<compile_context>
chip_gen: v7x
topology: tpu7x:2x2x1
jax: 0.10.0
libtpu: 0.0.40
codegen_flags: <defaults>
</compile_context>

<pallas_src>
import jax
import jax.numpy as jnp
from jax import lax
from jax.experimental import pallas as pl
from jax.experimental.pallas import tpu as pltpu

LANE = 128


def _round_up(x, m):
    return ((x + m - 1) // m) * m


def _vmem_limit_bytes(*byte_counts):
    """Scoped VMEM limit sized to the resident blocks (double-buffer margin),
    clamped to [32 MiB, 64 MiB] so it is valid on v5e/v6e/v7x."""
    need = int(sum(int(b) for b in byte_counts) * 2.5) + (4 << 20)
    return int(max(32 << 20, min(need, 64 << 20)))


def _pad_gate_cols(w, H, Hp):
    """(R, 4H) -> (R, 4Hp): each i/f/g/o slab starts at a lane-aligned k*Hp."""
    R = w.shape[0]
    return jnp.pad(w.reshape(R, 4, H),
                   ((0, 0), (0, 0), (0, Hp - H))).reshape(R, 4 * Hp)


# ----------------------------------------------------------------------------- #
# Gate math (PyTorch LSTM gate order i, f, g, o) on lane-aligned Hp-wide slabs.
# `gates` already holds the hoisted input projection + bias plus h @ W_hh (f32).
# ----------------------------------------------------------------------------- #
def _gate_math(gates, c, Hp):
    i = jax.nn.sigmoid(gates[:, 0 * Hp:1 * Hp])
    f = jax.nn.sigmoid(gates[:, 1 * Hp:2 * Hp])
    g = jnp.tanh(gates[:, 2 * Hp:3 * Hp])
    o = jax.nn.sigmoid(gates[:, 3 * Hp:4 * Hp])
    c_new = f * c + i * g
    h_new = o * jnp.tanh(c_new)
    return h_new, c_new


# ----------------------------------------------------------------------------- #
# Fused bidirectional encoder.  grid=(2,) over direction; time is an in-kernel
# fori_loop.  Both directions and their weights live in one array concatenated
# along the lane dimension, so the BlockSpec slices them without any wrapper
# copies.  The backward direction indexes the original time t_orig directly
# (no pre-reversed input, no post-reversed output).
# ----------------------------------------------------------------------------- #
def run_bi_encoder(pre_fb, whh_fb, lens_col, *, unroll):
    T, B, G2 = pre_fb.shape          # pre_fb: (T, B, 2*4Hp) bf16  [fwd | bwd]
    G = G2 // 2                      # 4 * Hp
    Hp = whh_fb.shape[0]             # whh_fb: (Hp, 2*4Hp) bf16   [fwd | bwd]

    def kernel(lens_ref, pre_ref, whh_ref, out_ref, hT_ref, cT_ref):
        d = pl.program_id(0)         # 0 = forward, 1 = backward
        whh = whh_ref[...]           # (Hp, G) bf16, resident for the whole loop
        lens = lens_ref[...]         # (B, 1) int32

        def step(t, carry):
            h, c = carry
            t_orig = jnp.where(d == 0, t, T - 1 - t)       # original time index
            m = t_orig < lens                              # (B, 1) bool mask
            gates = (pre_ref[t_orig].astype(jnp.float32)
                     + jnp.dot(h.astype(jnp.bfloat16), whh,
                               preferred_element_type=jnp.float32))
            hn, cn = _gate_math(gates, c, Hp)
            h = jnp.where(m, hn, h)
            c = jnp.where(m, cn, c)
            # pad_packed_sequence semantics: zeros at padded positions
            out_ref[t_orig] = jnp.where(m, hn, 0.0).astype(out_ref.dtype)
            return h, c

        z = jnp.zeros((B, Hp), jnp.float32)
        h_fin, c_fin = lax.fori_loop(0, T, step, (z, z), unroll=unroll)
        hT_ref[...] = h_fin          # final states written once, after the loop
        cT_ref[...] = c_fin

    vmem_bytes = _vmem_limit_bytes(pre_fb.nbytes, whh_fb.nbytes, lens_col.nbytes,
                                   T * B * 2 * Hp * 2, 2 * 2 * B * Hp * 4)
    out, hT, cT = pl.pallas_call(
        kernel,
        out_shape=(jax.ShapeDtypeStruct((T, B, 2 * Hp), jnp.bfloat16),
                   jax.ShapeDtypeStruct((2, B, Hp), jnp.float32),
                   jax.ShapeDtypeStruct((2, B, Hp), jnp.float32)),
        grid=(2,),
        in_specs=[pl.BlockSpec((B, 1), lambda d: (0, 0)),
                  pl.BlockSpec((T, B, G), lambda d: (0, 0, d)),
                  pl.BlockSpec((Hp, G), lambda d: (0, d))],
        out_specs=(pl.BlockSpec((T, B, Hp), lambda d: (0, 0, d)),
                   pl.BlockSpec((None, B, Hp), lambda d: (d, 0, 0)),
                   pl.BlockSpec((None, B, Hp), lambda d: (d, 0, 0))),
        compiler_params=pltpu.CompilerParams(
            dimension_semantics=("parallel",),
            vmem_limit_bytes=vmem_bytes),
    )(lens_col, pre_fb, whh_fb)
    return out, hT, cT


# ----------------------------------------------------------------------------- #
# Decoder recurrence: single kernel invocation (no grid), in-kernel time loop.
# Emits only the masked hidden states; hidden2tag/log_softmax are hoisted out.
# ----------------------------------------------------------------------------- #
def run_decoder(pre_d, whh, h0, c0, lens_col, *, unroll):
    T, B, G = pre_d.shape
    Hp = whh.shape[0]

    def kernel(lens_ref, pre_ref, whh_ref, h0_ref, c0_ref, hid_ref):
        w = whh_ref[...]             # (Hp, 4Hp) bf16
        lens = lens_ref[...]         # (B, 1) int32

        def step(t, carry):
            h, c = carry
            m = t < lens
            gates = (pre_ref[t].astype(jnp.float32)
                     + jnp.dot(h.astype(jnp.bfloat16), w,
                               preferred_element_type=jnp.float32))
            hn, cn = _gate_math(gates, c, Hp)
            h = jnp.where(m, hn, h)
            c = jnp.where(m, cn, c)
            hid_ref[t] = jnp.where(m, hn, 0.0).astype(hid_ref.dtype)
            return h, c

        lax.fori_loop(0, T, step, (h0_ref[...], c0_ref[...]), unroll=unroll)

    vmem = lambda: pl.BlockSpec(memory_space=pltpu.MemorySpace.VMEM)
    vmem_bytes = _vmem_limit_bytes(pre_d.nbytes, whh.nbytes, h0.nbytes,
                                   c0.nbytes, lens_col.nbytes, T * B * Hp * 2)
    return pl.pallas_call(
        kernel,
        out_shape=jax.ShapeDtypeStruct((T, B, Hp), jnp.bfloat16),
        in_specs=[vmem() for _ in range(5)],
        out_specs=vmem(),
        compiler_params=pltpu.CompilerParams(vmem_limit_bytes=vmem_bytes),
    )(lens_col, pre_d, whh, h0, c0)


# ----------------------------------------------------------------------------- #
# hidden2tag + log_softmax over the full (T*B, Hp) block.  The tag dimension is
# padded to a multiple of 128 so every output store is lane-dense; pad columns
# are masked to -inf before the softmax and sliced off in the wrapper.
# ----------------------------------------------------------------------------- #
def run_tag_projection(hid_flat, w_tag, b_tag, n_valid):
    M, Hp = hid_flat.shape
    Np = w_tag.shape[1]

    def kernel(h_ref, w_ref, b_ref, out_ref):
        logits = jnp.dot(h_ref[...], w_ref[...],
                         preferred_element_type=jnp.float32) + b_ref[...]
        col = lax.broadcasted_iota(jnp.int32, (M, Np), 1)
        logits = jnp.where(col < n_valid, logits, -1e30)
        mx = jnp.max(logits, axis=-1, keepdims=True)
        z = logits - mx
        out_ref[...] = z - jnp.log(jnp.sum(jnp.exp(z), axis=-1, keepdims=True))

    vmem = lambda: pl.BlockSpec(memory_space=pltpu.MemorySpace.VMEM)
    vmem_bytes = _vmem_limit_bytes(hid_flat.nbytes, w_tag.nbytes, b_tag.nbytes,
                                   M * Np * 4)
    return pl.pallas_call(
        kernel,
        out_shape=jax.ShapeDtypeStruct((M, Np), jnp.float32),
        in_specs=[vmem() for _ in range(3)],
        out_specs=vmem(),
        compiler_params=pltpu.CompilerParams(vmem_limit_bytes=vmem_bytes),
    )(hid_flat, w_tag, b_tag)


# ----------------------------------------------------------------------------- #
# Full forward.  Embedding gathers, the hoisted input-projection matmuls and the
# (tiny, one-time) weight padding stay in plain XLA.  Dropout p=0.0 -> identity,
# no extFeats, no elmo/bert -> plain word embeddings.
# ----------------------------------------------------------------------------- #
def lstm_tagger_focus_forward(params, word_seqs, tag_seqs, lengths):
    B, T = word_seqs.shape
    H = params["enc_whh_f"].shape[0]
    Ntag = params["tag_w"].shape[1]
    Hp = _round_up(H, LANE)
    G = 4 * Hp
    Np = _round_up(Ntag, LANE)
    unroll = True if T <= 16 else 8

    f32, bf16 = jnp.float32, jnp.bfloat16

    # ---- padded / fused weights (each gate slab lane-aligned at k*Hp) ----
    wih_f = _pad_gate_cols(params["enc_wih_f"], H, Hp)
    wih_b = _pad_gate_cols(params["enc_wih_b"], H, Hp)
    wih_fb = jnp.concatenate([wih_f, wih_b], axis=1).astype(bf16)        # (E, 2G)
    b_fb = jnp.concatenate([_pad_gate_cols(params["enc_b_f"], H, Hp),
                            _pad_gate_cols(params["enc_b_b"], H, Hp)],
                           axis=1)                                       # (1, 2G)

    whh_f = jnp.pad(_pad_gate_cols(params["enc_whh_f"], H, Hp),
                    ((0, Hp - H), (0, 0)))
    whh_b = jnp.pad(_pad_gate_cols(params["enc_whh_b"], H, Hp),
                    ((0, Hp - H), (0, 0)))
    whh_fb = jnp.concatenate([whh_f, whh_b], axis=1).astype(bf16)        # (Hp, 2G)

    W = params["dec_wih"]                    # rows: [out_f (H) | out_b (H) | te]
    Wf = jnp.pad(_pad_gate_cols(W[:H], H, Hp), ((0, Hp - H), (0, 0)))
    Wb = jnp.pad(_pad_gate_cols(W[H:2 * H], H, Hp), ((0, Hp - H), (0, 0)))
    W_fb = jnp.concatenate([Wf, Wb], axis=0).astype(bf16)                # (2Hp, G)
    Wt = _pad_gate_cols(W[2 * H:], H, Hp).astype(bf16)                   # (Te, G)
    dec_b = _pad_gate_cols(params["dec_b"], H, Hp)                       # (1, G)
    dec_whh = jnp.pad(_pad_gate_cols(params["dec_whh"], H, Hp),
                      ((0, Hp - H), (0, 0))).astype(bf16)                # (Hp, G)

    tag_w = jnp.pad(params["tag_w"],
                    ((0, Hp - H), (0, Np - Ntag))).astype(bf16)          # (Hp, Np)
    tag_b = jnp.pad(params["tag_b"], ((0, 0), (0, Np - Ntag)))           # (1, Np)

    # ---- embeddings (bf16 gathers) ----
    x = jnp.transpose(params["word_emb"].astype(bf16)[word_seqs], (1, 0, 2))
    te = jnp.transpose(params["tag_emb"].astype(bf16)[tag_seqs], (1, 0, 2))

    # ---- hoisted encoder input projection: x read once, fused fwd|bwd weights ----
    pre_fb = (jnp.einsum("tbe,eg->tbg", x, wih_fb,
                         preferred_element_type=f32) + b_fb).astype(bf16)  # (T,B,2G)

    lens_col = lengths.astype(jnp.int32).reshape(B, 1)

    enc_out, enc_hT, enc_cT = run_bi_encoder(pre_fb, whh_fb, lens_col,
                                             unroll=unroll)
    # index_select(enc_h_t, [1]) -> backward-direction final state as decoder init
    h0, c0 = enc_hT[1], enc_cT[1]

    # ---- decoder pregates without materializing [out_f | out_b | tag_embeds] ----
    pre_d = (jnp.einsum("tbh,hg->tbg", enc_out, W_fb, preferred_element_type=f32)
             + jnp.einsum("tbe,eg->tbg", te, Wt, preferred_element_type=f32)
             + dec_b).astype(bf16)                                        # (T,B,G)

    hid = run_decoder(pre_d, dec_whh, h0, c0, lens_col, unroll=unroll)    # (T,B,Hp)

    scores = run_tag_projection(hid.reshape(T * B, Hp), tag_w, tag_b, Ntag)
    scores = scores[:, :Ntag].reshape(T, B, Ntag)                         # drop pad
    return jnp.transpose(scores, (1, 0, 2))                               # (B,T,Ntag)


# ----------------------------------------------------------------------------- #
# Pure-JAX f32 reference (same masked-packed semantics) for a sanity check.
# ----------------------------------------------------------------------------- #
def _ref_cell(x_t, h, c, w_ih, w_hh, b):
    gates = x_t @ w_ih + h @ w_hh + b
    H = h.shape[-1]
    i = jax.nn.sigmoid(gates[:, :H])
    f = jax.nn.sigmoid(gates[:, H:2 * H])
    g = jnp.tanh(gates[:, 2 * H:3 * H])
    o = jax.nn.sigmoid(gates[:, 3 * H:])
    c_new = f * c + i * g
    h_new = o * jnp.tanh(c_new)
    return h_new, c_new


def _ref_lstm(x, mask, w_ih, w_hh, b, reverse, h0=None, c0=None):
    T, B, _ = x.shape
    H = w_hh.shape[0]
    h = jnp.zeros((B, H)) if h0 is None else h0
    c = jnp.zeros((B, H)) if c0 is None else c0
    outs = [None] * T
    steps = range(T - 1, -1, -1) if reverse else range(T)
    for t in steps:
        m = mask[t]
        hn, cn = _ref_cell(x[t], h, c, w_ih, w_hh, b)
        h = m * hn + (1 - m) * h
        c = m * cn + (1 - m) * c
        outs[t] = m * hn
    return jnp.stack(outs, axis=0), h, c


def reference_forward(params, word_seqs, tag_seqs, lengths):
    B, T = word_seqs.shape
    x = jnp.transpose(params["word_emb"][word_seqs], (1, 0, 2))
    te = jnp.transpose(params["tag_emb"][tag_seqs], (1, 0, 2))
    mask = (jnp.arange(T)[:, None] < lengths[None, :]).astype(jnp.float32)[..., None]
    out_f, _, _ = _ref_lstm(x, mask, params["enc_wih_f"], params["enc_whh_f"],
                            params["enc_b_f"], reverse=False)
    out_b, h_b, c_b = _ref_lstm(x, mask, params["enc_wih_b"], params["enc_whh_b"],
                                params["enc_b_b"], reverse=True)
    dec_in = jnp.concatenate([out_f, out_b, te], axis=-1)
    out_d, _, _ = _ref_lstm(dec_in, mask, params["dec_wih"], params["dec_whh"],
                            params["dec_b"], reverse=False, h0=h_b, c0=c_b)
    logits = out_d @ params["tag_w"] + params["tag_b"]
    scores = jax.nn.log_softmax(logits, axis=-1)
    return jnp.transpose(scores, (1, 0, 2))


# ----------------------------------------------------------------------------- #
def make_params(key, vocab, tagset, E, Te, H, initrange=0.2):
    ks = jax.random.split(key, 16)
    u = lambda k, shape: jax.random.uniform(k, shape, jnp.float32,
                                            -initrange, initrange)
    # encoder input dim = E, decoder input dim = 2H + Te; biases fold b_ih + b_hh
    return {
        "word_emb": u(ks[0], (vocab, E)),
        "tag_emb": u(ks[1], (tagset, Te)),
        "enc_wih_f": u(ks[2], (E, 4 * H)),
        "enc_whh_f": u(ks[3], (H, 4 * H)),
        "enc_b_f": u(ks[4], (1, 4 * H)),
        "enc_wih_b": u(ks[5], (E, 4 * H)),
        "enc_whh_b": u(ks[6], (H, 4 * H)),
        "enc_b_b": u(ks[7], (1, 4 * H)),
        "dec_wih": u(ks[8], (2 * H + Te, 4 * H)),
        "dec_whh": u(ks[9], (H, 4 * H)),
        "dec_b": u(ks[10], (1, 4 * H)),
        "tag_w": u(ks[11], (H, tagset)),
        "tag_b": u(ks[12], (1, tagset)),
    }


if __name__ == "__main__":
    B, T = 2, 8
    E, Te, H = 32, 16, 32
    vocab, tagset = 50, 16

    key = jax.random.PRNGKey(0)
    kp, kw, kt = jax.random.split(key, 3)
    params = make_params(kp, vocab, tagset, E, Te, H)

    word_seqs = jax.random.randint(kw, (B, T), 0, vocab)
    tag_seqs = jax.random.randint(kt, (B, T), 0, tagset)
    lengths = jnp.array([8, 6], dtype=jnp.int32)   # sorted descending, like packing

    fwd = jax.jit(lstm_tagger_focus_forward)
    tag_scores = jax.block_until_ready(fwd(params, word_seqs, tag_seqs, lengths))
    assert tag_scores.shape == (B, T, tagset)

    ref = jax.block_until_ready(
        reference_forward(params, word_seqs, tag_seqs, lengths))
    # bf16 MXU operands (f32 accumulate/gate math) -> looser-than-f32 tolerance.
    err = float(jnp.max(jnp.abs(tag_scores - ref)))
    assert jnp.allclose(tag_scores, ref, atol=1e-2, rtol=1e-2), err

    print("KERNEL_OK")
</pallas_src>

<mosaic_0001>
module attributes {stable_mosaic.version = 11 : i64} {
  func.func @kernel(%arg0: i32, %arg1: memref<2x1xi32, #tpu.memory_space<vmem>>, %arg2: memref<8x2x512xbf16, #tpu.memory_space<vmem>>, %arg3: memref<128x512xbf16, #tpu.memory_space<vmem>>, %arg4: memref<8x2x128xbf16, #tpu.memory_space<vmem>>, %arg5: memref<1x2x128xf32, #tpu.memory_space<vmem>>, %arg6: memref<1x2x128xf32, #tpu.memory_space<vmem>>) attributes {dimension_semantics = [#tpu.dimension_semantics<parallel>], iteration_bounds = array<i64: 2>, scalar_prefetch = 0 : i64, scratch_operands = 0 : i64, tpu.core_type = #tpu.core_type<tc>, window_params = [{pipeline_mode = #tpu.pipeline_mode<synchronous>, transform_indices = @transform_0, window_bounds = array<i64: 2, 1>}, {transform_indices = @transform_1, window_bounds = array<i64: 8, 2, 512>}, {transform_indices = @transform_2, window_bounds = array<i64: 128, 512>}, {transform_indices = @transform_3, window_bounds = array<i64: 8, 2, 128>}, {transform_indices = @transform_4, window_bounds = array<i64: 1, 2, 128>}, {transform_indices = @transform_5, window_bounds = array<i64: 1, 2, 128>}]} {
    %c0 = arith.constant 0 : index
    %c0_0 = arith.constant 0 : index
    %0 = vector.load %arg3[%c0, %c0_0] : memref<128x512xbf16, #tpu.memory_space<vmem>>, vector<128x512xbf16>
    %c0_1 = arith.constant 0 : index
    %c0_2 = arith.constant 0 : index
    %1 = vector.load %arg1[%c0_1, %c0_2] : memref<2x1xi32, #tpu.memory_space<vmem>>, vector<2x1xi32>
    %cst = arith.constant 0.000000e+00 : f32
    %2 = vector.broadcast %cst : f32 to vector<2x128xf32>
    %c0_i32 = arith.constant 0 : i32
    %c0_i32_3 = arith.constant 0 : i32
    %3 = arith.cmpi eq, %arg0, %c0_i32_3 : i32
    %c7_i32 = arith.constant 7 : i32
    %4 = arith.subi %c7_i32, %c0_i32 : i32
    %5 = arith.select %3, %c0_i32, %4 : i32
    %6 = vector.broadcast %5 : i32 to vector<2x1xi32>
    %7 = arith.cmpi slt, %6, %1 : vector<2x1xi32>
    %8 = arith.index_cast %5 : i32 to index
    %c0_4 = arith.constant 0 : index
    %c0_5 = arith.constant 0 : index
    %9 = vector.load %arg2[%8, %c0_4, %c0_5] : memref<8x2x512xbf16, #tpu.memory_space<vmem>>, vector<1x2x512xbf16>
    %10 = vector.shape_cast %9 : vector<1x2x512xbf16> to vector<2x512xbf16>
    %11 = arith.extf %10 : vector<2x512xbf16> to vector<2x512xf32>
    %12 = arith.truncf %2 : vector<2x128xf32> to vector<2x128xbf16>
    %cst_6 = arith.constant dense<0.000000e+00> : vector<2x512xf32>
    %13 = tpu.matmul %12, %0, %cst_6 {dimension_numbers = #tpu.dot_dimension_numbers<[1], [0], [0], [1], [0, 0, 1, 1], [], []>} : vector<2x128xbf16>, vector<128x512xbf16>, vector<2x512xf32> -> vector<2x512xf32>
    %14 = arith.addf %11, %13 : vector<2x512xf32>
    %15 = vector.extract_strided_slice %14 {offsets = [0, 0], sizes = [2, 128], strides = [1, 1]} : vector<2x512xf32> to vector<2x128xf32>
    %16 = arith.negf %15 : vector<2x128xf32>
    %17 = math.exp %16 : vector<2x128xf32>
    %cst_7 = arith.constant 1.000000e+00 : f32
    %18 = vector.broadcast %cst_7 : f32 to vector<2x128xf32>
    %19 = arith.addf %18, %17 : vector<2x128xf32>
    %20 = arith.divf %18, %19 : vector<2x128xf32>
    %21 = vector.extract_strided_slice %14 {offsets = [0, 128], sizes = [2, 128], strides = [1, 1]} : vector<2x512xf32> to vector<2x128xf32>
    %22 = arith.negf %21 : vector<2x128xf32>
    %23 = math.exp %22 : vector<2x128xf32>
    %cst_8 = arith.constant 1.000000e+00 : f32
    %24 = vector.broadcast %cst_8 : f32 to vector<2x128xf32>
    %25 = arith.addf %24, %23 : vector<2x128xf32>
    %26 = arith.divf %24, %25 : vector<2x128xf32>
    %27 = vector.extract_strided_slice %14 {offsets = [0, 256], sizes = [2, 128], strides = [1, 1]} : vector<2x512xf32> to vector<2x128xf32>
    %28 = math.tanh %27 : vector<2x128xf32>
    %29 = vector.extract_strided_slice %14 {offsets = [0, 384], sizes = [2, 128], strides = [1, 1]} : vector<2x512xf32> to vector<2x128xf32>
    %30 = arith.negf %29 : vector<2x128xf32>
    %31 = math.exp %30 : vector<2x128xf32>
    %cst_9 = arith.constant 1.000000e+00 : f32
    %32 = vector.broadcast %cst_9 : f32 to vector<2x128xf32>
    %33 = arith.addf %32, %31 : vector<2x128xf32>
    %34 = arith.divf %32, %33 : vector<2x128xf32>
    %35 = arith.mulf %26, %2 : vector<2x128xf32>
    %36 = arith.mulf %20, %28 : vector<2x128xf32>
    %37 = arith.addf %35, %36 : vector<2x128xf32>
    %38 = math.tanh %37 : vector<2x128xf32>
    %39 = arith.mulf %34, %38 : vector<2x128xf32>
    %40 = vector.shape_cast %7 : vector<2x1xi1> to vector<2x1xi1>
    %41 = vector.broadcast %40 : vector<2x1xi1> to vector<2x128xi1>
    %42 = arith.select %41, %39, %2 : vector<2x128xi1>, vector<2x128xf32>
    %43 = vector.shape_cast %7 : vector<2x1xi1> to vector<2x1xi1>
    %44 = vector.broadcast %43 : vector<2x1xi1> to vector<2x128xi1>
    %45 = arith.select %44, %37, %2 : vector<2x128xi1>, vector<2x128xf32>
    %cst_10 = arith.constant 0.000000e+00 : f32
    %46 = vector.shape_cast %7 : vector<2x1xi1> to vector<2x1xi1>
    %47 = vector.broadcast %46 : vector<2x1xi1> to vector<2x128xi1>
    %48 = vector.broadcast %cst_10 : f32 to vector<2x128xf32>
    %49 = arith.select %47, %39, %48 : vector<2x128xi1>, vector<2x128xf32>
    %50 = arith.truncf %49 : vector<2x128xf32> to vector<2x128xbf16>
    %51 = arith.index_cast %5 : i32 to index
    %c0_11 = arith.constant 0 : index
    %c0_12 = arith.constant 0 : index
    %52 = vector.load %arg4[%51, %c0_11, %c0_12] : memref<8x2x128xbf16, #tpu.memory_space<vmem>>, vector<1x2x128xbf16>
    %53 = vector.shape_cast %52 : vector<1x2x128xbf16> to vector<2x128xbf16>
    %54 = vector.shape_cast %50 : vector<2x128xbf16> to vector<1x2x128xbf16>
    tpu.vector_store %arg4[%51, %c0_11, %c0_12], %54 {strides = array<i32>} : memref<8x2x128xbf16, #tpu.memory_space<vmem>>, vector<1x2x128xbf16>,
    %c1_i32 = arith.constant 1 : i32
    %c0_i32_13 = arith.constant 0 : i32
    %55 = arith.cmpi eq, %arg0, %c0_i32_13 : i32
    %c7_i32_14 = arith.constant 7 : i32
    %56 = arith.subi %c7_i32_14, %c1_i32 : i32
    %57 = arith.select %55, %c1_i32, %56 : i32
    %58 = vector.broadcast %57 : i32 to vector<2x1xi32>
    %59 = arith.cmpi slt, %58, %1 : vector<2x1xi32>
    %60 = arith.index_cast %57 : i32 to index
    %c0_15 = arith.constant 0 : index
    %c0_16 = arith.constant 0 : index
    %61 = vector.load %arg2[%60, %c0_15, %c0_16] : memref<8x2x512xbf16, #tpu.memory_space<vmem>>, vector<1x2x512xbf16>
    %62 = vector.shape_cast %61 : vector<1x2x512xbf16> to vector<2x512xbf16>
    %63 = arith.extf %62 : vector<2x512xbf16> to vector<2x512xf32>
    %64 = arith.truncf %42 : vector<2x128xf32> to vector<2x128xbf16>
    %cst_17 = arith.constant dense<0.000000e+00> : vector<2x512xf32>
    %65 = tpu.matmul %64, %0, %cst_17 {dimension_numbers = #tpu.dot_dimension_numbers<[1], [0], [0], [1], [0, 0, 1, 1], [], []>} : vector<2x128xbf16>, vector<128x512xbf16>, vector<2x512xf32> -> vector<2x512xf32>
    %66 = arith.addf %63, %65 : vector<2x512xf32>
    %67 = vector.extract_strided_slice %66 {offsets = [0, 0], sizes = [2, 128], strides = [1, 1]} : vector<2x512xf32> to vector<2x128xf32>
    %68 = arith.negf %67 : vector<2x128xf32>
    %69 = math.exp %68 : vector<2x128xf32>
    %cst_18 = arith.constant 1.000000e+00 : f32
    %70 = vector.broadcast %cst_18 : f32 to vector<2x128xf32>
    %71 = arith.addf %70, %69 : vector<2x128xf32>
    %72 = arith.divf %70, %71 : vector<2x128xf32>
    %73 = vector.extract_strided_slice %66 {offsets = [0, 128], sizes = [2, 128], strides = [1, 1]} : vector<2x512xf32> to vector<2x128xf32>
    %74 = arith.negf %73 : vector<2x128xf32>
    %75 = math.exp %74 : vector<2x128xf32>
    %cst_19 = arith.constant 1.000000e+00 : f32
    %76 = vector.broadcast %cst_19 : f32 to vector<2x128xf32>
    %77 = arith.addf %76, %75 : vector<2x128xf32>
    %78 = arith.divf %76, %77 : vector<2x128xf32>
    %79 = vector.extract_strided_slice %66 {offsets = [0, 256], sizes = [2, 128], strides = [1, 1]} : vector<2x512xf32> to vector<2x128xf32>
    %80 = math.tanh %79 : vector<2x128xf32>
    %81 = vector.extract_strided_slice %66 {offsets = [0, 384], sizes = [2, 128], strides = [1, 1]} : vector<2x512xf32> to vector<2x128xf32>
    %82 = arith.negf %81 : vector<2x128xf32>
    %83 = math.exp %82 : vector<2x128xf32>
    %cst_20 = arith.constant 1.000000e+00 : f32
    %84 = vector.broadcast %cst_20 : f32 to vector<2x128xf32>
    %85 = arith.addf %84, %83 : vector<2x128xf32>
    %86 = arith.divf %84, %85 : vector<2x128xf32>
    %87 = arith.mulf %78, %45 : vector<2x128xf32>
    %88 = arith.mulf %72, %80 : vector<2x128xf32>
    %89 = arith.addf %87, %88 : vector<2x128xf32>
    %90 = math.tanh %89 : vector<2x128xf32>
    %91 = arith.mulf %86, %90 : vector<2x128xf32>
    %92 = vector.shape_cast %59 : vector<2x1xi1> to vector<2x1xi1>
    %93 = vector.broadcast %92 : vector<2x1xi1> to vector<2x128xi1>
    %94 = arith.select %93, %91, %42 : vector<2x128xi1>, vector<2x128xf32>
    %95 = vector.shape_cast %59 : vector<2x1xi1> to vector<2x1xi1>
    %96 = vector.broadcast %95 : vector<2x1xi1> to vector<2x128xi1>
    %97 = arith.select %96, %89, %45 : vector<2x128xi1>, vector<2x128xf32>
    %cst_21 = arith.constant 0.000000e+00 : f32
    %98 = vector.shape_cast %59 : vector<2x1xi1> to vector<2x1xi1>
    %99 = vector.broadcast %98 : vector<2x1xi1> to vector<2x128xi1>
    %100 = vector.broadcast %cst_21 : f32 to vector<2x128xf32>
    %101 = arith.select %99, %91, %100 : vector<2x128xi1>, vector<2x128xf32>
    %102 = arith.truncf %101 : vector<2x128xf32> to vector<2x128xbf16>
    %103 = arith.index_cast %57 : i32 to index
    %c0_22 = arith.constant 0 : index
    %c0_23 = arith.constant 0 : index
    %104 = vector.load %arg4[%103, %c0_22, %c0_23] : memref<8x2x128xbf16, #tpu.memory_space<vmem>>, vector<1x2x128xbf16>
    %105 = vector.shape_cast %104 : vector<1x2x128xbf16> to vector<2x128xbf16>
    %106 = vector.shape_cast %102 : vector<2x128xbf16> to vector<1x2x128xbf16>
    tpu.vector_store %arg4[%103, %c0_22, %c0_23], %106 {strides = array<i32>} : memref<8x2x128xbf16, #tpu.memory_space<vmem>>, vector<1x2x128xbf16>,
    %c2_i32 = arith.constant 2 : i32
    %c0_i32_24 = arith.constant 0 : i32
    %107 = arith.cmpi eq, %arg0, %c0_i32_24 : i32
    %c7_i32_25 = arith.constant 7 : i32
    %108 = arith.subi %c7_i32_25, %c2_i32 : i32
    %109 = arith.select %107, %c2_i32, %108 : i32
    %110 = vector.broadcast %109 : i32 to vector<2x1xi32>
    %111 = arith.cmpi slt, %110, %1 : vector<2x1xi32>
    %112 = arith.index_cast %109 : i32 to index
    %c0_26 = arith.constant 0 : index
    %c0_27 = arith.constant 0 : index
    %113 = vector.load %arg2[%112, %c0_26, %c0_27] : memref<8x2x512xbf16, #tpu.memory_space<vmem>>, vector<1x2x512xbf16>
    %114 = vector.shape_cast %113 : vector<1x2x512xbf16> to vector<2x512xbf16>
    %115 = arith.extf %114 : vector<2x512xbf16> to vector<2x512xf32>
    %116 = arith.truncf %94 : vector<2x128xf32> to vector<2x128xbf16>
    %cst_28 = arith.constant dense<0.000000e+00> : vector<2x512xf32>
    %117 = tpu.matmul %116, %0, %cst_28 {dimension_numbers = #tpu.dot_dimension_numbers<[1], [0], [0], [1], [0, 0, 1, 1], [], []>} : vector<2x128xbf16>, vector<128x512xbf16>, vector<2x512xf32> -> vector<2x512xf32>
    %118 = arith.addf %115, %117 : vector<2x512xf32>
    %119 = vector.extract_strided_slice %118 {offsets = [0, 0], sizes = [2, 128], strides = [1, 1]} : vector<2x512xf32> to vector<2x128xf32>
    %120 = arith.negf %119 : vector<2x128xf32>
    %121 = math.exp %120 : vector<2x128xf32>
    %cst_29 = arith.constant 1.000000e+00 : f32
    %122 = vector.broadcast %cst_29 : f32 to vector<2x128xf32>
    %123 = arith.addf %122, %121 : vector<2x128xf32>
    %124 = arith.divf %122, %123 : vector<2x128xf32>
    %125 = vector.extract_strided_slice %118 {offsets = [0, 128], sizes = [2, 128], strides = [1, 1]} : vector<2x512xf32> to vector<2x128xf32>
    %126 = arith.negf %125 : vector<2x128xf32>
    %127 = math.exp %126 : vector<2x128xf32>
    %cst_30 = arith.constant 1.000000e+00 : f32
    %128 = vector.broadcast %cst_30 : f32 to vector<2x128xf32>
    %129 = arith.addf %128, %127 : vector<2x128xf32>
    %130 = arith.divf %128, %129 : vector<2x128xf32>
    %131 = vector.extract_strided_slice %118 {offsets = [0, 256], sizes = [2, 128], strides = [1, 1]} : vector<2x512xf32> to vector<2x128xf32>
    %132 = math.tanh %131 : vector<2x128xf32>
    %133 = vector.extract_strided_slice %118 {offsets = [0, 384], sizes = [2, 128], strides = [1, 1]} : vector<2x512xf32> to vector<2x128xf32>
    %134 = arith.negf %133 : vector<2x128xf32>
    %135 = math.exp %134 : vector<2x128xf32>
    %cst_31 = arith.constant 1.000000e+00 : f32
    %136 = vector.broadcast %cst_31 : f32 to vector<2x128xf32>
    %137 = arith.addf %136, %135 : vector<2x128xf32>
    %138 = arith.divf %136, %137 : vector<2x128xf32>
    %139 = arith.mulf %130, %97 : vector<2x128xf32>
    %140 = arith.mulf %124, %132 : vector<2x128xf32>
    %141 = arith.addf %139, %140 : vector<2x128xf32>
    %142 = math.tanh %141 : vector<2x128xf32>
    %143 = arith.mulf %138, %142 : vector<2x128xf32>
    %144 = vector.shape_cast %111 : vector<2x1xi1> to vector<2x1xi1>
    %145 = vector.broadcast %144 : vector<2x1xi1> to vector<2x128xi1>
    %146 = arith.select %145, %143, %94 : vector<2x128xi1>, vector<2x128xf32>
    %147 = vector.shape_cast %111 : vector<2x1xi1> to vector<2x1xi1>
    %148 = vector.broadcast %147 : vector<2x1xi1> to vector<2x128xi1>
    %149 = arith.select %148, %141, %97 : vector<2x128xi1>, vector<2x128xf32>
    %cst_32 = arith.constant 0.000000e+00 : f32
    %150 = vector.shape_cast %111 : vector<2x1xi1> to vector<2x1xi1>
    %151 = vector.broadcast %150 : vector<2x1xi1> to vector<2x128xi1>
    %152 = vector.broadcast %cst_32 : f32 to vector<2x128xf32>
    %153 = arith.select %151, %143, %152 : vector<2x128xi1>, vector<2x128xf32>
    %154 = arith.truncf %153 : vector<2x128xf32> to vector<2x128xbf16>
    %155 = arith.index_cast %109 : i32 to index
    %c0_33 = arith.constant 0 : index
    %c0_34 = arith.constant 0 : index
    %156 = vector.load %arg4[%155, %c0_33, %c0_34] : memref<8x2x128xbf16, #tpu.memory_space<vmem>>, vector<1x2x128xbf16>
    %157 = vector.shape_cast %156 : vector<1x2x128xbf16> to vector<2x128xbf16>
    %158 = vector.shape_cast %154 : vector<2x128xbf16> to vector<1x2x128xbf16>
    tpu.vector_store %arg4[%155, %c0_33, %c0_34], %158 {strides = array<i32>} : memref<8x2x128xbf16, #tpu.memory_space<vmem>>, vector<1x2x128xbf16>,
    %c3_i32 = arith.constant 3 : i32
    %c0_i32_35 = arith.constant 0 : i32
    %159 = arith.cmpi eq, %arg0, %c0_i32_35 : i32
    %c7_i32_36 = arith.constant 7 : i32
    %160 = arith.subi %c7_i32_36, %c3_i32 : i32
    %161 = arith.select %159, %c3_i32, %160 : i32
    %162 = vector.broadcast %161 : i32 to vector<2x1xi32>
    %163 = arith.cmpi slt, %162, %1 : vector<2x1xi32>
    %164 = arith.index_cast %161 : i32 to index
    %c0_37 = arith.constant 0 : index
    %c0_38 = arith.constant 0 : index
    %165 = vector.load %arg2[%164, %c0_37, %c0_38] : memref<8x2x512xbf16, #tpu.memory_space<vmem>>, vector<1x2x512xbf16>
    %166 = vector.shape_cast %165 : vector<1x2x512xbf16> to vector<2x512xbf16>
    %167 = arith.extf %166 : vector<2x512xbf16> to vector<2x512xf32>
    %168 = arith.truncf %146 : vector<2x128xf32> to vector<2x128xbf16>
    %cst_39 = arith.constant dense<0.000000e+00> : vector<2x512xf32>
    %169 = tpu.matmul %168, %0, %cst_39 {dimension_numbers = #tpu.dot_dimension_numbers<[1], [0], [0], [1], [0, 0, 1, 1], [], []>} : vector<2x128xbf16>, vector<128x512xbf16>, vector<2x512xf32> -> vector<2x512xf32>
    %170 = arith.addf %167, %169 : vector<2x512xf32>
    %171 = vector.extract_strided_slice %170 {offsets = [0, 0], sizes = [2, 128], strides = [1, 1]} : vector<2x512xf32> to vector<2x128xf32>
    %172 = arith.negf %171 : vector<2x128xf32>
    %173 = math.exp %172 : vector<2x128xf32>
    %cst_40 = arith.constant 1.000000e+00 : f32
    %174 = vector.broadcast %cst_40 : f32 to vector<2x128xf32>
    %175 = arith.addf %174, %173 : vector<2x128xf32>
    %176 = arith.divf %174, %175 : vector<2x128xf32>
    %177 = vector.extract_strided_slice %170 {offsets = [0, 128], sizes = [2, 128], strides = [1, 1]} : vector<2x512xf32> to vector<2x128xf32>
    %178 = arith.negf %177 : vector<2x128xf32>
    %179 = math.exp %178 : vector<2x128xf32>
    %cst_41 = arith.constant 1.000000e+00 : f32
    %180 = vector.broadcast %cst_41 : f32 to vector<2x128xf32>
    %181 = arith.addf %180, %179 : vector<2x128xf32>
    %182 = arith.divf %180, %181 : vector<2x128xf32>
    %183 = vector.extract_strided_slice %170 {offsets = [0, 256], sizes = [2, 128], strides = [1, 1]} : vector<2x512xf32> to vector<2x128xf32>
    %184 = math.tanh %183 : vector<2x128xf32>
    %185 = vector.extract_strided_slice %170 {offsets = [0, 384], sizes = [2, 128], strides = [1, 1]} : vector<2x512xf32> to vector<2x128xf32>
    %186 = arith.negf %185 : vector<2x128xf32>
    %187 = math.exp %186 : vector<2x128xf32>
    %cst_42 = arith.constant 1.000000e+00 : f32
    %188 = vector.broadcast %cst_42 : f32 to vector<2x128xf32>
    %189 = arith.addf %188, %187 : vector<2x128xf32>
    %190 = arith.divf %188, %189 : vector<2x128xf32>
    %191 = arith.mulf %182, %149 : vector<2x128xf32>
    %192 = arith.mulf %176, %184 : vector<2x128xf32>
    %193 = arith.addf %191, %192 : vector<2x128xf32>
    %194 = math.tanh %193 : vector<2x128xf32>
    %195 = arith.mulf %190, %194 : vector<2x128xf32>
    %196 = vector.shape_cast %163 : vector<2x1xi1> to vector<2x1xi1>
    %197 = vector.broadcast %196 : vector<2x1xi1> to vector<2x128xi1>
    %198 = arith.select %197, %195, %146 : vector<2x128xi1>, vector<2x128xf32>
    %199 = vector.shape_cast %163 : vector<2x1xi1> to vector<2x1xi1>
    %200 = vector.broadcast %199 : vector<2x1xi1> to vector<2x128xi1>
    %201 = arith.select %200, %193, %149 : vector<2x128xi1>, vector<2x128xf32>
    %cst_43 = arith.constant 0.000000e+00 : f32
    %202 = vector.shape_cast %163 : vector<2x1xi1> to vector<2x1xi1>
    %203 = vector.broadcast %202 : vector<2x1xi1> to vector<2x128xi1>
    %204 = vector.broadcast %cst_43 : f32 to vector<2x128xf32>
    %205 = arith.select %203, %195, %204 : vector<2x128xi1>, vector<2x128xf32>
    %206 = arith.truncf %205 : vector<2x128xf32> to vector<2x128xbf16>
    %207 = arith.index_cast %161 : i32 to index
    %c0_44 = arith.constant 0 : index
    %c0_45 = arith.constant 0 : index
    %208 = vector.load %arg4[%207, %c0_44, %c0_45] : memref<8x2x128xbf16, #tpu.memory_space<vmem>>, vector<1x2x128xbf16>
    %209 = vector.shape_cast %208 : vector<1x2x128xbf16> to vector<2x128xbf16>
    %210 = vector.shape_cast %206 : vector<2x128xbf16> to vector<1x2x128xbf16>
    tpu.vector_store %arg4[%207, %c0_44, %c0_45], %210 {strides = array<i32>} : memref<8x2x128xbf16, #tpu.memory_space<vmem>>, vector<1x2x128xbf16>,
    %c4_i32 = arith.constant 4 : i32
    %c0_i32_46 = arith.constant 0 : i32
    %211 = arith.cmpi eq, %arg0, %c0_i32_46 : i32
    %c7_i32_47 = arith.constant 7 : i32
    %212 = arith.subi %c7_i32_47, %c4_i32 : i32
    %213 = arith.select %211, %c4_i32, %212 : i32
    %214 = vector.broadcast %213 : i32 to vector<2x1xi32>
    %215 = arith.cmpi slt, %214, %1 : vector<2x1xi32>
    %216 = arith.index_cast %213 : i32 to index
    %c0_48 = arith.constant 0 : index
    %c0_49 = arith.constant 0 : index
    %217 = vector.load %arg2[%216, %c0_48, %c0_49] : memref<8x2x512xbf16, #tpu.memory_space<vmem>>, vector<1x2x512xbf16>
    %218 = vector.shape_cast %217 : vector<1x2x512xbf16> to vector<2x512xbf16>
    %219 = arith.extf %218 : vector<2x512xbf16> to vector<2x512xf32>
    %220 = arith.truncf %198 : vector<2x128xf32> to vector<2x128xbf16>
    %cst_50 = arith.constant dense<0.000000e+00> : vector<2x512xf32>
    %221 = tpu.matmul %220, %0, %cst_50 {dimension_numbers = #tpu.dot_dimension_numbers<[1], [0], [0], [1], [0, 0, 1, 1], [], []>} : vector<2x128xbf16>, vector<128x512xbf16>, vector<2x512xf32> -> vector<2x512xf32>
    %222 = arith.addf %219, %221 : vector<2x512xf32>
    %223 = vector.extract_strided_slice %222 {offsets = [0, 0], sizes = [2, 128], strides = [1, 1]} : vector<2x512xf32> to vector<2x128xf32>
    %224 = arith.negf %223 : vector<2x128xf32>
    %225 = math.exp %224 : vector<2x128xf32>
    %cst_51 = arith.constant 1.000000e+00 : f32
    %226 = vector.broadcast %cst_51 : f32 to vector<2x128xf32>
    %227 = arith.addf %226, %225 : vector<2x128xf32>
    %228 = arith.divf %226, %227 : vector<2x128xf32>
    %229 = vector.extract_strided_slice %222 {offsets = [0, 128], sizes = [2, 128], strides = [1, 1]} : vector<2x512xf32> to vector<2x128xf32>
    %230 = arith.negf %229 : vector<2x128xf32>
    %231 = math.exp %230 : vector<2x128xf32>
    %cst_52 = arith.constant 1.000000e+00 : f32
    %232 = vector.broadcast %cst_52 : f32 to vector<2x128xf32>
    %233 = arith.addf %232, %231 : vector<2x128xf32>
    %234 = arith.divf %232, %233 : vector<2x128xf32>
    %235 = vector.extract_strided_slice %222 {offsets = [0, 256], sizes = [2, 128], strides = [1, 1]} : vector<2x512xf32> to vector<2x128xf32>
    %236 = math.tanh %235 : vector<2x128xf32>
    %237 = vector.extract_strided_slice %222 {offsets = [0, 384], sizes = [2, 128], strides = [1, 1]} : vector<2x512xf32> to vector<2x128xf32>
    %238 = arith.negf %237 : vector<2x128xf32>
    %239 = math.exp %238 : vector<2x128xf32>
    %cst_53 = arith.constant 1.000000e+00 : f32
    %240 = vector.broadcast %cst_53 : f32 to vector<2x128xf32>
    %241 = arith.addf %240, %239 : vector<2x128xf32>
    %242 = arith.divf %240, %241 : vector<2x128xf32>
    %243 = arith.mulf %234, %201 : vector<2x128xf32>
    %244 = arith.mulf %228, %236 : vector<2x128xf32>
    %245 = arith.addf %243, %244 : vector<2x128xf32>
    %246 = math.tanh %245 : vector<2x128xf32>
    %247 = arith.mulf %242, %246 : vector<2x128xf32>
    %248 = vector.shape_cast %215 : vector<2x1xi1> to vector<2x1xi1>
    %249 = vector.broadcast %248 : vector<2x1xi1> to vector<2x128xi1>
    %250 = arith.select %249, %247, %198 : vector<2x128xi1>, vector<2x128xf32>
    %251 = vector.shape_cast %215 : vector<2x1xi1> to vector<2x1xi1>
    %252 = vector.broadcast %251 : vector<2x1xi1> to vector<2x128xi1>
    %253 = arith.select %252, %245, %201 : vector<2x128xi1>, vector<2x128xf32>
    %cst_54 = arith.constant 0.000000e+00 : f32
    %254 = vector.shape_cast %215 : vector<2x1xi1> to vector<2x1xi1>
    %255 = vector.broadcast %254 : vector<2x1xi1> to vector<2x128xi1>
    %256 = vector.broadcast %cst_54 : f32 to vector<2x128xf32>
    %257 = arith.select %255, %247, %256 : vector<2x128xi1>, vector<2x128xf32>
    %258 = arith.truncf %257 : vector<2x128xf32> to vector<2x128xbf16>
    %259 = arith.index_cast %213 : i32 to index
    %c0_55 = arith.constant 0 : index
    %c0_56 = arith.constant 0 : index
    %260 = vector.load %arg4[%259, %c0_55, %c0_56] : memref<8x2x128xbf16, #tpu.memory_space<vmem>>, vector<1x2x128xbf16>
    %261 = vector.shape_cast %260 : vector<1x2x128xbf16> to vector<2x128xbf16>
    %262 = vector.shape_cast %258 : vector<2x128xbf16> to vector<1x2x128xbf16>
    tpu.vector_store %arg4[%259, %c0_55, %c0_56], %262 {strides = array<i32>} : memref<8x2x128xbf16, #tpu.memory_space<vmem>>, vector<1x2x128xbf16>,
    %c5_i32 = arith.constant 5 : i32
    %c0_i32_57 = arith.constant 0 : i32
    %263 = arith.cmpi eq, %arg0, %c0_i32_57 : i32
    %c7_i32_58 = arith.constant 7 : i32
    %264 = arith.subi %c7_i32_58, %c5_i32 : i32
    %265 = arith.select %263, %c5_i32, %264 : i32
    %266 = vector.broadcast %265 : i32 to vector<2x1xi32>
    %267 = arith.cmpi slt, %266, %1 : vector<2x1xi32>
    %268 = arith.index_cast %265 : i32 to index
    %c0_59 = arith.constant 0 : index
    %c0_60 = arith.constant 0 : index
    %269 = vector.load %arg2[%268, %c0_59, %c0_60] : memref<8x2x512xbf16, #tpu.memory_space<vmem>>, vector<1x2x512xbf16>
    %270 = vector.shape_cast %269 : vector<1x2x512xbf16> to vector<2x512xbf16>
    %271 = arith.extf %270 : vector<2x512xbf16> to vector<2x512xf32>
    %272 = arith.truncf %250 : vector<2x128xf32> to vector<2x128xbf16>
    %cst_61 = arith.constant dense<0.000000e+00> : vector<2x512xf32>
    %273 = tpu.matmul %272, %0, %cst_61 {dimension_numbers = #tpu.dot_dimension_numbers<[1], [0], [0], [1], [0, 0, 1, 1], [], []>} : vector<2x128xbf16>, vector<128x512xbf16>, vector<2x512xf32> -> vector<2x512xf32>
    %274 = arith.addf %271, %273 : vector<2x512xf32>
    %275 = vector.extract_strided_slice %274 {offsets = [0, 0], sizes = [2, 128], strides = [1, 1]} : vector<2x512xf32> to vector<2x128xf32>
    %276 = arith.negf %275 : vector<2x128xf32>
    %277 = math.exp %276 : vector<2x128xf32>
    %cst_62 = arith.constant 1.000000e+00 : f32
    %278 = vector.broadcast %cst_62 : f32 to vector<2x128xf32>
    %279 = arith.addf %278, %277 : vector<2x128xf32>
    %280 = arith.divf %278, %279 : vector<2x128xf32>
    %281 = vector.extract_strided_slice %274 {offsets = [0, 128], sizes = [2, 128], strides = [1, 1]} : vector<2x512xf32> to vector<2x128xf32>
    %282 = arith.negf %281 : vector<2x128xf32>
    %283 = math.exp %282 : vector<2x128xf32>
    %cst_63 = arith.constant 1.000000e+00 : f32
    %284 = vector.broadcast %cst_63 : f32 to vector<2x128xf32>
    %285 = arith.addf %284, %283 : vector<2x128xf32>
    %286 = arith.divf %284, %285 : vector<2x128xf32>
    %287 = vector.extract_strided_slice %274 {offsets = [0, 256], sizes = [2, 128], strides = [1, 1]} : vector<2x512xf32> to vector<2x128xf32>
    %288 = math.tanh %287 : vector<2x128xf32>
    %289 = vector.extract_strided_slice %274 {offsets = [0, 384], sizes = [2, 128], strides = [1, 1]} : vector<2x512xf32> to vector<2x128xf32>
    %290 = arith.negf %289 : vector<2x128xf32>
    %291 = math.exp %290 : vector<2x128xf32>
    %cst_64 = arith.constant 1.000000e+00 : f32
    %292 = vector.broadcast %cst_64 : f32 to vector<2x128xf32>
    %293 = arith.addf %292, %291 : vector<2x128xf32>
    %294 = arith.divf %292, %293 : vector<2x128xf32>
    %295 = arith.mulf %286, %253 : vector<2x128xf32>
    %296 = arith.mulf %280, %288 : vector<2x128xf32>
    %297 = arith.addf %295, %296 : vector<2x128xf32>
    %298 = math.tanh %297 : vector<2x128xf32>
    %299 = arith.mulf %294, %298 : vector<2x128xf32>
    %300 = vector.shape_cast %267 : vector<2x1xi1> to vector<2x1xi1>
    %301 = vector.broadcast %300 : vector<2x1xi1> to vector<2x128xi1>
    %302 = arith.select %301, %299, %250 : vector<2x128xi1>, vector<2x128xf32>
    %303 = vector.shape_cast %267 : vector<2x1xi1> to vector<2x1xi1>
    %304 = vector.broadcast %303 : vector<2x1xi1> to vector<2x128xi1>
    %305 = arith.select %304, %297, %253 : vector<2x128xi1>, vector<2x128xf32>
    %cst_65 = arith.constant 0.000000e+00 : f32
    %306 = vector.shape_cast %267 : vector<2x1xi1> to vector<2x1xi1>
    %307 = vector.broadcast %306 : vector<2x1xi1> to vector<2x128xi1>
    %308 = vector.broadcast %cst_65 : f32 to vector<2x128xf32>
    %309 = arith.select %307, %299, %308 : vector<2x128xi1>, vector<2x128xf32>
    %310 = arith.truncf %309 : vector<2x128xf32> to vector<2x128xbf16>
    %311 = arith.index_cast %265 : i32 to index
    %c0_66 = arith.constant 0 : index
    %c0_67 = arith.constant 0 : index
    %312 = vector.load %arg4[%311, %c0_66, %c0_67] : memref<8x2x128xbf16, #tpu.memory_space<vmem>>, vector<1x2x128xbf16>
    %313 = vector.shape_cast %312 : vector<1x2x128xbf16> to vector<2x128xbf16>
    %314 = vector.shape_cast %310 : vector<2x128xbf16> to vector<1x2x128xbf16>
    tpu.vector_store %arg4[%311, %c0_66, %c0_67], %314 {strides = array<i32>} : memref<8x2x128xbf16, #tpu.memory_space<vmem>>, vector<1x2x128xbf16>,
    %c6_i32 = arith.constant 6 : i32
    %c0_i32_68 = arith.constant 0 : i32
    %315 = arith.cmpi eq, %arg0, %c0_i32_68 : i32
    %c7_i32_69 = arith.constant 7 : i32
    %316 = arith.subi %c7_i32_69, %c6_i32 : i32
    %317 = arith.select %315, %c6_i32, %316 : i32
    %318 = vector.broadcast %317 : i32 to vector<2x1xi32>
    %319 = arith.cmpi slt, %318, %1 : vector<2x1xi32>
    %320 = arith.index_cast %317 : i32 to index
    %c0_70 = arith.constant 0 : index
    %c0_71 = arith.constant 0 : index
    %321 = vector.load %arg2[%320, %c0_70, %c0_71] : memref<8x2x512xbf16, #tpu.memory_space<vmem>>, vector<1x2x512xbf16>
    %322 = vector.shape_cast %321 : vector<1x2x512xbf16> to vector<2x512xbf16>
    %323 = arith.extf %322 : vector<2x512xbf16> to vector<2x512xf32>
    %324 = arith.truncf %302 : vector<2x128xf32> to vector<2x128xbf16>
    %cst_72 = arith.constant dense<0.000000e+00> : vector<2x512xf32>
    %325 = tpu.matmul %324, %0, %cst_72 {dimension_numbers = #tpu.dot_dimension_numbers<[1], [0], [0], [1], [0, 0, 1, 1], [], []>} : vector<2x128xbf16>, vector<128x512xbf16>, vector<2x512xf32> -> vector<2x512xf32>
    %326 = arith.addf %323, %325 : vector<2x512xf32>
    %327 = vector.extract_strided_slice %326 {offsets = [0, 0], sizes = [2, 128], strides = [1, 1]} : vector<2x512xf32> to vector<2x128xf32>
    %328 = arith.negf %327 : vector<2x128xf32>
    %329 = math.exp %328 : vector<2x128xf32>
    %cst_73 = arith.constant 1.000000e+00 : f32
    %330 = vector.broadcast %cst_73 : f32 to vector<2x128xf32>
    %331 = arith.addf %330, %329 : vector<2x128xf32>
    %332 = arith.divf %330, %331 : vector<2x128xf32>
    %333 = vector.extract_strided_slice %326 {offsets = [0, 128], sizes = [2, 128], strides = [1, 1]} : vector<2x512xf32> to vector<2x128xf32>
    %334 = arith.negf %333 : vector<2x128xf32>
    %335 = math.exp %334 : vector<2x128xf32>
    %cst_74 = arith.constant 1.000000e+00 : f32
    %336 = vector.broadcast %cst_74 : f32 to vector<2x128xf32>
    %337 = arith.addf %336, %335 : vector<2x128xf32>
    %338 = arith.divf %336, %337 : vector<2x128xf32>
    %339 = vector.extract_strided_slice %326 {offsets = [0, 256], sizes = [2, 128], strides = [1, 1]} : vector<2x512xf32> to vector<2x128xf32>
    %340 = math.tanh %339 : vector<2x128xf32>
    %341 = vector.extract_strided_slice %326 {offsets = [0, 384], sizes = [2, 128], strides = [1, 1]} : vector<2x512xf32> to vector<2x128xf32>
    %342 = arith.negf %341 : vector<2x128xf32>
    %343 = math.exp %342 : vector<2x128xf32>
    %cst_75 = arith.constant 1.000000e+00 : f32
    %344 = vector.broadcast %cst_75 : f32 to vector<2x128xf32>
    %345 = arith.addf %344, %343 : vector<2x128xf32>
    %346 = arith.divf %344, %345 : vector<2x128xf32>
    %347 = arith.mulf %338, %305 : vector<2x128xf32>
    %348 = arith.mulf %332, %340 : vector<2x128xf32>
    %349 = arith.addf %347, %348 : vector<2x128xf32>
    %350 = math.tanh %349 : vector<2x128xf32>
    %351 = arith.mulf %346, %350 : vector<2x128xf32>
    %352 = vector.shape_cast %319 : vector<2x1xi1> to vector<2x1xi1>
    %353 = vector.broadcast %352 : vector<2x1xi1> to vector<2x128xi1>
    %354 = arith.select %353, %351, %302 : vector<2x128xi1>, vector<2x128xf32>
    %355 = vector.shape_cast %319 : vector<2x1xi1> to vector<2x1xi1>
    %356 = vector.broadcast %355 : vector<2x1xi1> to vector<2x128xi1>
    %357 = arith.select %356, %349, %305 : vector<2x128xi1>, vector<2x128xf32>
    %cst_76 = arith.constant 0.000000e+00 : f32
    %358 = vector.shape_cast %319 : vector<2x1xi1> to vector<2x1xi1>
    %359 = vector.broadcast %358 : vector<2x1xi1> to vector<2x128xi1>
    %360 = vector.broadcast %cst_76 : f32 to vector<2x128xf32>
    %361 = arith.select %359, %351, %360 : vector<2x128xi1>, vector<2x128xf32>
    %362 = arith.truncf %361 : vector<2x128xf32> to vector<2x128xbf16>
    %363 = arith.index_cast %317 : i32 to index
    %c0_77 = arith.constant 0 : index
    %c0_78 = arith.constant 0 : index
    %364 = vector.load %arg4[%363, %c0_77, %c0_78] : memref<8x2x128xbf16, #tpu.memory_space<vmem>>, vector<1x2x128xbf16>
    %365 = vector.shape_cast %364 : vector<1x2x128xbf16> to vector<2x128xbf16>
    %366 = vector.shape_cast %362 : vector<2x128xbf16> to vector<1x2x128xbf16>
    tpu.vector_store %arg4[%363, %c0_77, %c0_78], %366 {strides = array<i32>} : memref<8x2x128xbf16, #tpu.memory_space<vmem>>, vector<1x2x128xbf16>,
    %c7_i32_79 = arith.constant 7 : i32
    %c0_i32_80 = arith.constant 0 : i32
    %367 = arith.cmpi eq, %arg0, %c0_i32_80 : i32
    %c7_i32_81 = arith.constant 7 : i32
    %368 = arith.subi %c7_i32_81, %c7_i32_79 : i32
    %369 = arith.select %367, %c7_i32_79, %368 : i32
    %370 = vector.broadcast %369 : i32 to vector<2x1xi32>
    %371 = arith.cmpi slt, %370, %1 : vector<2x1xi32>
    %372 = arith.index_cast %369 : i32 to index
    %c0_82 = arith.constant 0 : index
    %c0_83 = arith.constant 0 : index
    %373 = vector.load %arg2[%372, %c0_82, %c0_83] : memref<8x2x512xbf16, #tpu.memory_space<vmem>>, vector<1x2x512xbf16>
    %374 = vector.shape_cast %373 : vector<1x2x512xbf16> to vector<2x512xbf16>
    %375 = arith.extf %374 : vector<2x512xbf16> to vector<2x512xf32>
    %376 = arith.truncf %354 : vector<2x128xf32> to vector<2x128xbf16>
    %cst_84 = arith.constant dense<0.000000e+00> : vector<2x512xf32>
    %377 = tpu.matmul %376, %0, %cst_84 {dimension_numbers = #tpu.dot_dimension_numbers<[1], [0], [0], [1], [0, 0, 1, 1], [], []>} : vector<2x128xbf16>, vector<128x512xbf16>, vector<2x512xf32> -> vector<2x512xf32>
    %378 = arith.addf %375, %377 : vector<2x512xf32>
    %379 = vector.extract_strided_slice %378 {offsets = [0, 0], sizes = [2, 128], strides = [1, 1]} : vector<2x512xf32> to vector<2x128xf32>
    %380 = arith.negf %379 : vector<2x128xf32>
    %381 = math.exp %380 : vector<2x128xf32>
    %cst_85 = arith.constant 1.000000e+00 : f32
    %382 = vector.broadcast %cst_85 : f32 to vector<2x128xf32>
    %383 = arith.addf %382, %381 : vector<2x128xf32>
    %384 = arith.divf %382, %383 : vector<2x128xf32>
    %385 = vector.extract_strided_slice %378 {offsets = [0, 128], sizes = [2, 128], strides = [1, 1]} : vector<2x512xf32> to vector<2x128xf32>
    %386 = arith.negf %385 : vector<2x128xf32>
    %387 = math.exp %386 : vector<2x128xf32>
    %cst_86 = arith.constant 1.000000e+00 : f32
    %388 = vector.broadcast %cst_86 : f32 to vector<2x128xf32>
    %389 = arith.addf %388, %387 : vector<2x128xf32>
    %390 = arith.divf %388, %389 : vector<2x128xf32>
    %391 = vector.extract_strided_slice %378 {offsets = [0, 256], sizes = [2, 128], strides = [1, 1]} : vector<2x512xf32> to vector<2x128xf32>
    %392 = math.tanh %391 : vector<2x128xf32>
    %393 = vector.extract_strided_slice %378 {offsets = [0, 384], sizes = [2, 128], strides = [1, 1]} : vector<2x512xf32> to vector<2x128xf32>
    %394 = arith.negf %393 : vector<2x128xf32>
    %395 = math.exp %394 : vector<2x128xf32>
    %cst_87 = arith.constant 1.000000e+00 : f32
    %396 = vector.broadcast %cst_87 : f32 to vector<2x128xf32>
    %397 = arith.addf %396, %395 : vector<2x128xf32>
    %398 = arith.divf %396, %397 : vector<2x128xf32>
    %399 = arith.mulf %390, %357 : vector<2x128xf32>
    %400 = arith.mulf %384, %392 : vector<2x128xf32>
    %401 = arith.addf %399, %400 : vector<2x128xf32>
    %402 = math.tanh %401 : vector<2x128xf32>
    %403 = arith.mulf %398, %402 : vector<2x128xf32>
    %404 = vector.shape_cast %371 : vector<2x1xi1> to vector<2x1xi1>
    %405 = vector.broadcast %404 : vector<2x1xi1> to vector<2x128xi1>
    %406 = arith.select %405, %403, %354 : vector<2x128xi1>, vector<2x128xf32>
    %407 = vector.shape_cast %371 : vector<2x1xi1> to vector<2x1xi1>
    %408 = vector.broadcast %407 : vector<2x1xi1> to vector<2x128xi1>
    %409 = arith.select %408, %401, %357 : vector<2x128xi1>, vector<2x128xf32>
    %cst_88 = arith.constant 0.000000e+00 : f32
    %410 = vector.shape_cast %371 : vector<2x1xi1> to vector<2x1xi1>
    %411 = vector.broadcast %410 : vector<2x1xi1> to vector<2x128xi1>
    %412 = vector.broadcast %cst_88 : f32 to vector<2x128xf32>
    %413 = arith.select %411, %403, %412 : vector<2x128xi1>, vector<2x128xf32>
    %414 = arith.truncf %413 : vector<2x128xf32> to vector<2x128xbf16>
    %415 = arith.index_cast %369 : i32 to index
    %c0_89 = arith.constant 0 : index
    %c0_90 = arith.constant 0 : index
    %416 = vector.load %arg4[%415, %c0_89, %c0_90] : memref<8x2x128xbf16, #tpu.memory_space<vmem>>, vector<1x2x128xbf16>
    %417 = vector.shape_cast %416 : vector<1x2x128xbf16> to vector<2x128xbf16>
    %418 = vector.shape_cast %414 : vector<2x128xbf16> to vector<1x2x128xbf16>
    tpu.vector_store %arg4[%415, %c0_89, %c0_90], %418 {strides = array<i32>} : memref<8x2x128xbf16, #tpu.memory_space<vmem>>, vector<1x2x128xbf16>,
    %c8_i32 = arith.constant 8 : i32
    %c0_91 = arith.constant 0 : index
    %c0_92 = arith.constant 0 : index
    %c0_93 = arith.constant 0 : index
    %419 = vector.load %arg5[%c0_91, %c0_92, %c0_93] : memref<1x2x128xf32, #tpu.memory_space<vmem>>, vector<1x2x128xf32>
    %420 = vector.shape_cast %419 : vector<1x2x128xf32> to vector<2x128xf32>
    %421 = vector.shape_cast %406 : vector<2x128xf32> to vector<1x2x128xf32>
    tpu.vector_store %arg5[%c0_91, %c0_92, %c0_93], %421 {strides = array<i32>} : memref<1x2x128xf32, #tpu.memory_space<vmem>>, vector<1x2x128xf32>,
    %c0_94 = arith.constant 0 : index
    %c0_95 = arith.constant 0 : index
    %c0_96 = arith.constant 0 : index
    %422 = vector.load %arg6[%c0_94, %c0_95, %c0_96] : memref<1x2x128xf32, #tpu.memory_space<vmem>>, vector<1x2x128xf32>
    %423 = vector.shape_cast %422 : vector<1x2x128xf32> to vector<2x128xf32>
    %424 = vector.shape_cast %409 : vector<2x128xf32> to vector<1x2x128xf32>
    tpu.vector_store %arg6[%c0_94, %c0_95, %c0_96], %424 {strides = array<i32>} : memref<1x2x128xf32, #tpu.memory_space<vmem>>, vector<1x2x128xf32>,
    return
  }
  func.func @transform_0(%arg0: i32) -> (i32, i32) {
    %c0_i32 = arith.constant 0 : i32
    %c0_i32_0 = arith.constant 0 : i32
    %c0_i32_1 = arith.constant 0 : i32
    return %c0_i32, %c0_i32_0 : i32, i32
  }
  func.func @transform_1(%arg0: i32) -> (i32, i32, i32) {
    %c0_i32 = arith.constant 0 : i32
    %c0_i32_0 = arith.constant 0 : i32
    %c0_i32_1 = arith.constant 0 : i32
    return %c0_i32, %c0_i32_0, %arg0 : i32, i32, i32
  }
  func.func @transform_2(%arg0: i32) -> (i32, i32) {
    %c0_i32 = arith.constant 0 : i32
    %c0_i32_0 = arith.constant 0 : i32
    return %c0_i32, %arg0 : i32, i32
  }
  func.func @transform_3(%arg0: i32) -> (i32, i32, i32) {
    %c0_i32 = arith.constant 0 : i32
    %c0_i32_0 = arith.constant 0 : i32
    %c0_i32_1 = arith.constant 0 : i32
    return %c0_i32, %c0_i32_0, %arg0 : i32, i32, i32
  }
  func.func @transform_4(%arg0: i32) -> (i32, i32, i32) {
    %c0_i32 = arith.constant 0 : i32
    %c0_i32_0 = arith.constant 0 : i32
    %c0_i32_1 = arith.constant 0 : i32
    return %arg0, %c0_i32, %c0_i32_0 : i32, i32, i32
  }
  func.func @transform_5(%arg0: i32) -> (i32, i32, i32) {
    %c0_i32 = arith.constant 0 : i32
    %c0_i32_0 = arith.constant 0 : i32
    %c0_i32_1 = arith.constant 0 : i32
    return %arg0, %c0_i32, %c0_i32_0 : i32, i32, i32
  }
}

module attributes {stable_mosaic.version = 11 : i64} {
  func.func @kernel(%arg0: memref<2x1xi32, #tpu.memory_space<vmem>>, %arg1: memref<8x2x512xbf16, #tpu.memory_space<vmem>>, %arg2: memref<128x512xbf16, #tpu.memory_space<vmem>>, %arg3: memref<2x128xf32, #tpu.memory_space<vmem>>, %arg4: memref<2x128xf32, #tpu.memory_space<vmem>>, %arg5: memref<8x2x128xbf16, #tpu.memory_space<vmem>>) attributes {dimension_semantics = [], scalar_prefetch = 0 : i64, scratch_operands = 0 : i64, tpu.core_type = #tpu.core_type<tc>} {
    %c0 = arith.constant 0 : index
    %c0_0 = arith.constant 0 : index
    %0 = vector.load %arg2[%c0, %c0_0] : memref<128x512xbf16, #tpu.memory_space<vmem>>, vector<128x512xbf16>
    %c0_1 = arith.constant 0 : index
    %c0_2 = arith.constant 0 : index
    %1 = vector.load %arg0[%c0_1, %c0_2] : memref<2x1xi32, #tpu.memory_space<vmem>>, vector<2x1xi32>
    %c0_3 = arith.constant 0 : index
    %c0_4 = arith.constant 0 : index
    %2 = vector.load %arg3[%c0_3, %c0_4] : memref<2x128xf32, #tpu.memory_space<vmem>>, vector<2x128xf32>
    %c0_5 = arith.constant 0 : index
    %c0_6 = arith.constant 0 : index
    %3 = vector.load %arg4[%c0_5, %c0_6] : memref<2x128xf32, #tpu.memory_space<vmem>>, vector<2x128xf32>
    %c0_i32 = arith.constant 0 : i32
    %4 = vector.broadcast %c0_i32 : i32 to vector<2x1xi32>
    %5 = arith.cmpi slt, %4, %1 : vector<2x1xi32>
    %6 = arith.index_cast %c0_i32 : i32 to index
    %c0_7 = arith.constant 0 : index
    %c0_8 = arith.constant 0 : index
    %7 = vector.load %arg1[%6, %c0_7, %c0_8] : memref<8x2x512xbf16, #tpu.memory_space<vmem>>, vector<1x2x512xbf16>
    %8 = vector.shape_cast %7 : vector<1x2x512xbf16> to vector<2x512xbf16>
    %9 = arith.extf %8 : vector<2x512xbf16> to vector<2x512xf32>
    %10 = arith.truncf %2 : vector<2x128xf32> to vector<2x128xbf16>
    %cst = arith.constant dense<0.000000e+00> : vector<2x512xf32>
    %11 = tpu.matmul %10, %0, %cst {dimension_numbers = #tpu.dot_dimension_numbers<[1], [0], [0], [1], [0, 0, 1, 1], [], []>} : vector<2x128xbf16>, vector<128x512xbf16>, vector<2x512xf32> -> vector<2x512xf32>
    %12 = arith.addf %9, %11 : vector<2x512xf32>
    %13 = vector.extract_strided_slice %12 {offsets = [0, 0], sizes = [2, 128], strides = [1, 1]} : vector<2x512xf32> to vector<2x128xf32>
    %14 = arith.negf %13 : vector<2x128xf32>
    %15 = math.exp %14 : vector<2x128xf32>
    %cst_9 = arith.constant 1.000000e+00 : f32
    %16 = vector.broadcast %cst_9 : f32 to vector<2x128xf32>
    %17 = arith.addf %16, %15 : vector<2x128xf32>
    %18 = arith.divf %16, %17 : vector<2x128xf32>
    %19 = vector.extract_strided_slice %12 {offsets = [0, 128], sizes = [2, 128], strides = [1, 1]} : vector<2x512xf32> to vector<2x128xf32>
    %20 = arith.negf %19 : vector<2x128xf32>
    %21 = math.exp %20 : vector<2x128xf32>
    %cst_10 = arith.constant 1.000000e+00 : f32
    %22 = vector.broadcast %cst_10 : f32 to vector<2x128xf32>
    %23 = arith.addf %22, %21 : vector<2x128xf32>
    %24 = arith.divf %22, %23 : vector<2x128xf32>
    %25 = vector.extract_strided_slice %12 {offsets = [0, 256], sizes = [2, 128], strides = [1, 1]} : vector<2x512xf32> to vector<2x128xf32>
    %26 = math.tanh %25 : vector<2x128xf32>
    %27 = vector.extract_strided_slice %12 {offsets = [0, 384], sizes = [2, 128], strides = [1, 1]} : vector<2x512xf32> to vector<2x128xf32>
    %28 = arith.negf %27 : vector<2x128xf32>
    %29 = math.exp %28 : vector<2x128xf32>
    %cst_11 = arith.constant 1.000000e+00 : f32
    %30 = vector.broadcast %cst_11 : f32 to vector<2x128xf32>
    %31 = arith.addf %30, %29 : vector<2x128xf32>
    %32 = arith.divf %30, %31 : vector<2x128xf32>
    %33 = arith.mulf %24, %3 : vector<2x128xf32>
    %34 = arith.mulf %18, %26 : vector<2x128xf32>
    %35 = arith.addf %33, %34 : vector<2x128xf32>
    %36 = math.tanh %35 : vector<2x128xf32>
    %37 = arith.mulf %32, %36 : vector<2x128xf32>
    %38 = vector.shape_cast %5 : vector<2x1xi1> to vector<2x1xi1>
    %39 = vector.broadcast %38 : vector<2x1xi1> to vector<2x128xi1>
    %40 = arith.select %39, %37, %2 : vector<2x128xi1>, vector<2x128xf32>
    %41 = vector.shape_cast %5 : vector<2x1xi1> to vector<2x1xi1>
    %42 = vector.broadcast %41 : vector<2x1xi1> to vector<2x128xi1>
    %43 = arith.select %42, %35, %3 : vector<2x128xi1>, vector<2x128xf32>
    %cst_12 = arith.constant 0.000000e+00 : f32
    %44 = vector.shape_cast %5 : vector<2x1xi1> to vector<2x1xi1>
    %45 = vector.broadcast %44 : vector<2x1xi1> to vector<2x128xi1>
    %46 = vector.broadcast %cst_12 : f32 to vector<2x128xf32>
    %47 = arith.select %45, %37, %46 : vector<2x128xi1>, vector<2x128xf32>
    %48 = arith.truncf %47 : vector<2x128xf32> to vector<2x128xbf16>
    %49 = arith.index_cast %c0_i32 : i32 to index
    %c0_13 = arith.constant 0 : index
    %c0_14 = arith.constant 0 : index
    %50 = vector.load %arg5[%49, %c0_13, %c0_14] : memref<8x2x128xbf16, #tpu.memory_space<vmem>>, vector<1x2x128xbf16>
    %51 = vector.shape_cast %50 : vector<1x2x128xbf16> to vector<2x128xbf16>
    %52 = vector.shape_cast %48 : vector<2x128xbf16> to vector<1x2x128xbf16>
    tpu.vector_store %arg5[%49, %c0_13, %c0_14], %52 {strides = array<i32>} : memref<8x2x128xbf16, #tpu.memory_space<vmem>>, vector<1x2x128xbf16>,
    %c1_i32 = arith.constant 1 : i32
    %53 = vector.broadcast %c1_i32 : i32 to vector<2x1xi32>
    %54 = arith.cmpi slt, %53, %1 : vector<2x1xi32>
    %55 = arith.index_cast %c1_i32 : i32 to index
    %c0_15 = arith.constant 0 : index
    %c0_16 = arith.constant 0 : index
    %56 = vector.load %arg1[%55, %c0_15, %c0_16] : memref<8x2x512xbf16, #tpu.memory_space<vmem>>, vector<1x2x512xbf16>
    %57 = vector.shape_cast %56 : vector<1x2x512xbf16> to vector<2x512xbf16>
    %58 = arith.extf %57 : vector<2x512xbf16> to vector<2x512xf32>
    %59 = arith.truncf %40 : vector<2x128xf32> to vector<2x128xbf16>
    %cst_17 = arith.constant dense<0.000000e+00> : vector<2x512xf32>
    %60 = tpu.matmul %59, %0, %cst_17 {dimension_numbers = #tpu.dot_dimension_numbers<[1], [0], [0], [1], [0, 0, 1, 1], [], []>} : vector<2x128xbf16>, vector<128x512xbf16>, vector<2x512xf32> -> vector<2x512xf32>
    %61 = arith.addf %58, %60 : vector<2x512xf32>
    %62 = vector.extract_strided_slice %61 {offsets = [0, 0], sizes = [2, 128], strides = [1, 1]} : vector<2x512xf32> to vector<2x128xf32>
    %63 = arith.negf %62 : vector<2x128xf32>
    %64 = math.exp %63 : vector<2x128xf32>
    %cst_18 = arith.constant 1.000000e+00 : f32
    %65 = vector.broadcast %cst_18 : f32 to vector<2x128xf32>
    %66 = arith.addf %65, %64 : vector<2x128xf32>
    %67 = arith.divf %65, %66 : vector<2x128xf32>
    %68 = vector.extract_strided_slice %61 {offsets = [0, 128], sizes = [2, 128], strides = [1, 1]} : vector<2x512xf32> to vector<2x128xf32>
    %69 = arith.negf %68 : vector<2x128xf32>
    %70 = math.exp %69 : vector<2x128xf32>
    %cst_19 = arith.constant 1.000000e+00 : f32
    %71 = vector.broadcast %cst_19 : f32 to vector<2x128xf32>
    %72 = arith.addf %71, %70 : vector<2x128xf32>
    %73 = arith.divf %71, %72 : vector<2x128xf32>
    %74 = vector.extract_strided_slice %61 {offsets = [0, 256], sizes = [2, 128], strides = [1, 1]} : vector<2x512xf32> to vector<2x128xf32>
    %75 = math.tanh %74 : vector<2x128xf32>
    %76 = vector.extract_strided_slice %61 {offsets = [0, 384], sizes = [2, 128], strides = [1, 1]} : vector<2x512xf32> to vector<2x128xf32>
    %77 = arith.negf %76 : vector<2x128xf32>
    %78 = math.exp %77 : vector<2x128xf32>
    %cst_20 = arith.constant 1.000000e+00 : f32
    %79 = vector.broadcast %cst_20 : f32 to vector<2x128xf32>
    %80 = arith.addf %79, %78 : vector<2x128xf32>
    %81 = arith.divf %79, %80 : vector<2x128xf32>
    %82 = arith.mulf %73, %43 : vector<2x128xf32>
    %83 = arith.mulf %67, %75 : vector<2x128xf32>
    %84 = arith.addf %82, %83 : vector<2x128xf32>
    %85 = math.tanh %84 : vector<2x128xf32>
    %86 = arith.mulf %81, %85 : vector<2x128xf32>
    %87 = vector.shape_cast %54 : vector<2x1xi1> to vector<2x1xi1>
    %88 = vector.broadcast %87 : vector<2x1xi1> to vector<2x128xi1>
    %89 = arith.select %88, %86, %40 : vector<2x128xi1>, vector<2x128xf32>
    %90 = vector.shape_cast %54 : vector<2x1xi1> to vector<2x1xi1>
    %91 = vector.broadcast %90 : vector<2x1xi1> to vector<2x128xi1>
    %92 = arith.select %91, %84, %43 : vector<2x128xi1>, vector<2x128xf32>
    %cst_21 = arith.constant 0.000000e+00 : f32
    %93 = vector.shape_cast %54 : vector<2x1xi1> to vector<2x1xi1>
    %94 = vector.broadcast %93 : vector<2x1xi1> to vector<2x128xi1>
    %95 = vector.broadcast %cst_21 : f32 to vector<2x128xf32>
    %96 = arith.select %94, %86, %95 : vector<2x128xi1>, vector<2x128xf32>
    %97 = arith.truncf %96 : vector<2x128xf32> to vector<2x128xbf16>
    %98 = arith.index_cast %c1_i32 : i32 to index
    %c0_22 = arith.constant 0 : index
    %c0_23 = arith.constant 0 : index
    %99 = vector.load %arg5[%98, %c0_22, %c0_23] : memref<8x2x128xbf16, #tpu.memory_space<vmem>>, vector<1x2x128xbf16>
    %100 = vector.shape_cast %99 : vector<1x2x128xbf16> to vector<2x128xbf16>
    %101 = vector.shape_cast %97 : vector<2x128xbf16> to vector<1x2x128xbf16>
    tpu.vector_store %arg5[%98, %c0_22, %c0_23], %101 {strides = array<i32>} : memref<8x2x128xbf16, #tpu.memory_space<vmem>>, vector<1x2x128xbf16>,
    %c2_i32 = arith.constant 2 : i32
    %102 = vector.broadcast %c2_i32 : i32 to vector<2x1xi32>
    %103 = arith.cmpi slt, %102, %1 : vector<2x1xi32>
    %104 = arith.index_cast %c2_i32 : i32 to index
    %c0_24 = arith.constant 0 : index
    %c0_25 = arith.constant 0 : index
    %105 = vector.load %arg1[%104, %c0_24, %c0_25] : memref<8x2x512xbf16, #tpu.memory_space<vmem>>, vector<1x2x512xbf16>
    %106 = vector.shape_cast %105 : vector<1x2x512xbf16> to vector<2x512xbf16>
    %107 = arith.extf %106 : vector<2x512xbf16> to vector<2x512xf32>
    %108 = arith.truncf %89 : vector<2x128xf32> to vector<2x128xbf16>
    %cst_26 = arith.constant dense<0.000000e+00> : vector<2x512xf32>
    %109 = tpu.matmul %108, %0, %cst_26 {dimension_numbers = #tpu.dot_dimension_numbers<[1], [0], [0], [1], [0, 0, 1, 1], [], []>} : vector<2x128xbf16>, vector<128x512xbf16>, vector<2x512xf32> -> vector<2x512xf32>
    %110 = arith.addf %107, %109 : vector<2x512xf32>
    %111 = vector.extract_strided_slice %110 {offsets = [0, 0], sizes = [2, 128], strides = [1, 1]} : vector<2x512xf32> to vector<2x128xf32>
    %112 = arith.negf %111 : vector<2x128xf32>
    %113 = math.exp %112 : vector<2x128xf32>
    %cst_27 = arith.constant 1.000000e+00 : f32
    %114 = vector.broadcast %cst_27 : f32 to vector<2x128xf32>
    %115 = arith.addf %114, %113 : vector<2x128xf32>
    %116 = arith.divf %114, %115 : vector<2x128xf32>
    %117 = vector.extract_strided_slice %110 {offsets = [0, 128], sizes = [2, 128], strides = [1, 1]} : vector<2x512xf32> to vector<2x128xf32>
    %118 = arith.negf %117 : vector<2x128xf32>
    %119 = math.exp %118 : vector<2x128xf32>
    %cst_28 = arith.constant 1.000000e+00 : f32
    %120 = vector.broadcast %cst_28 : f32 to vector<2x128xf32>
    %121 = arith.addf %120, %119 : vector<2x128xf32>
    %122 = arith.divf %120, %121 : vector<2x128xf32>
    %123 = vector.extract_strided_slice %110 {offsets = [0, 256], sizes = [2, 128], strides = [1, 1]} : vector<2x512xf32> to vector<2x128xf32>
    %124 = math.tanh %123 : vector<2x128xf32>
    %125 = vector.extract_strided_slice %110 {offsets = [0, 384], sizes = [2, 128], strides = [1, 1]} : vector<2x512xf32> to vector<2x128xf32>
    %126 = arith.negf %125 : vector<2x128xf32>
    %127 = math.exp %126 : vector<2x128xf32>
    %cst_29 = arith.constant 1.000000e+00 : f32
    %128 = vector.broadcast %cst_29 : f32 to vector<2x128xf32>
    %129 = arith.addf %128, %127 : vector<2x128xf32>
    %130 = arith.divf %128, %129 : vector<2x128xf32>
    %131 = arith.mulf %122, %92 : vector<2x128xf32>
    %132 = arith.mulf %116, %124 : vector<2x128xf32>
    %133 = arith.addf %131, %132 : vector<2x128xf32>
    %134 = math.tanh %133 : vector<2x128xf32>
    %135 = arith.mulf %130, %134 : vector<2x128xf32>
    %136 = vector.shape_cast %103 : vector<2x1xi1> to vector<2x1xi1>
    %137 = vector.broadcast %136 : vector<2x1xi1> to vector<2x128xi1>
    %138 = arith.select %137, %135, %89 : vector<2x128xi1>, vector<2x128xf32>
    %139 = vector.shape_cast %103 : vector<2x1xi1> to vector<2x1xi1>
    %140 = vector.broadcast %139 : vector<2x1xi1> to vector<2x128xi1>
    %141 = arith.select %140, %133, %92 : vector<2x128xi1>, vector<2x128xf32>
    %cst_30 = arith.constant 0.000000e+00 : f32
    %142 = vector.shape_cast %103 : vector<2x1xi1> to vector<2x1xi1>
    %143 = vector.broadcast %142 : vector<2x1xi1> to vector<2x128xi1>
    %144 = vector.broadcast %cst_30 : f32 to vector<2x128xf32>
    %145 = arith.select %143, %135, %144 : vector<2x128xi1>, vector<2x128xf32>
    %146 = arith.truncf %145 : vector<2x128xf32> to vector<2x128xbf16>
    %147 = arith.index_cast %c2_i32 : i32 to index
    %c0_31 = arith.constant 0 : index
    %c0_32 = arith.constant 0 : index
    %148 = vector.load %arg5[%147, %c0_31, %c0_32] : memref<8x2x128xbf16, #tpu.memory_space<vmem>>, vector<1x2x128xbf16>
    %149 = vector.shape_cast %148 : vector<1x2x128xbf16> to vector<2x128xbf16>
    %150 = vector.shape_cast %146 : vector<2x128xbf16> to vector<1x2x128xbf16>
    tpu.vector_store %arg5[%147, %c0_31, %c0_32], %150 {strides = array<i32>} : memref<8x2x128xbf16, #tpu.memory_space<vmem>>, vector<1x2x128xbf16>,
    %c3_i32 = arith.constant 3 : i32
    %151 = vector.broadcast %c3_i32 : i32 to vector<2x1xi32>
    %152 = arith.cmpi slt, %151, %1 : vector<2x1xi32>
    %153 = arith.index_cast %c3_i32 : i32 to index
    %c0_33 = arith.constant 0 : index
    %c0_34 = arith.constant 0 : index
    %154 = vector.load %arg1[%153, %c0_33, %c0_34] : memref<8x2x512xbf16, #tpu.memory_space<vmem>>, vector<1x2x512xbf16>
    %155 = vector.shape_cast %154 : vector<1x2x512xbf16> to vector<2x512xbf16>
    %156 = arith.extf %155 : vector<2x512xbf16> to vector<2x512xf32>
    %157 = arith.truncf %138 : vector<2x128xf32> to vector<2x128xbf16>
    %cst_35 = arith.constant dense<0.000000e+00> : vector<2x512xf32>
    %158 = tpu.matmul %157, %0, %cst_35 {dimension_numbers = #tpu.dot_dimension_numbers<[1], [0], [0], [1], [0, 0, 1, 1], [], []>} : vector<2x128xbf16>, vector<128x512xbf16>, vector<2x512xf32> -> vector<2x512xf32>
    %159 = arith.addf %156, %158 : vector<2x512xf32>
    %160 = vector.extract_strided_slice %159 {offsets = [0, 0], sizes = [2, 128], strides = [1, 1]} : vector<2x512xf32> to vector<2x128xf32>
    %161 = arith.negf %160 : vector<2x128xf32>
    %162 = math.exp %161 : vector<2x128xf32>
    %cst_36 = arith.constant 1.000000e+00 : f32
    %163 = vector.broadcast %cst_36 : f32 to vector<2x128xf32>
    %164 = arith.addf %163, %162 : vector<2x128xf32>
    %165 = arith.divf %163, %164 : vector<2x128xf32>
    %166 = vector.extract_strided_slice %159 {offsets = [0, 128], sizes = [2, 128], strides = [1, 1]} : vector<2x512xf32> to vector<2x128xf32>
    %167 = arith.negf %166 : vector<2x128xf32>
    %168 = math.exp %167 : vector<2x128xf32>
    %cst_37 = arith.constant 1.000000e+00 : f32
    %169 = vector.broadcast %cst_37 : f32 to vector<2x128xf32>
    %170 = arith.addf %169, %168 : vector<2x128xf32>
    %171 = arith.divf %169, %170 : vector<2x128xf32>
    %172 = vector.extract_strided_slice %159 {offsets = [0, 256], sizes = [2, 128], strides = [1, 1]} : vector<2x512xf32> to vector<2x128xf32>
    %173 = math.tanh %172 : vector<2x128xf32>
    %174 = vector.extract_strided_slice %159 {offsets = [0, 384], sizes = [2, 128], strides = [1, 1]} : vector<2x512xf32> to vector<2x128xf32>
    %175 = arith.negf %174 : vector<2x128xf32>
    %176 = math.exp %175 : vector<2x128xf32>
    %cst_38 = arith.constant 1.000000e+00 : f32
    %177 = vector.broadcast %cst_38 : f32 to vector<2x128xf32>
    %178 = arith.addf %177, %176 : vector<2x128xf32>
    %179 = arith.divf %177, %178 : vector<2x128xf32>
    %180 = arith.mulf %171, %141 : vector<2x128xf32>
    %181 = arith.mulf %165, %173 : vector<2x128xf32>
    %182 = arith.addf %180, %181 : vector<2x128xf32>
    %183 = math.tanh %182 : vector<2x128xf32>
    %184 = arith.mulf %179, %183 : vector<2x128xf32>
    %185 = vector.shape_cast %152 : vector<2x1xi1> to vector<2x1xi1>
    %186 = vector.broadcast %185 : vector<2x1xi1> to vector<2x128xi1>
    %187 = arith.select %186, %184, %138 : vector<2x128xi1>, vector<2x128xf32>
    %188 = vector.shape_cast %152 : vector<2x1xi1> to vector<2x1xi1>
    %189 = vector.broadcast %188 : vector<2x1xi1> to vector<2x128xi1>
    %190 = arith.select %189, %182, %141 : vector<2x128xi1>, vector<2x128xf32>
    %cst_39 = arith.constant 0.000000e+00 : f32
    %191 = vector.shape_cast %152 : vector<2x1xi1> to vector<2x1xi1>
    %192 = vector.broadcast %191 : vector<2x1xi1> to vector<2x128xi1>
    %193 = vector.broadcast %cst_39 : f32 to vector<2x128xf32>
    %194 = arith.select %192, %184, %193 : vector<2x128xi1>, vector<2x128xf32>
    %195 = arith.truncf %194 : vector<2x128xf32> to vector<2x128xbf16>
    %196 = arith.index_cast %c3_i32 : i32 to index
    %c0_40 = arith.constant 0 : index
    %c0_41 = arith.constant 0 : index
    %197 = vector.load %arg5[%196, %c0_40, %c0_41] : memref<8x2x128xbf16, #tpu.memory_space<vmem>>, vector<1x2x128xbf16>
    %198 = vector.shape_cast %197 : vector<1x2x128xbf16> to vector<2x128xbf16>
    %199 = vector.shape_cast %195 : vector<2x128xbf16> to vector<1x2x128xbf16>
    tpu.vector_store %arg5[%196, %c0_40, %c0_41], %199 {strides = array<i32>} : memref<8x2x128xbf16, #tpu.memory_space<vmem>>, vector<1x2x128xbf16>,
    %c4_i32 = arith.constant 4 : i32
    %200 = vector.broadcast %c4_i32 : i32 to vector<2x1xi32>
    %201 = arith.cmpi slt, %200, %1 : vector<2x1xi32>
    %202 = arith.index_cast %c4_i32 : i32 to index
    %c0_42 = arith.constant 0 : index
    %c0_43 = arith.constant 0 : index
    %203 = vector.load %arg1[%202, %c0_42, %c0_43] : memref<8x2x512xbf16, #tpu.memory_space<vmem>>, vector<1x2x512xbf16>
    %204 = vector.shape_cast %203 : vector<1x2x512xbf16> to vector<2x512xbf16>
    %205 = arith.extf %204 : vector<2x512xbf16> to vector<2x512xf32>
    %206 = arith.truncf %187 : vector<2x128xf32> to vector<2x128xbf16>
    %cst_44 = arith.constant dense<0.000000e+00> : vector<2x512xf32>
    %207 = tpu.matmul %206, %0, %cst_44 {dimension_numbers = #tpu.dot_dimension_numbers<[1], [0], [0], [1], [0, 0, 1, 1], [], []>} : vector<2x128xbf16>, vector<128x512xbf16>, vector<2x512xf32> -> vector<2x512xf32>
    %208 = arith.addf %205, %207 : vector<2x512xf32>
    %209 = vector.extract_strided_slice %208 {offsets = [0, 0], sizes = [2, 128], strides = [1, 1]} : vector<2x512xf32> to vector<2x128xf32>
    %210 = arith.negf %209 : vector<2x128xf32>
    %211 = math.exp %210 : vector<2x128xf32>
    %cst_45 = arith.constant 1.000000e+00 : f32
    %212 = vector.broadcast %cst_45 : f32 to vector<2x128xf32>
    %213 = arith.addf %212, %211 : vector<2x128xf32>
    %214 = arith.divf %212, %213 : vector<2x128xf32>
    %215 = vector.extract_strided_slice %208 {offsets = [0, 128], sizes = [2, 128], strides = [1, 1]} : vector<2x512xf32> to vector<2x128xf32>
    %216 = arith.negf %215 : vector<2x128xf32>
    %217 = math.exp %216 : vector<2x128xf32>
    %cst_46 = arith.constant 1.000000e+00 : f32
    %218 = vector.broadcast %cst_46 : f32 to vector<2x128xf32>
    %219 = arith.addf %218, %217 : vector<2x128xf32>
    %220 = arith.divf %218, %219 : vector<2x128xf32>
    %221 = vector.extract_strided_slice %208 {offsets = [0, 256], sizes = [2, 128], strides = [1, 1]} : vector<2x512xf32> to vector<2x128xf32>
    %222 = math.tanh %221 : vector<2x128xf32>
    %223 = vector.extract_strided_slice %208 {offsets = [0, 384], sizes = [2, 128], strides = [1, 1]} : vector<2x512xf32> to vector<2x128xf32>
    %224 = arith.negf %223 : vector<2x128xf32>
    %225 = math.exp %224 : vector<2x128xf32>
    %cst_47 = arith.constant 1.000000e+00 : f32
    %226 = vector.broadcast %cst_47 : f32 to vector<2x128xf32>
    %227 = arith.addf %226, %225 : vector<2x128xf32>
    %228 = arith.divf %226, %227 : vector<2x128xf32>
    %229 = arith.mulf %220, %190 : vector<2x128xf32>
    %230 = arith.mulf %214, %222 : vector<2x128xf32>
    %231 = arith.addf %229, %230 : vector<2x128xf32>
    %232 = math.tanh %231 : vector<2x128xf32>
    %233 = arith.mulf %228, %232 : vector<2x128xf32>
    %234 = vector.shape_cast %201 : vector<2x1xi1> to vector<2x1xi1>
    %235 = vector.broadcast %234 : vector<2x1xi1> to vector<2x128xi1>
    %236 = arith.select %235, %233, %187 : vector<2x128xi1>, vector<2x128xf32>
    %237 = vector.shape_cast %201 : vector<2x1xi1> to vector<2x1xi1>
    %238 = vector.broadcast %237 : vector<2x1xi1> to vector<2x128xi1>
    %239 = arith.select %238, %231, %190 : vector<2x128xi1>, vector<2x128xf32>
    %cst_48 = arith.constant 0.000000e+00 : f32
    %240 = vector.shape_cast %201 : vector<2x1xi1> to vector<2x1xi1>
    %241 = vector.broadcast %240 : vector<2x1xi1> to vector<2x128xi1>
    %242 = vector.broadcast %cst_48 : f32 to vector<2x128xf32>
    %243 = arith.select %241, %233, %242 : vector<2x128xi1>, vector<2x128xf32>
    %244 = arith.truncf %243 : vector<2x128xf32> to vector<2x128xbf16>
    %245 = arith.index_cast %c4_i32 : i32 to index
    %c0_49 = arith.constant 0 : index
    %c0_50 = arith.constant 0 : index
    %246 = vector.load %arg5[%245, %c0_49, %c0_50] : memref<8x2x128xbf16, #tpu.memory_space<vmem>>, vector<1x2x128xbf16>
    %247 = vector.shape_cast %246 : vector<1x2x128xbf16> to vector<2x128xbf16>
    %248 = vector.shape_cast %244 : vector<2x128xbf16> to vector<1x2x128xbf16>
    tpu.vector_store %arg5[%245, %c0_49, %c0_50], %248 {strides = array<i32>} : memref<8x2x128xbf16, #tpu.memory_space<vmem>>, vector<1x2x128xbf16>,
    %c5_i32 = arith.constant 5 : i32
    %249 = vector.broadcast %c5_i32 : i32 to vector<2x1xi32>
    %250 = arith.cmpi slt, %249, %1 : vector<2x1xi32>
    %251 = arith.index_cast %c5_i32 : i32 to index
    %c0_51 = arith.constant 0 : index
    %c0_52 = arith.constant 0 : index
    %252 = vector.load %arg1[%251, %c0_51, %c0_52] : memref<8x2x512xbf16, #tpu.memory_space<vmem>>, vector<1x2x512xbf16>
    %253 = vector.shape_cast %252 : vector<1x2x512xbf16> to vector<2x512xbf16>
    %254 = arith.extf %253 : vector<2x512xbf16> to vector<2x512xf32>
    %255 = arith.truncf %236 : vector<2x128xf32> to vector<2x128xbf16>
    %cst_53 = arith.constant dense<0.000000e+00> : vector<2x512xf32>
    %256 = tpu.matmul %255, %0, %cst_53 {dimension_numbers = #tpu.dot_dimension_numbers<[1], [0], [0], [1], [0, 0, 1, 1], [], []>} : vector<2x128xbf16>, vector<128x512xbf16>, vector<2x512xf32> -> vector<2x512xf32>
    %257 = arith.addf %254, %256 : vector<2x512xf32>
    %258 = vector.extract_strided_slice %257 {offsets = [0, 0], sizes = [2, 128], strides = [1, 1]} : vector<2x512xf32> to vector<2x128xf32>
    %259 = arith.negf %258 : vector<2x128xf32>
    %260 = math.exp %259 : vector<2x128xf32>
    %cst_54 = arith.constant 1.000000e+00 : f32
    %261 = vector.broadcast %cst_54 : f32 to vector<2x128xf32>
    %262 = arith.addf %261, %260 : vector<2x128xf32>
    %263 = arith.divf %261, %262 : vector<2x128xf32>
    %264 = vector.extract_strided_slice %257 {offsets = [0, 128], sizes = [2, 128], strides = [1, 1]} : vector<2x512xf32> to vector<2x128xf32>
    %265 = arith.negf %264 : vector<2x128xf32>
    %266 = math.exp %265 : vector<2x128xf32>
    %cst_55 = arith.constant 1.000000e+00 : f32
    %267 = vector.broadcast %cst_55 : f32 to vector<2x128xf32>
    %268 = arith.addf %267, %266 : vector<2x128xf32>
    %269 = arith.divf %267, %268 : vector<2x128xf32>
    %270 = vector.extract_strided_slice %257 {offsets = [0, 256], sizes = [2, 128], strides = [1, 1]} : vector<2x512xf32> to vector<2x128xf32>
    %271 = math.tanh %270 : vector<2x128xf32>
    %272 = vector.extract_strided_slice %257 {offsets = [0, 384], sizes = [2, 128], strides = [1, 1]} : vector<2x512xf32> to vector<2x128xf32>
    %273 = arith.negf %272 : vector<2x128xf32>
    %274 = math.exp %273 : vector<2x128xf32>
    %cst_56 = arith.constant 1.000000e+00 : f32
    %275 = vector.broadcast %cst_56 : f32 to vector<2x128xf32>
    %276 = arith.addf %275, %274 : vector<2x128xf32>
    %277 = arith.divf %275, %276 : vector<2x128xf32>
    %278 = arith.mulf %269, %239 : vector<2x128xf32>
    %279 = arith.mulf %263, %271 : vector<2x128xf32>
    %280 = arith.addf %278, %279 : vector<2x128xf32>
    %281 = math.tanh %280 : vector<2x128xf32>
    %282 = arith.mulf %277, %281 : vector<2x128xf32>
    %283 = vector.shape_cast %250 : vector<2x1xi1> to vector<2x1xi1>
    %284 = vector.broadcast %283 : vector<2x1xi1> to vector<2x128xi1>
    %285 = arith.select %284, %282, %236 : vector<2x128xi1>, vector<2x128xf32>
    %286 = vector.shape_cast %250 : vector<2x1xi1> to vector<2x1xi1>
    %287 = vector.broadcast %286 : vector<2x1xi1> to vector<2x128xi1>
    %288 = arith.select %287, %280, %239 : vector<2x128xi1>, vector<2x128xf32>
    %cst_57 = arith.constant 0.000000e+00 : f32
    %289 = vector.shape_cast %250 : vector<2x1xi1> to vector<2x1xi1>
    %290 = vector.broadcast %289 : vector<2x1xi1> to vector<2x128xi1>
    %291 = vector.broadcast %cst_57 : f32 to vector<2x128xf32>
    %292 = arith.select %290, %282, %291 : vector<2x128xi1>, vector<2x128xf32>
    %293 = arith.truncf %292 : vector<2x128xf32> to vector<2x128xbf16>
    %294 = arith.index_cast %c5_i32 : i32 to index
    %c0_58 = arith.constant 0 : index
    %c0_59 = arith.constant 0 : index
    %295 = vector.load %arg5[%294, %c0_58, %c0_59] : memref<8x2x128xbf16, #tpu.memory_space<vmem>>, vector<1x2x128xbf16>
    %296 = vector.shape_cast %295 : vector<1x2x128xbf16> to vector<2x128xbf16>
    %297 = vector.shape_cast %293 : vector<2x128xbf16> to vector<1x2x128xbf16>
    tpu.vector_store %arg5[%294, %c0_58, %c0_59], %297 {strides = array<i32>} : memref<8x2x128xbf16, #tpu.memory_space<vmem>>, vector<1x2x128xbf16>,
    %c6_i32 = arith.constant 6 : i32
    %298 = vector.broadcast %c6_i32 : i32 to vector<2x1xi32>
    %299 = arith.cmpi slt, %298, %1 : vector<2x1xi32>
    %300 = arith.index_cast %c6_i32 : i32 to index
    %c0_60 = arith.constant 0 : index
    %c0_61 = arith.constant 0 : index
    %301 = vector.load %arg1[%300, %c0_60, %c0_61] : memref<8x2x512xbf16, #tpu.memory_space<vmem>>, vector<1x2x512xbf16>
    %302 = vector.shape_cast %301 : vector<1x2x512xbf16> to vector<2x512xbf16>
    %303 = arith.extf %302 : vector<2x512xbf16> to vector<2x512xf32>
    %304 = arith.truncf %285 : vector<2x128xf32> to vector<2x128xbf16>
    %cst_62 = arith.constant dense<0.000000e+00> : vector<2x512xf32>
    %305 = tpu.matmul %304, %0, %cst_62 {dimension_numbers = #tpu.dot_dimension_numbers<[1], [0], [0], [1], [0, 0, 1, 1], [], []>} : vector<2x128xbf16>, vector<128x512xbf16>, vector<2x512xf32> -> vector<2x512xf32>
    %306 = arith.addf %303, %305 : vector<2x512xf32>
    %307 = vector.extract_strided_slice %306 {offsets = [0, 0], sizes = [2, 128], strides = [1, 1]} : vector<2x512xf32> to vector<2x128xf32>
    %308 = arith.negf %307 : vector<2x128xf32>
    %309 = math.exp %308 : vector<2x128xf32>
    %cst_63 = arith.constant 1.000000e+00 : f32
    %310 = vector.broadcast %cst_63 : f32 to vector<2x128xf32>
    %311 = arith.addf %310, %309 : vector<2x128xf32>
    %312 = arith.divf %310, %311 : vector<2x128xf32>
    %313 = vector.extract_strided_slice %306 {offsets = [0, 128], sizes = [2, 128], strides = [1, 1]} : vector<2x512xf32> to vector<2x128xf32>
    %314 = arith.negf %313 : vector<2x128xf32>
    %315 = math.exp %314 : vector<2x128xf32>
    %cst_64 = arith.constant 1.000000e+00 : f32
    %316 = vector.broadcast %cst_64 : f32 to vector<2x128xf32>
    %317 = arith.addf %316, %315 : vector<2x128xf32>
    %318 = arith.divf %316, %317 : vector<2x128xf32>
    %319 = vector.extract_strided_slice %306 {offsets = [0, 256], sizes = [2, 128], strides = [1, 1]} : vector<2x512xf32> to vector<2x128xf32>
    %320 = math.tanh %319 : vector<2x128xf32>
    %321 = vector.extract_strided_slice %306 {offsets = [0, 384], sizes = [2, 128], strides = [1, 1]} : vector<2x512xf32> to vector<2x128xf32>
    %322 = arith.negf %321 : vector<2x128xf32>
    %323 = math.exp %322 : vector<2x128xf32>
    %cst_65 = arith.constant 1.000000e+00 : f32
    %324 = vector.broadcast %cst_65 : f32 to vector<2x128xf32>
    %325 = arith.addf %324, %323 : vector<2x128xf32>
    %326 = arith.divf %324, %325 : vector<2x128xf32>
    %327 = arith.mulf %318, %288 : vector<2x128xf32>
    %328 = arith.mulf %312, %320 : vector<2x128xf32>
    %329 = arith.addf %327, %328 : vector<2x128xf32>
    %330 = math.tanh %329 : vector<2x128xf32>
    %331 = arith.mulf %326, %330 : vector<2x128xf32>
    %332 = vector.shape_cast %299 : vector<2x1xi1> to vector<2x1xi1>
    %333 = vector.broadcast %332 : vector<2x1xi1> to vector<2x128xi1>
    %334 = arith.select %333, %331, %285 : vector<2x128xi1>, vector<2x128xf32>
    %335 = vector.shape_cast %299 : vector<2x1xi1> to vector<2x1xi1>
    %336 = vector.broadcast %335 : vector<2x1xi1> to vector<2x128xi1>
    %337 = arith.select %336, %329, %288 : vector<2x128xi1>, vector<2x128xf32>
    %cst_66 = arith.constant 0.000000e+00 : f32
    %338 = vector.shape_cast %299 : vector<2x1xi1> to vector<2x1xi1>
    %339 = vector.broadcast %338 : vector<2x1xi1> to vector<2x128xi1>
    %340 = vector.broadcast %cst_66 : f32 to vector<2x128xf32>
    %341 = arith.select %339, %331, %340 : vector<2x128xi1>, vector<2x128xf32>
    %342 = arith.truncf %341 : vector<2x128xf32> to vector<2x128xbf16>
    %343 = arith.index_cast %c6_i32 : i32 to index
    %c0_67 = arith.constant 0 : index
    %c0_68 = arith.constant 0 : index
    %344 = vector.load %arg5[%343, %c0_67, %c0_68] : memref<8x2x128xbf16, #tpu.memory_space<vmem>>, vector<1x2x128xbf16>
    %345 = vector.shape_cast %344 : vector<1x2x128xbf16> to vector<2x128xbf16>
    %346 = vector.shape_cast %342 : vector<2x128xbf16> to vector<1x2x128xbf16>
    tpu.vector_store %arg5[%343, %c0_67, %c0_68], %346 {strides = array<i32>} : memref<8x2x128xbf16, #tpu.memory_space<vmem>>, vector<1x2x128xbf16>,
    %c7_i32 = arith.constant 7 : i32
    %347 = vector.broadcast %c7_i32 : i32 to vector<2x1xi32>
    %348 = arith.cmpi slt, %347, %1 : vector<2x1xi32>
    %349 = arith.index_cast %c7_i32 : i32 to index
    %c0_69 = arith.constant 0 : index
    %c0_70 = arith.constant 0 : index
    %350 = vector.load %arg1[%349, %c0_69, %c0_70] : memref<8x2x512xbf16, #tpu.memory_space<vmem>>, vector<1x2x512xbf16>
    %351 = vector.shape_cast %350 : vector<1x2x512xbf16> to vector<2x512xbf16>
    %352 = arith.extf %351 : vector<2x512xbf16> to vector<2x512xf32>
    %353 = arith.truncf %334 : vector<2x128xf32> to vector<2x128xbf16>
    %cst_71 = arith.constant dense<0.000000e+00> : vector<2x512xf32>
    %354 = tpu.matmul %353, %0, %cst_71 {dimension_numbers = #tpu.dot_dimension_numbers<[1], [0], [0], [1], [0, 0, 1, 1], [], []>} : vector<2x128xbf16>, vector<128x512xbf16>, vector<2x512xf32> -> vector<2x512xf32>
    %355 = arith.addf %352, %354 : vector<2x512xf32>
    %356 = vector.extract_strided_slice %355 {offsets = [0, 0], sizes = [2, 128], strides = [1, 1]} : vector<2x512xf32> to vector<2x128xf32>
    %357 = arith.negf %356 : vector<2x128xf32>
    %358 = math.exp %357 : vector<2x128xf32>
    %cst_72 = arith.constant 1.000000e+00 : f32
    %359 = vector.broadcast %cst_72 : f32 to vector<2x128xf32>
    %360 = arith.addf %359, %358 : vector<2x128xf32>
    %361 = arith.divf %359, %360 : vector<2x128xf32>
    %362 = vector.extract_strided_slice %355 {offsets = [0, 128], sizes = [2, 128], strides = [1, 1]} : vector<2x512xf32> to vector<2x128xf32>
    %363 = arith.negf %362 : vector<2x128xf32>
    %364 = math.exp %363 : vector<2x128xf32>
    %cst_73 = arith.constant 1.000000e+00 : f32
    %365 = vector.broadcast %cst_73 : f32 to vector<2x128xf32>
    %366 = arith.addf %365, %364 : vector<2x128xf32>
    %367 = arith.divf %365, %366 : vector<2x128xf32>
    %368 = vector.extract_strided_slice %355 {offsets = [0, 256], sizes = [2, 128], strides = [1, 1]} : vector<2x512xf32> to vector<2x128xf32>
    %369 = math.tanh %368 : vector<2x128xf32>
    %370 = vector.extract_strided_slice %355 {offsets = [0, 384], sizes = [2, 128], strides = [1, 1]} : vector<2x512xf32> to vector<2x128xf32>
    %371 = arith.negf %370 : vector<2x128xf32>
    %372 = math.exp %371 : vector<2x128xf32>
    %cst_74 = arith.constant 1.000000e+00 : f32
    %373 = vector.broadcast %cst_74 : f32 to vector<2x128xf32>
    %374 = arith.addf %373, %372 : vector<2x128xf32>
    %375 = arith.divf %373, %374 : vector<2x128xf32>
    %376 = arith.mulf %367, %337 : vector<2x128xf32>
    %377 = arith.mulf %361, %369 : vector<2x128xf32>
    %378 = arith.addf %376, %377 : vector<2x128xf32>
    %379 = math.tanh %378 : vector<2x128xf32>
    %380 = arith.mulf %375, %379 : vector<2x128xf32>
    %381 = vector.shape_cast %348 : vector<2x1xi1> to vector<2x1xi1>
    %382 = vector.broadcast %381 : vector<2x1xi1> to vector<2x128xi1>
    %383 = arith.select %382, %380, %334 : vector<2x128xi1>, vector<2x128xf32>
    %384 = vector.shape_cast %348 : vector<2x1xi1> to vector<2x1xi1>
    %385 = vector.broadcast %384 : vector<2x1xi1> to vector<2x128xi1>
    %386 = arith.select %385, %378, %337 : vector<2x128xi1>, vector<2x128xf32>
    %cst_75 = arith.constant 0.000000e+00 : f32
    %387 = vector.shape_cast %348 : vector<2x1xi1> to vector<2x1xi1>
    %388 = vector.broadcast %387 : vector<2x1xi1> to vector<2x128xi1>
    %389 = vector.broadcast %cst_75 : f32 to vector<2x128xf32>
    %390 = arith.select %388, %380, %389 : vector<2x128xi1>, vector<2x128xf32>
    %391 = arith.truncf %390 : vector<2x128xf32> to vector<2x128xbf16>
    %392 = arith.index_cast %c7_i32 : i32 to index
    %c0_76 = arith.constant 0 : index
    %c0_77 = arith.constant 0 : index
    %393 = vector.load %arg5[%392, %c0_76, %c0_77] : memref<8x2x128xbf16, #tpu.memory_space<vmem>>, vector<1x2x128xbf16>
    %394 = vector.shape_cast %393 : vector<1x2x128xbf16> to vector<2x128xbf16>
    %395 = vector.shape_cast %391 : vector<2x128xbf16> to vector<1x2x128xbf16>
    tpu.vector_store %arg5[%392, %c0_76, %c0_77], %395 {strides = array<i32>} : memref<8x2x128xbf16, #tpu.memory_space<vmem>>, vector<1x2x128xbf16>,
    %c8_i32 = arith.constant 8 : i32
    return
  }
}

module attributes {stable_mosaic.version = 11 : i64} {
  func.func @kernel(%arg0: memref<16x128xbf16, #tpu.memory_space<vmem>>, %arg1: memref<128x128xbf16, #tpu.memory_space<vmem>>, %arg2: memref<1x128xf32, #tpu.memory_space<vmem>>, %arg3: memref<16x128xf32, #tpu.memory_space<vmem>>) attributes {dimension_semantics = [], scalar_prefetch = 0 : i64, scratch_operands = 0 : i64, tpu.core_type = #tpu.core_type<tc>} {
    %c0 = arith.constant 0 : index
    %c0_0 = arith.constant 0 : index
    %0 = vector.load %arg0[%c0, %c0_0] : memref<16x128xbf16, #tpu.memory_space<vmem>>, vector<16x128xbf16>
    %c0_1 = arith.constant 0 : index
    %c0_2 = arith.constant 0 : index
    %1 = vector.load %arg1[%c0_1, %c0_2] : memref<128x128xbf16, #tpu.memory_space<vmem>>, vector<128x128xbf16>
    %cst = arith.constant dense<0.000000e+00> : vector<16x128xf32>
    %2 = tpu.matmul %0, %1, %cst {dimension_numbers = #tpu.dot_dimension_numbers<[1], [0], [0], [1], [0, 0, 1, 1], [], []>} : vector<16x128xbf16>, vector<128x128xbf16>, vector<16x128xf32> -> vector<16x128xf32>
    %c0_3 = arith.constant 0 : index
    %c0_4 = arith.constant 0 : index
    %3 = vector.load %arg2[%c0_3, %c0_4] : memref<1x128xf32, #tpu.memory_space<vmem>>, vector<1x128xf32>
    %4 = vector.broadcast %3 : vector<1x128xf32> to vector<16x128xf32>
    %5 = arith.addf %2, %4 : vector<16x128xf32>
    %6 = tpu.iota {dimensions = array<i32: 1>} : vector<16x128xi32>
    %c16_i32 = arith.constant 16 : i32
    %7 = vector.broadcast %c16_i32 : i32 to vector<16x128xi32>
    %8 = arith.cmpi slt, %6, %7 : vector<16x128xi32>
    %cst_5 = arith.constant -1.000000e+30 : f32
    %9 = vector.broadcast %cst_5 : f32 to vector<16x128xf32>
    %10 = arith.select %8, %5, %9 : vector<16x128xi1>, vector<16x128xf32>
    %cst_6 = arith.constant dense<0xFF800000> : vector<16xf32>
    %11 = vector.multi_reduction <maximumf>, %10, %cst_6 [1] : vector<16x128xf32> to vector<16xf32>
    %12 = vector.shape_cast %11 : vector<16xf32> to vector<16x1xf32>
    %13 = vector.broadcast %12 : vector<16x1xf32> to vector<16x128xf32>
    %14 = arith.subf %10, %13 : vector<16x128xf32>
    %15 = math.exp %14 : vector<16x128xf32>
    %cst_7 = arith.constant dense<0.000000e+00> : vector<16xf32>
    %16 = vector.multi_reduction <add>, %15, %cst_7 [1] : vector<16x128xf32> to vector<16xf32>
    %17 = vector.shape_cast %16 : vector<16xf32> to vector<16x1xf32>
    %18 = math.log %17 : vector<16x1xf32>
    %19 = vector.broadcast %18 : vector<16x1xf32> to vector<16x128xf32>
    %20 = arith.subf %14, %19 : vector<16x128xf32>
    %c0_8 = arith.constant 0 : index
    %c0_9 = arith.constant 0 : index
    %21 = vector.load %arg3[%c0_8, %c0_9] : memref<16x128xf32, #tpu.memory_space<vmem>>, vector<16x128xf32>
    tpu.vector_store %arg3[%c0_8, %c0_9], %20 {strides = array<i32>} : memref<16x128xf32, #tpu.memory_space<vmem>>, vector<16x128xf32>,
    return
  }
}

</mosaic_0001>

<bundles_post_ra>
// kernel: lstm_tagger_focus_forward.5
= control target key start
LH: loop header
LB: loop body
LE: loop exit
PB: predicated region body
PF: predicated region fallthrough
CT: control target
= control target key end

     0   :  { %v224_v0 = vmov 0.0   ;;  %vm225_vm0 = vmmov 0   ;;  %v135_v10 = vlaneseq  ;;  %s282_s1 = inlined_call_operand.vmem [shape: bf16[128,128], index: 1, kind: input, shape index: {}]   ;;  %s283_s0 = inlined_call_operand.vmem [shape: bf16[16,128], index: 0, kind: input, shape index: {}]   ;;  %s284_s2 = inlined_call_operand.vmem [shape: f32[1,128], index: 2, kind: input, shape index: {}]   ;;  %s285_s3 = inlined_call_operand.vmem [shape: f32[16,128], index: 3, kind: output, shape index: {}]  }
   0x1   :  { %185 = vmatprep.subr.bf16.mxu0 %v224_v0  ;;  %v207_v1 = vld [vmem:[%s282_s1] sm:$0xff]   ;;  %201 = vmatprep.mubr.msk.bf16.mxu0 %vm225_vm0, %v224_v0  ;;  %v208_v2 = vld [vmem:[%s282_s1 + $0x8] sm:$0xff]   ;;  %v209_v3 = vld [vmem:[%s282_s1 + $0x10] sm:$0xff]  }
   0x2   :  { %186 = vmatpush3.bf16.msra.mxu0 %v207_v1  ;;  %v210_v4 = vld [vmem:[%s282_s1 + $0x18] sm:$0xff]   ;;  %v211_v5 = vld [vmem:[%s282_s1 + $0x20] sm:$0xff]   ;;  %v212_v6 = vld [vmem:[%s282_s1 + $0x28] sm:$0xff]   ;;  %v136_v11 = vand.u32 127, %v135_v10 }
   0x3   :  { %187 = vmatprep.subr.bf16.mxu0 %v224_v0  ;;  %v213_v7 = vld [vmem:[%s282_s1 + $0x30] sm:$0xff]   ;;  %v214_v8 = vld [vmem:[%s282_s1 + $0x38] sm:$0xff]   ;;  %v215_v9 = vld [vmem:[%s283_s0] sm:$0xff]  }
   0x4   :  { %v166_v12 = vld [vmem:[%s284_s2] ss:$0 sm:$0xff]  ;;  %vm137_vm1 = vcmp.lt.s32.totalorder %v136_v11, 16 }
   0x6   :  { %188 = vmatpush3.bf16.msra.mxu0 %v208_v2 }
   0x7   :  { %189 = vmatprep.subr.bf16.mxu0 %v224_v0 }
   0xa   :  { %190 = vmatpush3.bf16.msra.mxu0 %v209_v3 }
   0xb   :  { %191 = vmatprep.subr.bf16.mxu0 %v224_v0 }
   0xe   :  { %192 = vmatpush3.bf16.msra.mxu0 %v210_v4 }
   0xf   :  { %193 = vmatprep.subr.bf16.mxu0 %v224_v0 }
  0x12   :  { %194 = vmatpush3.bf16.msra.mxu0 %v211_v5 }
  0x13   :  { %195 = vmatprep.subr.bf16.mxu0 %v224_v0 }
  0x16   :  { %196 = vmatpush3.bf16.msra.mxu0 %v212_v6 }
  0x17   :  { %197 = vmatprep.subr.bf16.mxu0 %v224_v0 }
  0x1a   :  { %198 = vmatpush3.bf16.msra.mxu0 %v213_v7 }
  0x1b   :  { %199 = vmatprep.subr.bf16.mxu0 %v224_v0 }
  0x1e   :  { %200 = vmatpush3.bf16.msra.mxu0 %v214_v8 }
  0x21   :  { %202 = vmatmul.mubr.bf16.vlgmr.msra.gmra.mrb[0].mxu0 %v215_v9 }
  0xf4   :  { %v128_v13 = vpop.f32.mrb[0].mxu0 }
  0xf5   :  { %v129_v14 = vadd.f32 %v166_v12, %v128_v13  ;;  %v203_v15 = vpop.f32.mrb[1].mxu0 }
  0xf6   :  { %v131_v16 = vpop.f32.mrb[2].mxu0 }
  0xf7   :  { %v132_v17 = vadd.f32 %v166_v12, %v131_v16  ;;  %v204_v18 = vpop.f32.mrb[3].mxu0  ;;  %v138_v19 = vsel %vm137_vm1, %v129_v14, -1e+30 }
  0xf8   :  { %140 = vmax.xlane.f32.xlu0 %v138_v19 }
  0xf9   :  { %v139_v20 = vsel %vm137_vm1, %v132_v17, -1e+30 }
  0xfc   :  { %142 = vmax.xlane.f32.xlu0 %v139_v20 }
 0x185   :  { %v141_v21 = vpop.xlane.xlu0 %140 }
 0x186   :  { %v144_v22 = vsub.f32 %v138_v19, %v141_v21 }
 0x188   :  { %v146_v23 = vmul.f32 1.442695, %v144_v22 }
 0x189   :  { %v143_v24 = vpop.xlane.xlu0 %142 }
 0x18a   :  { %v145_v25 = vsub.f32 %v139_v20, %v143_v24  ;;  %216 = vpow2.f32 %v146_v23 }
 0x18c   :  { %v148_v26 = vmul.f32 1.442695, %v145_v25 }
 0x18e   :  { %218 = vpow2.f32 %v148_v26 }
 0x194   :  { %v217_v27 = vpop.eup %216 }
 0x195   :  { %150 = vadd.xlane.f32.xlu1 %v217_v27 }
 0x198   :  { %v219_v28 = vpop.eup %218 }
 0x199   :  { %152 = vadd.xlane.f32.xlu1 %v219_v28 }
 0x222   :  { %v151_v29 = vpop.xlane.xlu1 %150 }
 0x223   :  { %220 = vlog2.f32 %v151_v29 }
 0x226   :  { %v153_v30 = vpop.xlane.xlu1 %152 }
 0x227   :  { %222 = vlog2.f32 %v153_v30 }
 0x22d   :  { %v221_v31 = vpop.eup %220 }
 0x22e   :  { %v155_v32 = vmul.f32 0.6931472, %v221_v31 }
 0x230   :  { %v158_v33 = vsub.f32 %v144_v22, %v155_v32 }
 0x231   :  { %v223_v34 = vpop.eup %222 }
 0x232   :  { %160 = vst [vmem:[%s285_s3] sm:$0xff] %v158_v33  ;;  %v157_v35 = vmul.f32 0.6931472, %v223_v34 }
 0x234   :  { %v159_v36 = vsub.f32 %v145_v25, %v157_v35 }
 0x236   :  { %161 = vst [vmem:[%s285_s3 + $0x8] sm:$0xff] %v159_v36 }

// kernel: lstm_tagger_focus_forward.3
= control target key start
LH: loop header
LB: loop body
LE: loop exit
PB: predicated region body
PF: predicated region fallthrough
CT: control target
= control target key end

     0   :  { %s2462_s18 = smov 0   ;;  %s2464_s19 = smov 0   ;;  %s3283_s0 = inlined_call_operand.vmem [shape: s32[2,1], index: 0, kind: input, shape index: {}]   ;;  %s3284_s1 = inlined_call_operand.vmem [shape: bf16[8,2,1024], index: 1, kind: input, shape index: {}]   ;;  %s3285_s2 = inlined_call_operand.vmem [shape: bf16[128,1024], index: 2, kind: input, shape index: {}]   ;;  %s3286_s3 = inlined_call_operand.vmem [shape: bf16[8,2,256], index: 3, kind: output, shape index: {0}]   ;;  %s3287_s4 = inlined_call_operand.vmem [shape: f32[2,2,128], index: 4, kind: output, shape index: {1}]   ;;  %s3288_s5 = inlined_call_operand.vmem [shape: f32[2,2,128], index: 5, kind: output, shape index: {2}]  }
   0x1   :  { %s2466_s20 = smov 0  }
   0x2 LB: > { %s2478_s21 = sadd.s32 4294967295, %s2428_s20   ;;  %s2481_s22 = sadd.s32 1, %s2428_s20   ;;  %s2428_s20 = sphi %s2466_s20, %s3293_s20   ;;  %s2424_s19 = sphi %s2464_s19, %s3292_s19   ;;  %s2420_s18 = sphi %s2462_s18, %s3291_s18  }
   0x3   : > { %s41_s23 = ssub.s32 %s2428_s20, %s2481_s22  ;;  %s44_s24 = sadd.s32 1, %s2424_s19 }
   0x4   : > { %p42_p0 = scmp.eq.s32.totalorder %s41_s23, 0  ;;  %p51_p1 = scmp.ne.s32.totalorder %s2424_s19, %s2420_s18 }
   0x5   : > { %p52_p2 = scmp.eq.s32.totalorder %s2428_s20, 0  ;;  %p107_p3 = scmp.eq.s32.totalorder %s2478_s21, 1 }
   0x6   : > { %s2491_s25 = scalar_select %p42_p0, %s2424_s19, %s44_s24  }
   0x7   : > { %p2493_p4 = por %p52_p2, %p51_p1  ;;  %p2497_p5 = por %p107_p3, %p51_p1 }
   0x8   : > { %p2084_p6 = scmp.ge.s32.totalorder %s2428_s20, 2 }
   0xa   : > { %184 = sbr.rel (%p2084_p6) target bundleno = 46 (0x2e), region = 20 }
  0x11   : > { %187 = sbr.rel (!%p2493_p4) target bundleno = 26 (0x1a), region = 24  ;;  %s189_s28 = sand.u32 (%p2493_p4), 1, %s2424_s19  }
  0x12   : > { %s2086_s29 = sshll.u32 (%p2493_p4), %s2428_s20, 2  ;;  %s2085_s30 = sshll.u32 (%p2493_p4), %s189_s28, 5 }
  0x13   : > { %s193_s8 = scalar_lea.vmem (%p2493_p4), %s3284_s1, %s2086_s29  ;;  %s191_s9 = scalar_lea.vmem (%p2493_p4), [#allocation2], %s2085_s30 }
  0x14   : > { %v209_v0 = vld [vmem:[%s193_s8] sm:$0xf] (%p2493_p4)  ;;  %v211_v1 = vld [vmem:[%s193_s8 + $0x8] sm:$0xf] (%p2493_p4)  ;;  %v213_v2 = vld [vmem:[%s193_s8 + $0x10] sm:$0xf] (%p2493_p4) }
  0x15   : > { %210 = vst [vmem:[%s191_s9] sm:$0xf] (%p2493_p4), %v209_v0  ;;  %212 = vst [vmem:[%s191_s9 + $0x4] sm:$0xf] (%p2493_p4), %v211_v1  ;;  %v215_v3 = vld [vmem:[%s193_s8 + $0x18] sm:$0xf] (%p2493_p4) }
  0x16   : > { %v217_v4 = vld [vmem:[%s193_s8 + $0x20] sm:$0xf] (%p2493_p4)  ;;  %214 = vst [vmem:[%s191_s9 + $0x8] sm:$0xf] (%p2493_p4), %v213_v2  ;;  %216 = vst [vmem:[%s191_s9 + $0xc] sm:$0xf] (%p2493_p4), %v215_v3 }
  0x17   : > { %218 = vst [vmem:[%s191_s9 + $0x10] sm:$0xf] (%p2493_p4), %v217_v4  ;;  %v219_v5 = vld [vmem:[%s193_s8 + $0x28] sm:$0xf] (%p2493_p4)  ;;  %v221_v6 = vld [vmem:[%s193_s8 + $0x30] sm:$0xf] (%p2493_p4) }
  0x18   : > { %v223_v7 = vld [vmem:[%s193_s8 + $0x38] sm:$0xf]  ;;  %220 = vst [vmem:[%s191_s9 + $0x14] sm:$0xf] %v219_v5  ;;  %222 = vst [vmem:[%s191_s9 + $0x18] sm:$0xf] %v221_v6 }
  0x19   : > { %224 = vst [vmem:[%s191_s9 + $0x1c] sm:$0xf] %v223_v7 }
  0x1a PF: > { %263 = sbr.rel (!%p2493_p4) target bundleno = 46 (0x2e), region = 65  ;;  %s265_s10 = sand.u32 (%p2493_p4), 1, %s2424_s19  }
  0x1b   : > { %s2169_s11 = sshll.u32 (%p2493_p4), %s2428_s20, 4  ;;  %s2087_s12 = sshll.u32 (%p2493_p4), %s265_s10, 8 }
  0x1c   : > { %s2516_s15 = scalar_lea.vmem (%p2493_p4), %s3285_s2, %s2169_s11  ;;  %s2521_s16 = scalar_lea.vmem (%p2493_p4), [#allocation3], %s2087_s12 }
  0x1d   : > { %v283_v8 = vld [vmem:[%s2516_s15] sm:$0xff] (%p2493_p4)  ;;  %v285_v9 = vld [vmem:[%s2516_s15 + $0x8] sm:$0xff] (%p2493_p4) }
  0x1e   : > { %v287_v10 = vld [vmem:[%s2516_s15 + $0x20] sm:$0xff] (%p2493_p4)  ;;  %284 = vst [vmem:[%s2521_s16] sm:$0xff] (%p2493_p4), %v283_v8  ;;  %286 = vst [vmem:[%s2521_s16 + $0x8] sm:$0xff] (%p2493_p4), %v285_v9  ;;  %v289_v11 = vld [vmem:[%s2516_s15 + $0x28] sm:$0xff] (%p2493_p4) }
  0x1f   : > { %288 = vst [vmem:[%s2521_s16 + $0x10] sm:$0xff] (%p2493_p4), %v287_v10  ;;  %v291_v12 = vld [vmem:[%s2516_s15 + $0x40] sm:$0xff] (%p2493_p4)  ;;  %v293_v13 = vld [vmem:[%s2516_s15 + $0x48] sm:$0xff] (%p2493_p4)  ;;  %290 = vst [vmem:[%s2521_s16 + $0x18] sm:$0xff] (%p2493_p4), %v289_v11 }
  0x20   : > { %292 = vst [vmem:[%s2521_s16 + $0x20] sm:$0xff] (%p2493_p4), %v291_v12  ;;  %294 = vst [vmem:[%s2521_s16 + $0x28] sm:$0xff] (%p2493_p4), %v293_v13  ;;  %v295_v14 = vld [vmem:[%s2516_s15 + $0x60] sm:$0xff] (%p2493_p4)  ;;  %v297_v15 = vld [vmem:[%s2516_s15 + $0x68] sm:$0xff] (%p2493_p4) }
  0x21   : > { %v299_v16 = vld [vmem:[%s2516_s15 + $0x80] sm:$0xff]  ;;  %296 = vst [vmem:[%s2521_s16 + $0x30] sm:$0xff] %v295_v14  ;;  %298 = vst [vmem:[%s2521_s16 + $0x38] sm:$0xff] %v297_v15  ;;  %v301_v17 = vld [vmem:[%s2516_s15 + $0x88] sm:$0xff] }
  0x22   : > { %300 = vst [vmem:[%s2521_s16 + $0x40] sm:$0xff] %v299_v16  ;;  %v303_v18 = vld [vmem:[%s2516_s15 + $0xa0] sm:$0xff]  ;;  %v305_v19 = vld [vmem:[%s2516_s15 + $0xa8] sm:$0xff]  ;;  %302 = vst [vmem:[%s2521_s16 + $0x48] sm:$0xff] %v301_v17 }
  0x23   : > { %304 = vst [vmem:[%s2521_s16 + $0x50] sm:$0xff] %v303_v18  ;;  %306 = vst [vmem:[%s2521_s16 + $0x58] sm:$0xff] %v305_v19  ;;  %v307_v20 = vld [vmem:[%s2516_s15 + $0xc0] sm:$0xff]  ;;  %v309_v21 = vld [vmem:[%s2516_s15 + $0xc8] sm:$0xff] }
  0x24   : > { %v311_v22 = vld [vmem:[%s2516_s15 + $0xe0] sm:$0xff]  ;;  %308 = vst [vmem:[%s2521_s16 + $0x60] sm:$0xff] %v307_v20  ;;  %310 = vst [vmem:[%s2521_s16 + $0x68] sm:$0xff] %v309_v21  ;;  %v313_v23 = vld [vmem:[%s2516_s15 + $0xe8] sm:$0xff] }
  0x25   : > { %312 = vst [vmem:[%s2521_s16 + $0x70] sm:$0xff] %v311_v22  ;;  %v315_v24 = vld [vmem:[%s2516_s15 + $0x100] sm:$0xff]  ;;  %v317_v25 = vld [vmem:[%s2516_s15 + $0x108] sm:$0xff]  ;;  %314 = vst [vmem:[%s2521_s16 + $0x78] sm:$0xff] %v313_v23 }
  0x26   : > { %316 = vst [vmem:[%s2521_s16 + $0x80] sm:$0xff] %v315_v24  ;;  %318 = vst [vmem:[%s2521_s16 + $0x88] sm:$0xff] %v317_v25  ;;  %v319_v26 = vld [vmem:[%s2516_s15 + $0x120] sm:$0xff]  ;;  %v321_v27 = vld [vmem:[%s2516_s15 + $0x128] sm:$0xff] }
  0x27   : > { %v323_v28 = vld [vmem:[%s2516_s15 + $0x140] sm:$0xff]  ;;  %320 = vst [vmem:[%s2521_s16 + $0x90] sm:$0xff] %v319_v26  ;;  %322 = vst [vmem:[%s2521_s16 + $0x98] sm:$0xff] %v321_v27  ;;  %v325_v29 = vld [vmem:[%s2516_s15 + $0x148] sm:$0xff] }
  0x28   : > { %324 = vst [vmem:[%s2521_s16 + $0xa0] sm:$0xff] %v323_v28  ;;  %v327_v30 = vld [vmem:[%s2516_s15 + $0x160] sm:$0xff]  ;;  %v329_v31 = vld [vmem:[%s2516_s15 + $0x168] sm:$0xff]  ;;  %326 = vst [vmem:[%s2521_s16 + $0xa8] sm:$0xff] %v325_v29 }
  0x29   : > { %328 = vst [vmem:[%s2521_s16 + $0xb0] sm:$0xff] %v327_v30  ;;  %330 = vst [vmem:[%s2521_s16 + $0xb8] sm:$0xff] %v329_v31  ;;  %v331_v32 = vld [vmem:[%s2516_s15 + $0x180] sm:$0xff]  ;;  %v333_v33 = vld [vmem:[%s2516_s15 + $0x188] sm:$0xff] }
  0x2a   : > { %v335_v34 = vld [vmem:[%s2516_s15 + $0x1a0] sm:$0xff]  ;;  %332 = vst [vmem:[%s2521_s16 + $0xc0] sm:$0xff] %v331_v32  ;;  %334 = vst [vmem:[%s2521_s16 + $0xc8] sm:$0xff] %v333_v33  ;;  %v337_v35 = vld [vmem:[%s2516_s15 + $0x1a8] sm:$0xff] }
  0x2b   : > { %336 = vst [vmem:[%s2521_s16 + $0xd0] sm:$0xff] %v335_v34  ;;  %v339_v36 = vld [vmem:[%s2516_s15 + $0x1c0] sm:$0xff]  ;;  %v341_v37 = vld [vmem:[%s2516_s15 + $0x1c8] sm:$0xff]  ;;  %338 = vst [vmem:[%s2521_s16 + $0xd8] sm:$0xff] %v337_v35 }
  0x2c   : > { %340 = vst [vmem:[%s2521_s16 + $0xe0] sm:$0xff] %v339_v36  ;;  %342 = vst [vmem:[%s2521_s16 + $0xe8] sm:$0xff] %v341_v37  ;;  %v343_v38 = vld [vmem:[%s2516_s15 + $0x1e0] sm:$0xff]  ;;  %v345_v39 = vld [vmem:[%s2516_s15 + $0x1e8] sm:$0xff] }
  0x2d   : > { %344 = vst [vmem:[%s2521_s16 + $0xf0] sm:$0xff] %v343_v38  ;;  %346 = vst [vmem:[%s2521_s16 + $0xf8] sm:$0xff] %v345_v39 }
  0x2e PF: > { %p2090_p7 = scmp.ge.s32.totalorder %s2428_s20, 1  ;;  %p351_p8 = scmp.lt.s32.totalorder %s2428_s20, 3 }
  0x30   : > { %p352_p9 = pnand %p2090_p7, %p351_p8 }
  0x31   : > { %s2587_s17 = sand.u32 (!%p352_p9), 1, %s2420_s18   ;;  %p447_p10 = scmp.eq.s32.totalorder (!%p352_p9), %s2478_s21, 0  ;;  %v2430_v40 = vmov (!%p352_p9), 0   ;;  %v2597_v41 = vld [vmem:[%s3283_s0] sm:$0x3] (!%p352_p9)  ;;  %v706_v20 = vlaneseq (!%p352_p9) }
  0x32   : > { %355 = sbr.rel (%p352_p9) target bundleno = 2250 (0x8ca), region = 88  ;;  %s2092_s23 = sshll.u32 (!%p352_p9), %s2587_s17, 8  ;;  %647 = vmatprep.mubr.bf16.mxu0 (!%p352_p9), %v2430_v40  ;;  %688 = vmatprep.mubr.bf16.mxu1 (!%p352_p9), %v2430_v40  ;;  %v2431_v18 = vmov (!%p352_p9), 1983009808  }
  0x33   : > { %2196 = vset.pattern.permute.xlu0 (!%p352_p9), %v2430_v40  ;;  %2197 = vset.pattern.permute.xlu1 (!%p352_p9), %v2430_v40  ;;  %s2600_s26 = scalar_lea.vmem (!%p352_p9), [#allocation3], %s2092_s23  ;;  %v704_v19 = vunpack.c.l.s4 (!%p352_p9), %v2431_v18  ;;  %s2091_s6 = sshll.u32 (!%p352_p9), %s2587_s17, 5  ;;  %v707_v22 = vshrl.u32 (!%p352_p9), %v706_v20, 7 }
  0x34   : > { %v2603_v42 = vld [vmem:[%s2600_s26 + $0x4] ss:$16 sps:$4 sm:$0xff] (!%p352_p9)   ;;  %v2610_v43 = vld [vmem:[%s2600_s26 + $0xc] ss:$16 sps:$4 sm:$0xff] (!%p352_p9)   ;;  %v2618_v44 = vld [vmem:[%s2600_s26] ss:$16 sps:$4 sm:$0xff] (!%p352_p9)  }
  0x35   : > { %615 = vmatprep.subr.bf16.mxu0 (!%p352_p9), %v2603_v42  ;;  %v2621_v45 = vld [vmem:[%s2600_s26 + $0x8] ss:$16 sps:$4 sm:$0xff] (!%p352_p9)   ;;  %656 = vmatprep.subr.bf16.mxu1 (!%p352_p9), %v2610_v43  ;;  %v2626_v47 = vld [vmem:[%s2600_s26 + $0x24] ss:$16 sps:$4 sm:$0xff] (!%p352_p9)   ;;  %v2633_v49 = vld [vmem:[%s2600_s26 + $0x2c] ss:$16 sps:$4 sm:$0xff] (!%p352_p9)   ;;  %v705_v21 = vunpack.c.0.s8 (!%p352_p9), %v704_v19 }
  0x36   : > { %616 = vmatpush1.bf16.msra.mxu0 (!%p352_p9), %v2618_v44  ;;  %657 = vmatpush1.bf16.msra.mxu1 (!%p352_p9), %v2621_v45  ;;  %v2636_v50 = vld [vmem:[%s2600_s26 + $0x20] ss:$16 sps:$4 sm:$0xff] (!%p352_p9)   ;;  %v2642_v52 = vld [vmem:[%s2600_s26 + $0x28] ss:$16 sps:$4 sm:$0xff] (!%p352_p9)   ;;  %v2647_v54 = vld [vmem:[%s2600_s26 + $0x44] ss:$16 sps:$4 sm:$0xff] (!%p352_p9)  }
  0x37   : > { %617 = vmatprep.subr.bf16.mxu0 (!%p352_p9), %v2626_v47  ;;  %658 = vmatprep.subr.bf16.mxu1 (!%p352_p9), %v2633_v49  ;;  %v2654_v55 = vld [vmem:[%s2600_s26 + $0x4c] ss:$16 sps:$4 sm:$0xff] (!%p352_p9)   ;;  %v2657_v56 = vld [vmem:[%s2600_s26 + $0x40] ss:$16 sps:$4 sm:$0xff] (!%p352_p9)   ;;  %v2660_v57 = vld [vmem:[%s2600_s26 + $0x48] ss:$16 sps:$4 sm:$0xff] (!%p352_p9)   ;;  %v2801_v25 = vsub.s32 (!%p352_p9), %v705_v21, %v707_v22 }
  0x38   : > { %v2665_v58 = vld [vmem:[%s2600_s26 + $0x64] ss:$16 sps:$4 sm:$0xff] (!%p352_p9)   ;;  %v2671_v60 = vld [vmem:[%s2600_s26 + $0x6c] ss:$16 sps:$4 sm:$0xff] (!%p352_p9)   ;;  %v2679_v61 = vld [vmem:[%s2600_s26 + $0x60] ss:$16 sps:$4 sm:$0xff] (!%p352_p9)  }
  0x39   : > { %s2607_s18 = scalar_select %p447_p10, 0, 7  ;;  %v2686_v0 = vld [vmem:[%s2600_s26 + $0x68] ss:$16 sps:$4 sm:$0xff]   ;;  %v2689_v1 = vld [vmem:[%s2600_s26 + $0x84] ss:$16 sps:$4 sm:$0xff]  }
  0x3a   : > { %s2614_s28 = scalar_select %p447_p10, 1, 6  ;;  %618 = vmatpush1.bf16.msra.mxu0 %v2636_v50  ;;  %659 = vmatpush1.bf16.msra.mxu1 %v2642_v52  ;;  %v2695_v2 = vld [vmem:[%s2600_s26 + $0x8c] ss:$16 sps:$4 sm:$0xff]   ;;  %v2698_v3 = vld [vmem:[%s2600_s26 + $0x80] ss:$16 sps:$4 sm:$0xff]  }
  0x3b   : > { %v449_v46 = vstv %s2607_s18  ;;  %s2651_s29 = scalar_select %p447_p10, 4, 3  ;;  %619 = vmatprep.subr.bf16.mxu0 %v2647_v54  ;;  %660 = vmatprep.subr.bf16.mxu1 %v2654_v55  ;;  %v2701_v4 = vld [vmem:[%s2600_s26 + $0x88] ss:$16 sps:$4 sm:$0xff]   ;;  %v2707_v6 = vld [vmem:[%s2600_s26 + $0xa4] ss:$16 sps:$4 sm:$0xff]  }
  0x3c   : > { %vm450_vm0 = vcmp.lt.s32.totalorder %v449_v46, %v2597_v41  ;;  %v762_v48 = vstv %s2614_s28  ;;  %s2676_s30 = scalar_select %p447_p10, 6, 1  ;;  %v2712_v7 = vld [vmem:[%s2600_s26 + $0xac] ss:$16 sps:$4 sm:$0xff]   ;;  %v2717_v8 = vld [vmem:[%s2600_s26 + $0xa0] ss:$16 sps:$4 sm:$0xff]  }
  0x3d   : > { %v751_v51 = vsel %vm450_vm0, 1, %v2430_v40  ;;  %vm763_vm1 = vcmp.lt.s32.totalorder %v762_v48, %v2597_v41  ;;  %v1226_v59 = vstv %s2651_s29  ;;  %v2720_v9 = vld [vmem:[%s2600_s26 + $0xa8] ss:$16 sps:$4 sm:$0xff]   ;;  %v2725_v10 = vld [vmem:[%s2600_s26 + $0xc4] ss:$16 sps:$4 sm:$0xff]   ;;  %s2096_s7 = sshll.u32 %s2607_s18, 2 }
  0x3e   : > { %753 = vperm.xlu0 %2196, %v751_v51   ;;  %v904_v53 = vsel %vm763_vm1, 1, %v2430_v40  ;;  %vm1227_vm2 = vcmp.lt.s32.totalorder %v1226_v59, %v2597_v41  ;;  %v1536_v63 = vstv %s2676_s30  ;;  %620 = vmatpush1.bf16.msra.mxu0 %v2657_v56  ;;  %v2728_v11 = vld [vmem:[%s2600_s26 + $0xcc] ss:$16 sps:$4 sm:$0xff]   ;;  %v2733_v12 = vld [vmem:[%s2600_s26 + $0xc0] ss:$16 sps:$4 sm:$0xff]   ;;  %s2798_s8 = scalar_lea.vmem [#allocation2], %s2091_s6 }
  0x3f   : > { %v1369_v62 = vsel %vm1227_vm2, 1, %v2430_v40  ;;  %661 = vmatpush1.bf16.msra.mxu1 %v2660_v57  ;;  %vm1537_vm3 = vcmp.lt.s32.totalorder %v1536_v63, %v2597_v41  ;;  %621 = vmatprep.subr.bf16.mxu0 %v2665_v58  ;;  %v2736_v13 = vld [vmem:[%s2600_s26 + $0xc8] ss:$16 sps:$4 sm:$0xff]   ;;  %v2741_v14 = vld [vmem:[%s2600_s26 + $0xe4] ss:$16 sps:$4 sm:$0xff]   ;;  %s452_s9 = scalar_lea.vmem %s2798_s8, %s2096_s7 [#allocation2]  ;;  %s2093_s10 = sshll.u32 %s2587_s17, 3 }
  0x40   : > { %662 = vmatprep.subr.bf16.mxu1 %v2671_v60  ;;  %v1679_v5 = vsel %vm1537_vm3, 1, %v2430_v40  ;;  %v2744_v15 = vld [vmem:[%s2600_s26 + $0xec] ss:$16 sps:$4 sm:$0xff]   ;;  %v2749_v16 = vld [vmem:[%s2600_s26 + $0xe0] ss:$16 sps:$4 sm:$0xff]   ;;  %s2819_s11 = scalar_lea.vmem [#allocation4], %s2093_s10 }
  0x41   : > { %v2752_v17 = vld [vmem:[%s2600_s26 + $0xe8] ss:$16 sps:$4 sm:$0xff]   ;;  %v453_v27 = vld [vmem:[%s452_s9] sm:$0xf]  ;;  %s759_s12 = scalar_lea.vmem %s2819_s11, %s2607_s18 [#allocation4]  ;;  %s2132_s17 = sshll.u32 %s2614_s28, 2 }
  0x42   : > { %906 = vperm.xlu0 %2196, %v904_v53   ;;  %622 = vmatpush1.bf16.msra.mxu0 %v2679_v61  ;;  %v454_v36 = vunpack.c.l.bf16 %v453_v27  ;;  %s2861_s13 = scalar_select %p447_p10, 2, 5 }
  0x43   : > { %663 = vmatpush1.bf16.msra.mxu1 %v2686_v0  ;;  %623 = vmatprep.subr.bf16.mxu0 %v2689_v1  ;;  %s2865_s14 = scalar_select %p447_p10, 3, 4 }
  0x44   : > { %664 = vmatprep.subr.bf16.mxu1 %v2695_v2  ;;  %s2870_s15 = scalar_select %p447_p10, 5, 2 }
  0x45   : > { %s2879_s16 = scalar_select %p447_p10, 7, 0 }
  0x46   : > { %1371 = vperm.xlu0 %2196, %v1369_v62   ;;  %624 = vmatpush1.bf16.msra.mxu0 %v2698_v3  ;;  %s765_s23 = scalar_lea.vmem %s2798_s8, %s2132_s17 [#allocation2]  ;;  %s913_s24 = scalar_lea.vmem %s2819_s11, %s2614_s28 [#allocation4] }
  0x47   : > { %665 = vmatpush1.bf16.msra.mxu1 %v2701_v4  ;;  %625 = vmatprep.subr.bf16.mxu0 %v2707_v6  ;;  %s2142_s20 = sshll.u32 %s2861_s13, 2  ;;  %s1068_s28 = scalar_lea.vmem %s2819_s11, %s2861_s13 [#allocation4] }
  0x48   : > { %666 = vmatprep.subr.bf16.mxu1 %v2712_v7  ;;  %s919_s18 = scalar_lea.vmem %s2798_s8, %s2142_s20 [#allocation2]  ;;  %s2146_s6 = sshll.u32 %s2865_s14, 2 }
  0x49   : > { %s1074_s7 = scalar_lea.vmem %s2798_s8, %s2146_s6 [#allocation2]  ;;  %s1223_s9 = scalar_lea.vmem %s2819_s11, %s2865_s14 [#allocation4] }
  0x4a   : > { %1681 = vperm.xlu0 %2196, %v1679_v5   ;;  %626 = vmatpush1.bf16.msra.mxu0 %v2717_v8  ;;  %s2150_s10 = sshll.u32 %s2651_s29, 2  ;;  %p405_p11 = scmp.lt.s32.totalorder %s2478_s21, 1 }
  0x4b   : > { %667 = vmatpush1.bf16.msra.mxu1 %v2720_v9  ;;  %627 = vmatprep.subr.bf16.mxu0 %v2725_v10 }
  0x4c   : > { %668 = vmatprep.subr.bf16.mxu1 %v2728_v11 }
  0x4e   : > { %628 = vmatpush1.bf16.msra.mxu0 %v2733_v12 }
  0x4f   : > { %669 = vmatpush1.bf16.msra.mxu1 %v2736_v13  ;;  %629 = vmatprep.subr.bf16.mxu0 %v2741_v14 }
  0x50   : > { %670 = vmatprep.subr.bf16.mxu1 %v2744_v15 }
  0x52   : > { %630 = vmatpush1.bf16.msra.mxu0 %v2749_v16 }
  0x53   : > { %671 = vmatpush1.bf16.msra.mxu1 %v2752_v17  ;;  %768 = vmatprep.subr.bf16.mxu0 %v2603_v42 }
  0x54   : > { %809 = vmatprep.subr.bf16.mxu1 %v2610_v43 }
  0x55   : > { %648 = vmatmul.mubr.bf16.vlgmr.msra.gmra.mrb[0].mxu0 %v2430_v40 }
  0x56   : > { %689 = vmatmul.mubr.bf16.vlgmr.msra.gmra.mrb[0].mxu1 %v2430_v40  ;;  %769 = vmatpush1.bf16.msra.mxu0 %v2618_v44 }
  0x57   : > { %810 = vmatpush1.bf16.msra.mxu1 %v2621_v45  ;;  %770 = vmatprep.subr.bf16.mxu0 %v2626_v47 }
  0x58   : > { %811 = vmatprep.subr.bf16.mxu1 %v2633_v49  ;;  %800 = vmatprep.mubr.bf16.mxu0 %v2430_v40 }
  0x59   : > { %841 = vmatprep.mubr.bf16.mxu1 %v2430_v40 }
  0x5a   : > { %771 = vmatpush1.bf16.msra.mxu0 %v2636_v50 }
  0x5b   : > { %812 = vmatpush1.bf16.msra.mxu1 %v2642_v52  ;;  %772 = vmatprep.subr.bf16.mxu0 %v2647_v54 }
  0x5c   : > { %813 = vmatprep.subr.bf16.mxu1 %v2654_v55 }
  0x5e   : > { %773 = vmatpush1.bf16.msra.mxu0 %v2657_v56 }
  0x5f   : > { %814 = vmatpush1.bf16.msra.mxu1 %v2660_v57  ;;  %774 = vmatprep.subr.bf16.mxu0 %v2665_v58 }
  0x60   : > { %815 = vmatprep.subr.bf16.mxu1 %v2671_v60 }
  0x62   : > { %775 = vmatpush1.bf16.msra.mxu0 %v2679_v61 }
  0x63   : > { %816 = vmatpush1.bf16.msra.mxu1 %v2686_v0  ;;  %776 = vmatprep.subr.bf16.mxu0 %v2689_v1 }
  0x64   : > { %817 = vmatprep.subr.bf16.mxu1 %v2695_v2 }
  0x66   : > { %777 = vmatpush1.bf16.msra.mxu0 %v2698_v3 }
  0x67   : > { %818 = vmatpush1.bf16.msra.mxu1 %v2701_v4  ;;  %778 = vmatprep.subr.bf16.mxu0 %v2707_v6 }
  0x68   : > { %819 = vmatprep.subr.bf16.mxu1 %v2712_v7 }
  0x6a   : > { %779 = vmatpush1.bf16.msra.mxu0 %v2717_v8 }
  0x6b   : > { %820 = vmatpush1.bf16.msra.mxu1 %v2720_v9  ;;  %780 = vmatprep.subr.bf16.mxu0 %v2725_v10 }
  0x6c   : > { %821 = vmatprep.subr.bf16.mxu1 %v2728_v11 }
  0x6e   : > { %781 = vmatpush1.bf16.msra.mxu0 %v2733_v12 }
  0x6f   : > { %822 = vmatpush1.bf16.msra.mxu1 %v2736_v13  ;;  %782 = vmatprep.subr.bf16.mxu0 %v2741_v14 }
  0x70   : > { %823 = vmatprep.subr.bf16.mxu1 %v2744_v15 }
  0x72   : > { %783 = vmatpush1.bf16.msra.mxu0 %v2749_v16 }
  0x73   : > { %824 = vmatpush1.bf16.msra.mxu1 %v2752_v17  ;;  %923 = vmatprep.subr.bf16.mxu0 %v2603_v42 }
  0x74   : > { %964 = vmatprep.subr.bf16.mxu1 %v2610_v43 }
 0x128   : > { %v649_v23 = vpop.f32.mrb[0].mxu0 }
 0x129   : > { %v690_v24 = vpop.f32.mrb[0].mxu1  ;;  %v651_v26 = vpop.f32.mrb[1].mxu0 }
 0x12a   : > { %v692_v28 = vpop.f32.mrb[1].mxu1  ;;  %v701_v29 = vcombine.low %v649_v23, %v651_v26  ;;  %v653_v31 = vpop.f32.mrb[2].mxu0 }
 0x12b   : > { %v702_v30 = vcombine.low %v690_v24, %v692_v28  ;;  %v694_v32 = vpop.f32.mrb[2].mxu1  ;;  %v654_v33 = vpop.f32.mrb[3].mxu0 }
 0x12c   : > { %v695_v34 = vpop.f32.mrb[3].mxu1  ;;  %v709_v35 = vrot.slane %v701_v29, %v2801_v25  ;;  %v2809_v29 = vpop.permute.xlu0 %753 }
 0x12d   : > { %v716_v37 = vrot.slane %v702_v30, %v2801_v25  ;;  %vm755_vm4 = vcmp.eq.s32.totalorder %v2809_v29, 1 }
 0x12e   : > { %vm2133_vm5 = vmpackc.low %vm755_vm4, %vm755_vm4 }
 0x12f   : > { %v717_v38 = vcombine.low %v709_v35, %v716_v37  ;;  %v1071_v37 = vstv %s2865_s14 }
 0x130   : > { %vm1072_vm7 = vcmp.lt.s32.totalorder %v1071_v37, %v2597_v41 }
 0x131   : > { %v719_v39 = vadd.f32 %v717_v38, %v454_v36  ;;  %v916_v36 = vstv %s2861_s13  ;;  %s1378_s13 = scalar_lea.vmem %s2819_s11, %s2651_s29 [#allocation4]  ;;  %s2154_s29 = sshll.u32 %s2870_s15, 2 }
 0x132   : > { %vm917_vm6 = vcmp.lt.s32.totalorder %v916_v36, %v2597_v41  ;;  %s1384_s14 = scalar_lea.vmem %s2798_s8, %s2154_s29 [#allocation2] }
 0x133   : > { %v2129_v46 = vmul.f32 -1.442695, %v719_v39  ;;  %v727_v48 = vrot.slane %v719_v39, 2  ;;  %v738_v53 = vrot.slane %v719_v39, 6  ;;  %v735_v5 = vrot.slane %v719_v39, 4 }
 0x134   : > { %v1059_v38 = vsel %vm917_vm6, 1, %v2430_v40  ;;  %v1381_v39 = vstv %s2870_s15 }
 0x135   : > { %2246 = vpow2.f32 %v2129_v46  ;;  %v2130_v51 = vmul.f32 -1.442695, %v727_v48  ;;  %v2131_v59 = vmul.f32 -1.442695, %v738_v53  ;;  %1061 = vperm.xlu1 %2197, %v1059_v38   ;;  %v1214_v46 = vsel %vm1072_vm7, 1, %v2430_v40 }
 0x136   : > { %vm1382_vm8 = vcmp.lt.s32.totalorder %v1381_v39, %v2597_v41  ;;  %v1691_v48 = vstv %s2879_s16 }
 0x137   : > { %2248 = vpow2.f32 %v2130_v51  ;;  %v1524_v51 = vsel %vm1382_vm8, 1, %v2430_v40  ;;  %vm1692_vm9 = vcmp.lt.s32.totalorder %v1691_v48, %v2597_v41 }
 0x138   : > { %2250 = vpow2.f32 %v2131_v59  ;;  %v1834_v53 = vsel %vm1692_vm9, 1, %v2430_v40 }
 0x139   : > { %1216 = vperm.xlu1 %2197, %v1214_v46  }
 0x13d   : > { %1526 = vperm.xlu1 %2197, %v1524_v51  }
 0x13f   : > { %v2247_v62 = vpop.eup %2246 }
 0x140   : > { %v723_v63 = vadd.f32 1.0, %v2247_v62 }
 0x141   : > { %v2249_v18 = vpop.eup %2248  ;;  %1836 = vperm.xlu1 %2197, %v1834_v53  }
 0x142   : > { %2252 = vrcp.f32 %v723_v63  ;;  %v732_v19 = vadd.f32 1.0, %v2249_v18  ;;  %v2251_v20 = vpop.eup %2250 }
 0x143   : > { %2254 = vtanh.f32 %v735_v5  ;;  %v743_v24 = vadd.f32 1.0, %v2251_v20  ;;  %v766_v5 = vld [vmem:[%s765_s23] sm:$0xf]  ;;  %s1688_s23 = scalar_lea.vmem %s2819_s11, %s2676_s30 [#allocation4] }
 0x144   : > { %2256 = vrcp.f32 %v732_v19  ;;  %v767_v41 = vunpack.c.l.bf16 %v766_v5 }
 0x145   : > { %2258 = vrcp.f32 %v743_v24 }
 0x14c   : > { %v2253_v21 = vpop.eup %2252 }
 0x14d   : > { %v2255_v22 = vpop.eup %2254 }
 0x14e   : > { %v2257_v23 = vpop.eup %2256  ;;  %v747_v27 = vmul.f32 %v2255_v22, %v2253_v21 }
 0x14f   : > { %v746_v26 = vmul.f32 0.0, %v2257_v23  ;;  %v2259_v30 = vpop.eup %2258 }
 0x151   : > { %v2805_v28 = vadd.f32 %v747_v27, %v746_v26 }
 0x153   : > { %2260 = vtanh.f32 %v2805_v28  ;;  %v757_v5 = vsel %vm755_vm4, %v2805_v28, 0.0 }
 0x15d   : > { %v2261_v31 = vpop.eup %2260 }
 0x15e   : > { %v750_v32 = vmul.f32 %v2261_v31, %v2259_v30 }
 0x160   : > { %v2817_v33 = vsel %vm755_vm4, %v750_v32, 0.0  ;;  %v2134_v34 = vpack.c.bf16 %v750_v32, %v750_v32 }
 0x161   : > { %v758_v35 = vpack.c.bf16 %v2817_v33, %v2817_v33 }
 0x162   : > { %2135 = vmatmul.mubr.msk.bf16.vlgmr.msra.gmra.mrb[4].mxu0 %vm2133_vm5, %v2134_v34  ;;  %2138 = vmatmul.mubr.msk.bf16.vlgmr.msra.gmra.mrb[4].mxu1 %vm2133_vm5, %v2134_v34 }
 0x163   : > { %760 = vst [vmem:[%s759_s12] sm:$0x1] %v758_v35  ;;  %924 = vmatpush1.bf16.msra.mxu0 %v2618_v44  ;;  %965 = vmatpush1.bf16.msra.mxu1 %v2621_v45  ;;  %s1229_s12 = scalar_lea.vmem %s2798_s8, %s2150_s10 [#allocation2] }
 0x164   : > { %925 = vmatprep.subr.bf16.mxu0 %v2626_v47  ;;  %966 = vmatprep.subr.bf16.mxu1 %v2633_v49 }
 0x165   : > { %955 = vmatprep.mubr.bf16.mxu0 %v2430_v40  ;;  %996 = vmatprep.mubr.bf16.mxu1 %v2430_v40 }
 0x167   : > { %926 = vmatpush1.bf16.msra.mxu0 %v2636_v50  ;;  %967 = vmatpush1.bf16.msra.mxu1 %v2642_v52 }
 0x168   : > { %927 = vmatprep.subr.bf16.mxu0 %v2647_v54  ;;  %968 = vmatprep.subr.bf16.mxu1 %v2654_v55 }
 0x16b   : > { %928 = vmatpush1.bf16.msra.mxu0 %v2657_v56  ;;  %969 = vmatpush1.bf16.msra.mxu1 %v2660_v57 }
 0x16c   : > { %929 = vmatprep.subr.bf16.mxu0 %v2665_v58  ;;  %970 = vmatprep.subr.bf16.mxu1 %v2671_v60 }
 0x16f   : > { %930 = vmatpush1.bf16.msra.mxu0 %v2679_v61  ;;  %971 = vmatpush1.bf16.msra.mxu1 %v2686_v0 }
 0x170   : > { %931 = vmatprep.subr.bf16.mxu0 %v2689_v1  ;;  %972 = vmatprep.subr.bf16.mxu1 %v2695_v2 }
 0x173   : > { %932 = vmatpush1.bf16.msra.mxu0 %v2698_v3  ;;  %973 = vmatpush1.bf16.msra.mxu1 %v2701_v4 }
 0x174   : > { %933 = vmatprep.subr.bf16.mxu0 %v2707_v6  ;;  %974 = vmatprep.subr.bf16.mxu1 %v2712_v7 }
 0x177   : > { %934 = vmatpush1.bf16.msra.mxu0 %v2717_v8  ;;  %975 = vmatpush1.bf16.msra.mxu1 %v2720_v9 }
 0x178   : > { %935 = vmatprep.subr.bf16.mxu0 %v2725_v10  ;;  %976 = vmatprep.subr.bf16.mxu1 %v2728_v11 }
 0x17b   : > { %936 = vmatpush1.bf16.msra.mxu0 %v2733_v12  ;;  %977 = vmatpush1.bf16.msra.mxu1 %v2736_v13 }
 0x17c   : > { %937 = vmatprep.subr.bf16.mxu0 %v2741_v14  ;;  %978 = vmatprep.subr.bf16.mxu1 %v2744_v15 }
 0x17f   : > { %938 = vmatpush1.bf16.msra.mxu0 %v2749_v16  ;;  %979 = vmatpush1.bf16.msra.mxu1 %v2752_v17 }
 0x180   : > { %1078 = vmatprep.subr.bf16.mxu0 %v2603_v42  ;;  %1119 = vmatprep.subr.bf16.mxu1 %v2610_v43 }
 0x235   : > { %v802_v59 = vpop.f32.mrb[4].mxu0  ;;  %v843_v62 = vpop.f32.mrb[4].mxu1 }
 0x236   : > { %v804_v63 = vpop.f32.mrb[5].mxu0  ;;  %v845_v18 = vpop.f32.mrb[5].mxu1 }
 0x237   : > { %v854_v19 = vcombine.low %v802_v59, %v804_v63  ;;  %v855_v20 = vcombine.low %v843_v62, %v845_v18  ;;  %v806_v21 = vpop.f32.mrb[6].mxu0  ;;  %v847_v22 = vpop.f32.mrb[6].mxu1 }
 0x238   : > { %v807_v23 = vpop.f32.mrb[7].mxu0  ;;  %v848_v24 = vpop.f32.mrb[7].mxu1 }
 0x239   : > { %v862_v26 = vrot.slane %v854_v19, %v2801_v25  ;;  %v869_v27 = vrot.slane %v855_v20, %v2801_v25  ;;  %v907_v21 = vpop.permute.xlu0 %906 }
 0x23a   : > { %vm908_vm10 = vcmp.eq.s32.totalorder %v907_v21, 1 }
 0x23b   : > { %v870_v30 = vcombine.low %v862_v26, %v869_v27 }
 0x23d   : > { %v872_v31 = vadd.f32 %v870_v30, %v767_v41 }
 0x23f   : > { %v2139_v32 = vmul.f32 -1.442695, %v872_v31  ;;  %v880_v34 = vrot.slane %v872_v31, 2  ;;  %v891_v36 = vrot.slane %v872_v31, 6  ;;  %v888_v39 = vrot.slane %v872_v31, 4 }
 0x241   : > { %2262 = vpow2.f32 %v2139_v32  ;;  %v2140_v35 = vmul.f32 -1.442695, %v880_v34  ;;  %v2141_v37 = vmul.f32 -1.442695, %v891_v36  ;;  %v920_v34 = vld [vmem:[%s919_s18] sm:$0xf] }
 0x243   : > { %2264 = vpow2.f32 %v2140_v35 }
 0x244   : > { %2266 = vpow2.f32 %v2141_v37 }
 0x24b   : > { %v2263_v38 = vpop.eup %2262 }
 0x24c   : > { %v876_v46 = vadd.f32 1.0, %v2263_v38 }
 0x24d   : > { %v2265_v48 = vpop.eup %2264 }
 0x24e   : > { %2268 = vrcp.f32 %v876_v46  ;;  %v885_v51 = vadd.f32 1.0, %v2265_v48  ;;  %v2267_v53 = vpop.eup %2266 }
 0x24f   : > { %2270 = vtanh.f32 %v888_v39  ;;  %v896_v18 = vadd.f32 1.0, %v2267_v53  ;;  %v921_v53 = vunpack.c.l.bf16 %v920_v34 }
 0x250   : > { %2272 = vrcp.f32 %v885_v51 }
 0x251   : > { %2274 = vrcp.f32 %v896_v18 }
 0x258   : > { %v2269_v59 = vpop.eup %2268 }
 0x259   : > { %v2271_v62 = vpop.eup %2270 }
 0x25a   : > { %v2273_v63 = vpop.eup %2272  ;;  %v900_v19 = vmul.f32 %v2271_v62, %v2269_v59 }
 0x25b   : > { %v899_v20 = vmul.f32 %v2273_v63, %v757_v5  ;;  %v2275_v24 = vpop.eup %2274 }
 0x25d   : > { %v901_v22 = vadd.f32 %v900_v19, %v899_v20 }
 0x25f   : > { %2276 = vtanh.f32 %v901_v22  ;;  %v2894_v23 = vsel %vm908_vm10, %v901_v22, %v757_v5 }
 0x269   : > { %v2277_v26 = vpop.eup %2276 }
 0x26a   : > { %v903_v41 = vmul.f32 %v2277_v26, %v2275_v24 }
 0x26c   : > { %v2899_v27 = vsel %vm908_vm10, %v903_v41, %v2817_v33  ;;  %v911_v30 = vsel %vm908_vm10, %v903_v41, 0.0 }
 0x26d   : > { %v912_v29 = vpack.c.bf16 %v911_v30, %v911_v30  ;;  %v922_v28 = vpack.c.bf16 %v2899_v27, %v2899_v27 }
 0x26f   : > { %914 = vst [vmem:[%s913_s24] sm:$0x1] %v912_v29  ;;  %956 = vmatmul.mubr.bf16.vlgmr.msra.gmra.mrb[8].mxu0 %v922_v28  ;;  %997 = vmatmul.mubr.bf16.vlgmr.msra.gmra.mrb[8].mxu1 %v922_v28  ;;  %s2162_s24 = sshll.u32 %s2879_s16, 2 }
 0x270   : > { %1079 = vmatpush1.bf16.msra.mxu0 %v2618_v44  ;;  %1120 = vmatpush1.bf16.msra.mxu1 %v2621_v45  ;;  %s1694_s20 = scalar_lea.vmem %s2798_s8, %s2162_s24 [#allocation2] }
 0x271   : > { %1080 = vmatprep.subr.bf16.mxu0 %v2626_v47  ;;  %1121 = vmatprep.subr.bf16.mxu1 %v2633_v49 }
 0x272   : > { %1110 = vmatprep.mubr.bf16.mxu0 %v2430_v40  ;;  %1151 = vmatprep.mubr.bf16.mxu1 %v2430_v40 }
 0x274   : > { %1081 = vmatpush1.bf16.msra.mxu0 %v2636_v50  ;;  %1122 = vmatpush1.bf16.msra.mxu1 %v2642_v52 }
 0x275   : > { %1082 = vmatprep.subr.bf16.mxu0 %v2647_v54  ;;  %1123 = vmatprep.subr.bf16.mxu1 %v2654_v55 }
 0x278   : > { %1083 = vmatpush1.bf16.msra.mxu0 %v2657_v56  ;;  %1124 = vmatpush1.bf16.msra.mxu1 %v2660_v57 }
 0x279   : > { %1084 = vmatprep.subr.bf16.mxu0 %v2665_v58  ;;  %1125 = vmatprep.subr.bf16.mxu1 %v2671_v60 }
 0x27c   : > { %1085 = vmatpush1.bf16.msra.mxu0 %v2679_v61  ;;  %1126 = vmatpush1.bf16.msra.mxu1 %v2686_v0 }
 0x27d   : > { %1086 = vmatprep.subr.bf16.mxu0 %v2689_v1  ;;  %1127 = vmatprep.subr.bf16.mxu1 %v2695_v2 }
 0x280   : > { %1087 = vmatpush1.bf16.msra.mxu0 %v2698_v3  ;;  %1128 = vmatpush1.bf16.msra.mxu1 %v2701_v4 }
 0x281   : > { %1088 = vmatprep.subr.bf16.mxu0 %v2707_v6  ;;  %1129 = vmatprep.subr.bf16.mxu1 %v2712_v7 }
 0x284   : > { %1089 = vmatpush1.bf16.msra.mxu0 %v2717_v8  ;;  %1130 = vmatpush1.bf16.msra.mxu1 %v2720_v9 }
 0x285   : > { %1090 = vmatprep.subr.bf16.mxu0 %v2725_v10  ;;  %1131 = vmatprep.subr.bf16.mxu1 %v2728_v11 }
 0x288   : > { %1091 = vmatpush1.bf16.msra.mxu0 %v2733_v12  ;;  %1132 = vmatpush1.bf16.msra.mxu1 %v2736_v13 }
 0x289   : > { %1092 = vmatprep.subr.bf16.mxu0 %v2741_v14  ;;  %1133 = vmatprep.subr.bf16.mxu1 %v2744_v15 }
 0x28c   : > { %1093 = vmatpush1.bf16.msra.mxu0 %v2749_v16  ;;  %1134 = vmatpush1.bf16.msra.mxu1 %v2752_v17 }
 0x28d   : > { %1233 = vmatprep.subr.bf16.mxu0 %v2603_v42  ;;  %1274 = vmatprep.subr.bf16.mxu1 %v2610_v43 }
 0x342   : > { %v957_v33 = vpop.f32.mrb[8].mxu0  ;;  %v998_v31 = vpop.f32.mrb[8].mxu1 }
 0x343   : > { %v959_v32 = vpop.f32.mrb[9].mxu0  ;;  %v1000_v35 = vpop.f32.mrb[9].mxu1 }
 0x344   : > { %v1009_v36 = vcombine.low %v957_v33, %v959_v32  ;;  %v1010_v37 = vcombine.low %v998_v31, %v1000_v35  ;;  %v961_v38 = vpop.f32.mrb[10].mxu0  ;;  %v1002_v39 = vpop.f32.mrb[10].mxu1 }
 0x345   : > { %v962_v46 = vpop.f32.mrb[11].mxu0  ;;  %v1003_v48 = vpop.f32.mrb[11].mxu1 }
 0x346   : > { %v1017_v51 = vrot.slane %v1009_v36, %v2801_v25  ;;  %v1024_v59 = vrot.slane %v1010_v37, %v2801_v25  ;;  %v1062_v31 = vpop.permute.xlu1 %1061 }
 0x347   : > { %vm1063_vm11 = vcmp.eq.s32.totalorder %v1062_v31, 1 }
 0x348   : > { %v1025_v62 = vcombine.low %v1017_v51, %v1024_v59 }
 0x34a   : > { %v1027_v63 = vadd.f32 %v1025_v62, %v921_v53 }
 0x34c   : > { %v2143_v5 = vmul.f32 -1.442695, %v1027_v63  ;;  %v1035_v18 = vrot.slane %v1027_v63, 2  ;;  %v1046_v20 = vrot.slane %v1027_v63, 6  ;;  %v1043_v24 = vrot.slane %v1027_v63, 4 }
 0x34e   : > { %2278 = vpow2.f32 %v2143_v5  ;;  %v2144_v19 = vmul.f32 -1.442695, %v1035_v18  ;;  %v2145_v21 = vmul.f32 -1.442695, %v1046_v20  ;;  %v1075_v5 = vld [vmem:[%s1074_s7] sm:$0xf] }
 0x350   : > { %2280 = vpow2.f32 %v2144_v19 }
 0x351   : > { %2282 = vpow2.f32 %v2145_v21 }
 0x358   : > { %v2279_v22 = vpop.eup %2278 }
 0x359   : > { %v1031_v26 = vadd.f32 1.0, %v2279_v22 }
 0x35a   : > { %v2281_v41 = vpop.eup %2280 }
 0x35b   : > { %2284 = vrcp.f32 %v1031_v26  ;;  %v1040_v30 = vadd.f32 1.0, %v2281_v41  ;;  %v2283_v29 = vpop.eup %2282 }
 0x35c   : > { %2286 = vtanh.f32 %v1043_v24  ;;  %v1051_v34 = vadd.f32 1.0, %v2283_v29 }
 0x35d   : > { %2288 = vrcp.f32 %v1040_v30  ;;  %v1076_v30 = vunpack.c.l.bf16 %v1075_v5  ;;  %v1217_v5 = vpop.permute.xlu1 %1216 }
 0x35e   : > { %2290 = vrcp.f32 %v1051_v34  ;;  %vm1218_vm12 = vcmp.eq.s32.totalorder %v1217_v5, 1  ;;  %v3087_v5 = vld [vmem:[%s2600_s26 + $0x4c] ss:$16 sps:$4 sm:$0xff]  }
 0x365   : > { %v2285_v28 = vpop.eup %2284 }
 0x366   : > { %v2287_v33 = vpop.eup %2286 }
 0x367   : > { %v2289_v32 = vpop.eup %2288  ;;  %v1055_v36 = vmul.f32 %v2287_v33, %v2285_v28 }
 0x368   : > { %v1054_v35 = vmul.f32 %v2289_v32, %v2894_v23  ;;  %v2291_v39 = vpop.eup %2290 }
 0x36a   : > { %v1056_v37 = vadd.f32 %v1055_v36, %v1054_v35 }
 0x36c   : > { %2292 = vtanh.f32 %v1056_v37  ;;  %v2943_v38 = vsel %vm1063_vm11, %v1056_v37, %v2894_v23 }
 0x376   : > { %v2293_v46 = vpop.eup %2292 }
 0x377   : > { %v1058_v48 = vmul.f32 %v2293_v46, %v2291_v39 }
 0x379   : > { %v2946_v51 = vsel %vm1063_vm11, %v1058_v48, %v2899_v27  ;;  %v1066_v53 = vsel %vm1063_vm11, %v1058_v48, 0.0 }
 0x37a   : > { %v1067_v59 = vpack.c.bf16 %v1066_v53, %v1066_v53  ;;  %v1077_v62 = vpack.c.bf16 %v2946_v51, %v2946_v51 }
 0x37c   : > { %1069 = vst [vmem:[%s1068_s28] sm:$0x1] %v1067_v59  ;;  %1111 = vmatmul.mubr.bf16.vlgmr.msra.gmra.mrb[12].mxu0 %v1077_v62  ;;  %1152 = vmatmul.mubr.bf16.vlgmr.msra.gmra.mrb[12].mxu1 %v1077_v62 }
 0x37d   : > { %1234 = vmatpush1.bf16.msra.mxu0 %v2618_v44  ;;  %1275 = vmatpush1.bf16.msra.mxu1 %v2621_v45 }
 0x37e   : > { %1235 = vmatprep.subr.bf16.mxu0 %v2626_v47  ;;  %1276 = vmatprep.subr.bf16.mxu1 %v2633_v49 }
 0x37f   : > { %1265 = vmatprep.mubr.bf16.mxu0 %v2430_v40  ;;  %1306 = vmatprep.mubr.bf16.mxu1 %v2430_v40 }
 0x381   : > { %1236 = vmatpush1.bf16.msra.mxu0 %v2636_v50  ;;  %1277 = vmatpush1.bf16.msra.mxu1 %v2642_v52 }
 0x382   : > { %1237 = vmatprep.subr.bf16.mxu0 %v2647_v54  ;;  %1278 = vmatprep.subr.bf16.mxu1 %v2654_v55 }
 0x385   : > { %1238 = vmatpush1.bf16.msra.mxu0 %v2657_v56  ;;  %1279 = vmatpush1.bf16.msra.mxu1 %v2660_v57 }
 0x386   : > { %1239 = vmatprep.subr.bf16.mxu0 %v2665_v58  ;;  %1280 = vmatprep.subr.bf16.mxu1 %v2671_v60 }
 0x389   : > { %1240 = vmatpush1.bf16.msra.mxu0 %v2679_v61  ;;  %1281 = vmatpush1.bf16.msra.mxu1 %v2686_v0 }
 0x38a   : > { %1241 = vmatprep.subr.bf16.mxu0 %v2689_v1  ;;  %1282 = vmatprep.subr.bf16.mxu1 %v2695_v2 }
 0x38d   : > { %1242 = vmatpush1.bf16.msra.mxu0 %v2698_v3  ;;  %1283 = vmatpush1.bf16.msra.mxu1 %v2701_v4 }
 0x38e   : > { %1243 = vmatprep.subr.bf16.mxu0 %v2707_v6  ;;  %1284 = vmatprep.subr.bf16.mxu1 %v2712_v7 }
 0x391   : > { %1244 = vmatpush1.bf16.msra.mxu0 %v2717_v8  ;;  %1285 = vmatpush1.bf16.msra.mxu1 %v2720_v9 }
 0x392   : > { %1245 = vmatprep.subr.bf16.mxu0 %v2725_v10  ;;  %1286 = vmatprep.subr.bf16.mxu1 %v2728_v11 }
 0x395   : > { %1246 = vmatpush1.bf16.msra.mxu0 %v2733_v12  ;;  %1287 = vmatpush1.bf16.msra.mxu1 %v2736_v13 }
 0x396   : > { %1247 = vmatprep.subr.bf16.mxu0 %v2741_v14  ;;  %1288 = vmatprep.subr.bf16.mxu1 %v2744_v15 }
 0x399   : > { %1248 = vmatpush1.bf16.msra.mxu0 %v2749_v16  ;;  %1289 = vmatpush1.bf16.msra.mxu1 %v2752_v17 }
 0x39a   : > { %1388 = vmatprep.subr.bf16.mxu0 %v2603_v42  ;;  %1429 = vmatprep.subr.bf16.mxu1 %v2610_v43 }
 0x44f   : > { %v1112_v23 = vpop.f32.mrb[12].mxu0  ;;  %v1153_v27 = vpop.f32.mrb[12].mxu1 }
 0x450   : > { %v1114_v63 = vpop.f32.mrb[13].mxu0  ;;  %v1155_v18 = vpop.f32.mrb[13].mxu1 }
 0x451   : > { %v1164_v19 = vcombine.low %v1112_v23, %v1114_v63  ;;  %v1165_v20 = vcombine.low %v1153_v27, %v1155_v18  ;;  %v1116_v21 = vpop.f32.mrb[14].mxu0  ;;  %v1157_v22 = vpop.f32.mrb[14].mxu1 }
 0x452   : > { %v1117_v24 = vpop.f32.mrb[15].mxu0  ;;  %v1158_v26 = vpop.f32.mrb[15].mxu1 }
 0x453   : > { %v1172_v41 = vrot.slane %v1164_v19, %v2801_v25  ;;  %v1179_v42 = vrot.slane %v1165_v20, %v2801_v25 }
 0x455   : > { %v1180_v29 = vcombine.low %v1172_v41, %v1179_v42 }
 0x457   : > { %v1182_v43 = vadd.f32 %v1180_v29, %v1076_v30 }
 0x459   : > { %v2147_v28 = vmul.f32 -1.442695, %v1182_v43  ;;  %v1190_v33 = vrot.slane %v1182_v43, 2  ;;  %v1201_v32 = vrot.slane %v1182_v43, 6  ;;  %v1198_v36 = vrot.slane %v1182_v43, 4 }
 0x45b   : > { %2294 = vpow2.f32 %v2147_v28  ;;  %v2148_v31 = vmul.f32 -1.442695, %v1190_v33  ;;  %v2149_v34 = vmul.f32 -1.442695, %v1201_v32  ;;  %v1372_v28 = vpop.permute.xlu0 %1371 }
 0x45c   : > { %vm1373_vm13 = vcmp.eq.s32.totalorder %v1372_v28, 1 }
 0x45d   : > { %2296 = vpow2.f32 %v2148_v31 }
 0x45e   : > { %2298 = vpow2.f32 %v2149_v34 }
 0x465   : > { %v2295_v35 = vpop.eup %2294 }
 0x466   : > { %v1186_v37 = vadd.f32 1.0, %v2295_v35 }
 0x467   : > { %v2297_v39 = vpop.eup %2296 }
 0x468   : > { %2300 = vrcp.f32 %v1186_v37  ;;  %v1195_v46 = vadd.f32 1.0, %v2297_v39  ;;  %v2299_v48 = vpop.eup %2298 }
 0x469   : > { %2302 = vtanh.f32 %v1198_v36  ;;  %v1206_v23 = vadd.f32 1.0, %v2299_v48  ;;  %v3057_v48 = vld [vmem:[%s2600_s26] ss:$16 sps:$4 sm:$0xff]  }
 0x46a   : > { %2304 = vrcp.f32 %v1195_v46 }
 0x46b   : > { %2306 = vrcp.f32 %v1206_v23  ;;  %v3075_v23 = vld [vmem:[%s2600_s26 + $0x20] ss:$16 sps:$4 sm:$0xff]  }
 0x472   : > { %v2301_v53 = vpop.eup %2300 }
 0x473   : > { %v2303_v59 = vpop.eup %2302 }
 0x474   : > { %v2305_v62 = vpop.eup %2304  ;;  %v1210_v27 = vmul.f32 %v2303_v59, %v2301_v53  ;;  %v3061_v53 = vld [vmem:[%s2600_s26 + $0x8] ss:$16 sps:$4 sm:$0xff]   ;;  %v3065_v59 = vld [vmem:[%s2600_s26 + $0x24] ss:$16 sps:$4 sm:$0xff]  }
 0x475   : > { %v1209_v63 = vmul.f32 %v2305_v62, %v2943_v38  ;;  %v2307_v20 = vpop.eup %2306  ;;  %v3069_v62 = vld [vmem:[%s2600_s26 + $0x2c] ss:$16 sps:$4 sm:$0xff]  }
 0x477   : > { %v1211_v18 = vadd.f32 %v1210_v27, %v1209_v63  ;;  %v3079_v27 = vld [vmem:[%s2600_s26 + $0x28] ss:$16 sps:$4 sm:$0xff]   ;;  %v3083_v63 = vld [vmem:[%s2600_s26 + $0x44] ss:$16 sps:$4 sm:$0xff]  }
 0x479   : > { %2308 = vtanh.f32 %v1211_v18  ;;  %v2992_v19 = vsel %vm1218_vm12, %v1211_v18, %v2943_v38  ;;  %v3091_v18 = vld [vmem:[%s2600_s26 + $0x40] ss:$16 sps:$4 sm:$0xff]  }
 0x483   : > { %v2309_v21 = vpop.eup %2308 }
 0x484   : > { %v1213_v22 = vmul.f32 %v2309_v21, %v2307_v20  ;;  %v3099_v20 = vld [vmem:[%s2600_s26 + $0x64] ss:$16 sps:$4 sm:$0xff]   ;;  %v3103_v21 = vld [vmem:[%s2600_s26 + $0x6c] ss:$16 sps:$4 sm:$0xff]  }
 0x486   : > { %v2997_v24 = vsel %vm1218_vm12, %v1213_v22, %v2946_v51  ;;  %v1221_v26 = vsel %vm1218_vm12, %v1213_v22, 0.0  ;;  %v3107_v22 = vld [vmem:[%s2600_s26 + $0x60] ss:$16 sps:$4 sm:$0xff]  }
 0x487   : > { %v1222_v41 = vpack.c.bf16 %v1221_v26, %v1221_v26  ;;  %v1232_v30 = vpack.c.bf16 %v2997_v24, %v2997_v24  ;;  %v3115_v26 = vld [vmem:[%s2600_s26 + $0x84] ss:$16 sps:$4 sm:$0xff]  }
 0x489   : > { %1224 = vst [vmem:[%s1223_s9] sm:$0x1] %v1222_v41  ;;  %1266 = vmatmul.mubr.bf16.vlgmr.msra.gmra.mrb[16].mxu0 %v1232_v30  ;;  %1307 = vmatmul.mubr.bf16.vlgmr.msra.gmra.mrb[16].mxu1 %v1232_v30  ;;  %v3119_v41 = vld [vmem:[%s2600_s26 + $0x8c] ss:$16 sps:$4 sm:$0xff]   ;;  %v3123_v30 = vld [vmem:[%s2600_s26 + $0x80] ss:$16 sps:$4 sm:$0xff]  }
 0x48a   : > { %1389 = vmatpush1.bf16.msra.mxu0 %v2618_v44  ;;  %1430 = vmatpush1.bf16.msra.mxu1 %v2621_v45  ;;  %v3034_v44 = vld [vmem:[%s2600_s26 + $0x4] ss:$16 sps:$4 sm:$0xff]   ;;  %v3038_v45 = vld [vmem:[%s2600_s26 + $0xc] ss:$16 sps:$4 sm:$0xff]  }
 0x48b   : > { %1390 = vmatprep.subr.bf16.mxu0 %v2626_v47  ;;  %1431 = vmatprep.subr.bf16.mxu1 %v2633_v49 }
 0x48c   : > { %1420 = vmatprep.mubr.bf16.mxu0 %v2430_v40  ;;  %1461 = vmatprep.mubr.bf16.mxu1 %v2430_v40 }
 0x48e   : > { %1391 = vmatpush1.bf16.msra.mxu0 %v2636_v50  ;;  %1432 = vmatpush1.bf16.msra.mxu1 %v2642_v52  ;;  %v1230_v52 = vld [vmem:[%s1229_s12] sm:$0xf]  ;;  %s1843_s12 = scalar_lea.vmem %s2819_s11, %s2879_s16 [#allocation4]  ;;  %s1862_s16 = scalar_lea.vmem (%p2497_p5), %s3286_s3, %s2478_s21 }
 0x48f   : > { %1392 = vmatprep.subr.bf16.mxu0 %v2647_v54  ;;  %1433 = vmatprep.subr.bf16.mxu1 %v2654_v55 }
 0x492   : > { %1393 = vmatpush1.bf16.msra.mxu0 %v2657_v56  ;;  %1434 = vmatpush1.bf16.msra.mxu1 %v2660_v57 }
 0x493   : > { %1394 = vmatprep.subr.bf16.mxu0 %v2665_v58  ;;  %1435 = vmatprep.subr.bf16.mxu1 %v2671_v60 }
 0x496   : > { %1395 = vmatpush1.bf16.msra.mxu0 %v2679_v61  ;;  %1436 = vmatpush1.bf16.msra.mxu1 %v2686_v0 }
 0x497   : > { %1396 = vmatprep.subr.bf16.mxu0 %v2689_v1  ;;  %1437 = vmatprep.subr.bf16.mxu1 %v2695_v2  ;;  %v1231_v1 = vunpack.c.l.bf16 %v1230_v52  ;;  %v3139_v52 = vld [vmem:[%s2600_s26 + $0xa0] ss:$16 sps:$4 sm:$0xff]  }
 0x49a   : > { %1397 = vmatpush1.bf16.msra.mxu0 %v2698_v3  ;;  %1438 = vmatpush1.bf16.msra.mxu1 %v2701_v4 }
 0x49b   : > { %1398 = vmatprep.subr.bf16.mxu0 %v2707_v6  ;;  %1439 = vmatprep.subr.bf16.mxu1 %v2712_v7 }
 0x49e   : > { %1399 = vmatpush1.bf16.msra.mxu0 %v2717_v8  ;;  %1440 = vmatpush1.bf16.msra.mxu1 %v2720_v9 }
 0x49f   : > { %1400 = vmatprep.subr.bf16.mxu0 %v2725_v10  ;;  %1441 = vmatprep.subr.bf16.mxu1 %v2728_v11 }
 0x4a2   : > { %1401 = vmatpush1.bf16.msra.mxu0 %v2733_v12  ;;  %1442 = vmatpush1.bf16.msra.mxu1 %v2736_v13 }
 0x4a3   : > { %1402 = vmatprep.subr.bf16.mxu0 %v2741_v14  ;;  %1443 = vmatprep.subr.bf16.mxu1 %v2744_v15 }
 0x4a6   : > { %1403 = vmatpush1.bf16.msra.mxu0 %v2749_v16  ;;  %1444 = vmatpush1.bf16.msra.mxu1 %v2752_v17 }
 0x4a7   : > { %1543 = vmatprep.subr.bf16.mxu0 %v3034_v44  ;;  %1584 = vmatprep.subr.bf16.mxu1 %v3038_v45 }
 0x55c   : > { %v1267_v47 = vpop.f32.mrb[16].mxu0  ;;  %v1308_v49 = vpop.f32.mrb[16].mxu1 }
 0x55d   : > { %v1269_v50 = vpop.f32.mrb[17].mxu0  ;;  %v1310_v54 = vpop.f32.mrb[17].mxu1 }
 0x55e   : > { %v1319_v55 = vcombine.low %v1267_v47, %v1269_v50  ;;  %v1320_v56 = vcombine.low %v1308_v49, %v1310_v54  ;;  %v1271_v57 = vpop.f32.mrb[18].mxu0  ;;  %v1312_v58 = vpop.f32.mrb[18].mxu1  ;;  %v3127_v47 = vld [vmem:[%s2600_s26 + $0x88] ss:$16 sps:$4 sm:$0xff]   ;;  %v3131_v49 = vld [vmem:[%s2600_s26 + $0xa4] ss:$16 sps:$4 sm:$0xff]  }
 0x55f   : > { %v1272_v60 = vpop.f32.mrb[19].mxu0  ;;  %v1313_v61 = vpop.f32.mrb[19].mxu1  ;;  %v3135_v50 = vld [vmem:[%s2600_s26 + $0xac] ss:$16 sps:$4 sm:$0xff]   ;;  %v3143_v54 = vld [vmem:[%s2600_s26 + $0xa8] ss:$16 sps:$4 sm:$0xff]  }
 0x560   : > { %v1327_v0 = vrot.slane %v1319_v55, %v2801_v25  ;;  %v1334_v2 = vrot.slane %v1320_v56, %v2801_v25  ;;  %v3147_v55 = vld [vmem:[%s2600_s26 + $0xc4] ss:$16 sps:$4 sm:$0xff]   ;;  %v3151_v56 = vld [vmem:[%s2600_s26 + $0xcc] ss:$16 sps:$4 sm:$0xff]   ;;  %v3155_v57 = vld [vmem:[%s2600_s26 + $0xc0] ss:$16 sps:$4 sm:$0xff]  }
 0x561   : > { %v3159_v58 = vld [vmem:[%s2600_s26 + $0xc8] ss:$16 sps:$4 sm:$0xff]   ;;  %v3163_v60 = vld [vmem:[%s2600_s26 + $0xe4] ss:$16 sps:$4 sm:$0xff]   ;;  %v3167_v61 = vld [vmem:[%s2600_s26 + $0xec] ss:$16 sps:$4 sm:$0xff]  }
 0x562   : > { %v1335_v3 = vcombine.low %v1327_v0, %v1334_v2  ;;  %v3171_v0 = vld [vmem:[%s2600_s26 + $0xe0] ss:$16 sps:$4 sm:$0xff]  }
 0x564   : > { %v1337_v4 = vadd.f32 %v1335_v3, %v1231_v1  ;;  %v3175_v1 = vld [vmem:[%s2600_s26 + $0xe8] ss:$16 sps:$4 sm:$0xff]  }
 0x566   : > { %v2151_v6 = vmul.f32 -1.442695, %v1337_v4  ;;  %v1345_v7 = vrot.slane %v1337_v4, 2  ;;  %v1356_v9 = vrot.slane %v1337_v4, 6  ;;  %v1353_v12 = vrot.slane %v1337_v4, 4 }
 0x568   : > { %2310 = vpow2.f32 %v2151_v6  ;;  %v2152_v8 = vmul.f32 -1.442695, %v1345_v7  ;;  %v2153_v10 = vmul.f32 -1.442695, %v1356_v9  ;;  %v1385_v6 = vld [vmem:[%s1384_s14] sm:$0xf] }
 0x56a   : > { %2312 = vpow2.f32 %v2152_v8 }
 0x56b   : > { %2314 = vpow2.f32 %v2153_v10 }
 0x572   : > { %v2311_v11 = vpop.eup %2310 }
 0x573   : > { %v1341_v13 = vadd.f32 1.0, %v2311_v11 }
 0x574   : > { %v2313_v14 = vpop.eup %2312 }
 0x575   : > { %2316 = vrcp.f32 %v1341_v13  ;;  %v1350_v15 = vadd.f32 1.0, %v2313_v14  ;;  %v2315_v16 = vpop.eup %2314 }
 0x576   : > { %2318 = vtanh.f32 %v1353_v12  ;;  %v1361_v42 = vadd.f32 1.0, %v2315_v16 }
 0x577   : > { %2320 = vrcp.f32 %v1350_v15  ;;  %v1386_v15 = vunpack.c.l.bf16 %v1385_v6  ;;  %v1527_v6 = vpop.permute.xlu1 %1526 }
 0x578   : > { %2322 = vrcp.f32 %v1361_v42  ;;  %vm1528_vm14 = vcmp.eq.s32.totalorder %v1527_v6, 1 }
 0x57f   : > { %v2317_v17 = vpop.eup %2316 }
 0x580   : > { %v2319_v38 = vpop.eup %2318 }
 0x581   : > { %v2321_v51 = vpop.eup %2320  ;;  %v1365_v29 = vmul.f32 %v2319_v38, %v2317_v17 }
 0x582   : > { %v1364_v43 = vmul.f32 %v2321_v51, %v2992_v19  ;;  %v2323_v32 = vpop.eup %2322 }
 0x584   : > { %v1366_v33 = vadd.f32 %v1365_v29, %v1364_v43 }
 0x586   : > { %2324 = vtanh.f32 %v1366_v33  ;;  %v3047_v31 = vsel %vm1373_vm13, %v1366_v33, %v2992_v19  ;;  %v3095_v19 = vld [vmem:[%s2600_s26 + $0x48] ss:$16 sps:$4 sm:$0xff]  }
 0x590   : > { %v2325_v34 = vpop.eup %2324 }
 0x591   : > { %v1368_v35 = vmul.f32 %v2325_v34, %v2323_v32 }
 0x593   : > { %v3052_v36 = vsel %vm1373_vm13, %v1368_v35, %v2997_v24  ;;  %v1376_v37 = vsel %vm1373_vm13, %v1368_v35, 0.0  ;;  %v3111_v24 = vld [vmem:[%s2600_s26 + $0x68] ss:$16 sps:$4 sm:$0xff]   ;;  %s1533_s26 = scalar_lea.vmem %s2819_s11, %s2870_s15 [#allocation4]  ;;  %s2158_s15 = sshll.u32 %s2676_s30, 2 }
 0x594   : > { %v1377_v39 = vpack.c.bf16 %v1376_v37, %v1376_v37  ;;  %v1387_v46 = vpack.c.bf16 %v3052_v36, %v3052_v36  ;;  %s1539_s17 = scalar_lea.vmem %s2798_s8, %s2158_s15 [#allocation2] }
 0x595   : > { %s406_s30 = scalar_select %p405_p11, %s2478_s21, 1 }
 0x596   : > { %1379 = vst [vmem:[%s1378_s13] sm:$0x1] %v1377_v39  ;;  %1421 = vmatmul.mubr.bf16.vlgmr.msra.gmra.mrb[20].mxu0 %v1387_v46  ;;  %1462 = vmatmul.mubr.bf16.vlgmr.msra.gmra.mrb[20].mxu1 %v1387_v46 }
 0x597   : > { %1544 = vmatpush1.bf16.msra.mxu0 %v3057_v48  ;;  %1585 = vmatpush1.bf16.msra.mxu1 %v3061_v53  ;;  %s2094_s8 = sshll.u32 %s406_s30, 1 }
 0x598   : > { %1545 = vmatprep.subr.bf16.mxu0 %v3065_v59  ;;  %1586 = vmatprep.subr.bf16.mxu1 %v3069_v62  ;;  %s412_s6 = scalar_lea.vmem %s3288_s5, %s2094_s8  ;;  %s408_s10 = scalar_lea.vmem %s3287_s4, %s2094_s8 }
 0x599   : > { %1575 = vmatprep.mubr.bf16.mxu0 %v2430_v40  ;;  %1616 = vmatprep.mubr.bf16.mxu1 %v2430_v40 }
 0x59b   : > { %1546 = vmatpush1.bf16.msra.mxu0 %v3075_v23  ;;  %1587 = vmatpush1.bf16.msra.mxu1 %v3079_v27 }
 0x59c   : > { %1547 = vmatprep.subr.bf16.mxu0 %v3083_v63  ;;  %1588 = vmatprep.subr.bf16.mxu1 %v3087_v5 }
 0x59f   : > { %1548 = vmatpush1.bf16.msra.mxu0 %v3091_v18  ;;  %1589 = vmatpush1.bf16.msra.mxu1 %v3095_v19 }
 0x5a0   : > { %1549 = vmatprep.subr.bf16.mxu0 %v3099_v20  ;;  %1590 = vmatprep.subr.bf16.mxu1 %v3103_v21 }
 0x5a3   : > { %1550 = vmatpush1.bf16.msra.mxu0 %v3107_v22  ;;  %1591 = vmatpush1.bf16.msra.mxu1 %v3111_v24 }
 0x5a4   : > { %1551 = vmatprep.subr.bf16.mxu0 %v3115_v26  ;;  %1592 = vmatprep.subr.bf16.mxu1 %v3119_v41 }
 0x5a7   : > { %1552 = vmatpush1.bf16.msra.mxu0 %v3123_v30  ;;  %1593 = vmatpush1.bf16.msra.mxu1 %v3127_v47 }
 0x5a8   : > { %1553 = vmatprep.subr.bf16.mxu0 %v3131_v49  ;;  %1594 = vmatprep.subr.bf16.mxu1 %v3135_v50 }
 0x5ab   : > { %1554 = vmatpush1.bf16.msra.mxu0 %v3139_v52  ;;  %1595 = vmatpush1.bf16.msra.mxu1 %v3143_v54 }
 0x5ac   : > { %1555 = vmatprep.subr.bf16.mxu0 %v3147_v55  ;;  %1596 = vmatprep.subr.bf16.mxu1 %v3151_v56 }
 0x5af   : > { %1556 = vmatpush1.bf16.msra.mxu0 %v3155_v57  ;;  %1597 = vmatpush1.bf16.msra.mxu1 %v3159_v58 }
 0x5b0   : > { %1557 = vmatprep.subr.bf16.mxu0 %v3163_v60  ;;  %1598 = vmatprep.subr.bf16.mxu1 %v3167_v61 }
 0x5b3   : > { %1558 = vmatpush1.bf16.msra.mxu0 %v3171_v0  ;;  %1599 = vmatpush1.bf16.msra.mxu1 %v3175_v1 }
 0x5b4   : > { %1698 = vmatprep.subr.bf16.mxu0 %v3034_v44  ;;  %1739 = vmatprep.subr.bf16.mxu1 %v3038_v45 }
 0x669   : > { %v1422_v2 = vpop.f32.mrb[20].mxu0  ;;  %v1463_v3 = vpop.f32.mrb[20].mxu1 }
 0x66a   : > { %v1424_v4 = vpop.f32.mrb[21].mxu0  ;;  %v1465_v7 = vpop.f32.mrb[21].mxu1 }
 0x66b   : > { %v1474_v8 = vcombine.low %v1422_v2, %v1424_v4  ;;  %v1475_v9 = vcombine.low %v1463_v3, %v1465_v7  ;;  %v1426_v10 = vpop.f32.mrb[22].mxu0  ;;  %v1467_v11 = vpop.f32.mrb[22].mxu1 }
 0x66c   : > { %v1427_v12 = vpop.f32.mrb[23].mxu0  ;;  %v1468_v13 = vpop.f32.mrb[23].mxu1 }
 0x66d   : > { %v1482_v14 = vrot.slane %v1474_v8, %v2801_v25  ;;  %v1489_v44 = vrot.slane %v1475_v9, %v2801_v25 }
 0x66f   : > { %v1490_v16 = vcombine.low %v1482_v14, %v1489_v44 }
 0x671   : > { %v1492_v45 = vadd.f32 %v1490_v16, %v1386_v15 }
 0x673   : > { %v2155_v17 = vmul.f32 -1.442695, %v1492_v45  ;;  %v1500_v38 = vrot.slane %v1492_v45, 2  ;;  %v1511_v42 = vrot.slane %v1492_v45, 6  ;;  %v1508_v28 = vrot.slane %v1492_v45, 4 }
 0x675   : > { %2326 = vpow2.f32 %v2155_v17  ;;  %v2156_v51 = vmul.f32 -1.442695, %v1500_v38  ;;  %v2157_v29 = vmul.f32 -1.442695, %v1511_v42 }
 0x677   : > { %2328 = vpow2.f32 %v2156_v51 }
 0x678   : > { %2330 = vpow2.f32 %v2157_v29 }
 0x67f   : > { %v2327_v43 = vpop.eup %2326 }
 0x680   : > { %v1496_v33 = vadd.f32 1.0, %v2327_v43 }
 0x681   : > { %v2329_v32 = vpop.eup %2328 }
 0x682   : > { %2332 = vrcp.f32 %v1496_v33  ;;  %v1505_v34 = vadd.f32 1.0, %v2329_v32  ;;  %v2331_v35 = vpop.eup %2330 }
 0x683   : > { %2334 = vtanh.f32 %v1508_v28  ;;  %v1516_v2 = vadd.f32 1.0, %v2331_v35  ;;  %v1695_v35 = vld [vmem:[%s1694_s20] sm:$0xf] }
 0x684   : > { %2336 = vrcp.f32 %v1505_v34 }
 0x685   : > { %2338 = vrcp.f32 %v1516_v2 }
 0x68c   : > { %v2333_v37 = vpop.eup %2332 }
 0x68d   : > { %v2335_v39 = vpop.eup %2334 }
 0x68e   : > { %v2337_v46 = vpop.eup %2336  ;;  %v1520_v3 = vmul.f32 %v2335_v39, %v2333_v37 }
 0x68f   : > { %v1519_v4 = vmul.f32 %v2337_v46, %v3047_v31  ;;  %v2339_v9 = vpop.eup %2338 }
 0x691   : > { %v1521_v7 = vadd.f32 %v1520_v3, %v1519_v4 }
 0x693   : > { %2340 = vtanh.f32 %v1521_v7  ;;  %v3186_v8 = vsel %vm1528_vm14, %v1521_v7, %v3047_v31 }
 0x69d   : > { %v2341_v10 = vpop.eup %2340 }
 0x69e   : > { %v1523_v11 = vmul.f32 %v2341_v10, %v2339_v9 }
 0x6a0   : > { %v3191_v12 = vsel %vm1528_vm14, %v1523_v11, %v3052_v36  ;;  %v1531_v13 = vsel %vm1528_vm14, %v1523_v11, 0.0 }
 0x6a1   : > { %v1532_v14 = vpack.c.bf16 %v1531_v13, %v1531_v13  ;;  %v1542_v15 = vpack.c.bf16 %v3191_v12, %v3191_v12 }
 0x6a3   : > { %1534 = vst [vmem:[%s1533_s26] sm:$0x1] %v1532_v14  ;;  %1576 = vmatmul.mubr.bf16.vlgmr.msra.gmra.mrb[24].mxu0 %v1542_v15  ;;  %1617 = vmatmul.mubr.bf16.vlgmr.msra.gmra.mrb[24].mxu1 %v1542_v15 }
 0x6a4   : > { %1699 = vmatpush1.bf16.msra.mxu0 %v3057_v48  ;;  %1740 = vmatpush1.bf16.msra.mxu1 %v3061_v53  ;;  %v1540_v48 = vld [vmem:[%s1539_s17] sm:$0xf] }
 0x6a5   : > { %1700 = vmatprep.subr.bf16.mxu0 %v3065_v59  ;;  %1741 = vmatprep.subr.bf16.mxu1 %v3069_v62 }
 0x6a6   : > { %1730 = vmatprep.mubr.bf16.mxu0 %v2430_v40  ;;  %1771 = vmatprep.mubr.bf16.mxu1 %v2430_v40 }
 0x6a8   : > { %1701 = vmatpush1.bf16.msra.mxu0 %v3075_v23  ;;  %1742 = vmatpush1.bf16.msra.mxu1 %v3079_v27 }
 0x6a9   : > { %1702 = vmatprep.subr.bf16.mxu0 %v3083_v63  ;;  %1743 = vmatprep.subr.bf16.mxu1 %v3087_v5 }
 0x6ac   : > { %1703 = vmatpush1.bf16.msra.mxu0 %v3091_v18  ;;  %1744 = vmatpush1.bf16.msra.mxu1 %v3095_v19  ;;  %v1541_v19 = vunpack.c.l.bf16 %v1540_v48 }
 0x6ad   : > { %1704 = vmatprep.subr.bf16.mxu0 %v3099_v20  ;;  %1745 = vmatprep.subr.bf16.mxu1 %v3103_v21 }
 0x6b0   : > { %1705 = vmatpush1.bf16.msra.mxu0 %v3107_v22  ;;  %1746 = vmatpush1.bf16.msra.mxu1 %v3111_v24 }
 0x6b1   : > { %1706 = vmatprep.subr.bf16.mxu0 %v3115_v26  ;;  %1747 = vmatprep.subr.bf16.mxu1 %v3119_v41 }
 0x6b4   : > { %1707 = vmatpush1.bf16.msra.mxu0 %v3123_v30  ;;  %1748 = vmatpush1.bf16.msra.mxu1 %v3127_v47 }
 0x6b5   : > { %1708 = vmatprep.subr.bf16.mxu0 %v3131_v49  ;;  %1749 = vmatprep.subr.bf16.mxu1 %v3135_v50 }
 0x6b8   : > { %1709 = vmatpush1.bf16.msra.mxu0 %v3139_v52  ;;  %1750 = vmatpush1.bf16.msra.mxu1 %v3143_v54 }
 0x6b9   : > { %1710 = vmatprep.subr.bf16.mxu0 %v3147_v55  ;;  %1751 = vmatprep.subr.bf16.mxu1 %v3151_v56 }
 0x6bc   : > { %1711 = vmatpush1.bf16.msra.mxu0 %v3155_v57  ;;  %1752 = vmatpush1.bf16.msra.mxu1 %v3159_v58 }
 0x6bd   : > { %1712 = vmatprep.subr.bf16.mxu0 %v3163_v60  ;;  %1753 = vmatprep.subr.bf16.mxu1 %v3167_v61 }
 0x6c0   : > { %1713 = vmatpush1.bf16.msra.mxu0 %v3171_v0  ;;  %1754 = vmatpush1.bf16.msra.mxu1 %v3175_v1  ;;  %v1682_v0 = vpop.permute.xlu0 %1681 }
 0x6c1   : > { %vm1683_vm15 = vcmp.eq.s32.totalorder %v1682_v0, 1 }
 0x776   : > { %v1577_v40 = vpop.f32.mrb[24].mxu0  ;;  %v1618_v31 = vpop.f32.mrb[24].mxu1 }
 0x777   : > { %v1579_v36 = vpop.f32.mrb[25].mxu0  ;;  %v1620_v53 = vpop.f32.mrb[25].mxu1 }
 0x778   : > { %v1629_v59 = vcombine.low %v1577_v40, %v1579_v36  ;;  %v1630_v62 = vcombine.low %v1618_v31, %v1620_v53  ;;  %v1581_v23 = vpop.f32.mrb[26].mxu0  ;;  %v1622_v27 = vpop.f32.mrb[26].mxu1 }
 0x779   : > { %v1582_v63 = vpop.f32.mrb[27].mxu0  ;;  %v1623_v5 = vpop.f32.mrb[27].mxu1 }
 0x77a   : > { %v1637_v18 = vrot.slane %v1629_v59, %v2801_v25  ;;  %v1644_v20 = vrot.slane %v1630_v62, %v2801_v25  ;;  %v1837_v5 = vpop.permute.xlu1 %1836 }
 0x77b   : > { %vm1838_vm0 = vcmp.eq.s32.totalorder %v1837_v5, 1 }
 0x77c   : > { %v1645_v21 = vcombine.low %v1637_v18, %v1644_v20 }
 0x77e   : > { %v1647_v22 = vadd.f32 %v1645_v21, %v1541_v19 }
 0x780   : > { %v2159_v24 = vmul.f32 -1.442695, %v1647_v22  ;;  %v1655_v26 = vrot.slane %v1647_v22, 2  ;;  %v1666_v30 = vrot.slane %v1647_v22, 6  ;;  %v1663_v50 = vrot.slane %v1647_v22, 4 }
 0x782   : > { %2342 = vpow2.f32 %v2159_v24  ;;  %v2160_v41 = vmul.f32 -1.442695, %v1655_v26  ;;  %v2161_v47 = vmul.f32 -1.442695, %v1666_v30 }
 0x784   : > { %2344 = vpow2.f32 %v2160_v41 }
 0x785   : > { %2346 = vpow2.f32 %v2161_v47 }
 0x78c   : > { %v2343_v49 = vpop.eup %2342 }
 0x78d   : > { %v1651_v52 = vadd.f32 1.0, %v2343_v49 }
 0x78e   : > { %v2345_v54 = vpop.eup %2344 }
 0x78f   : > { %2348 = vrcp.f32 %v1651_v52  ;;  %v1660_v55 = vadd.f32 1.0, %v2345_v54  ;;  %v2347_v56 = vpop.eup %2346 }
 0x790   : > { %2350 = vtanh.f32 %v1663_v50  ;;  %v1671_v61 = vadd.f32 1.0, %v2347_v56 }
 0x791   : > { %2352 = vrcp.f32 %v1660_v55 }
 0x792   : > { %2354 = vrcp.f32 %v1671_v61 }
 0x799   : > { %v2349_v57 = vpop.eup %2348 }
 0x79a   : > { %v2351_v58 = vpop.eup %2350 }
 0x79b   : > { %v2353_v60 = vpop.eup %2352  ;;  %v1675_v1 = vmul.f32 %v2351_v58, %v2349_v57 }
 0x79c   : > { %v1674_v44 = vmul.f32 %v2353_v60, %v3186_v8  ;;  %v2355_v17 = vpop.eup %2354 }
 0x79e   : > { %v1676_v16 = vadd.f32 %v1675_v1, %v1674_v44 }
 0x7a0   : > { %2356 = vtanh.f32 %v1676_v16  ;;  %v3233_v45 = vsel %vm1683_vm15, %v1676_v16, %v3186_v8  ;;  %v1696_v8 = vunpack.c.l.bf16 %v1695_v35 }
 0x7aa   : > { %v2357_v38 = vpop.eup %2356 }
 0x7ab   : > { %v1678_v51 = vmul.f32 %v2357_v38, %v2355_v17 }
 0x7ad   : > { %v3238_v42 = vsel %vm1683_vm15, %v1678_v51, %v3191_v12  ;;  %v1686_v29 = vsel %vm1683_vm15, %v1678_v51, 0.0 }
 0x7ae   : > { %v1687_v43 = vpack.c.bf16 %v1686_v29, %v1686_v29  ;;  %v1697_v28 = vpack.c.bf16 %v3238_v42, %v3238_v42 }
 0x7b0   : > { %1689 = vst [vmem:[%s1688_s23] sm:$0x1] %v1687_v43  ;;  %1731 = vmatmul.mubr.bf16.vlgmr.msra.gmra.mrb[28].mxu0 %v1697_v28  ;;  %1772 = vmatmul.mubr.bf16.vlgmr.msra.gmra.mrb[28].mxu1 %v1697_v28 }
 0x883   : > { %v1732_v33 = vpop.f32.mrb[28].mxu0  ;;  %v1773_v32 = vpop.f32.mrb[28].mxu1 }
 0x884   : > { %v1734_v34 = vpop.f32.mrb[29].mxu0  ;;  %v1775_v37 = vpop.f32.mrb[29].mxu1 }
 0x885   : > { %v1784_v39 = vcombine.low %v1732_v33, %v1734_v34  ;;  %v1785_v46 = vcombine.low %v1773_v32, %v1775_v37  ;;  %v1736_v2 = vpop.f32.mrb[30].mxu0  ;;  %v1777_v3 = vpop.f32.mrb[30].mxu1 }
 0x886   : > { %v1737_v4 = vpop.f32.mrb[31].mxu0  ;;  %v1778_v6 = vpop.f32.mrb[31].mxu1 }
 0x887   : > { %v1792_v7 = vrot.slane %v1784_v39, %v2801_v25  ;;  %v1799_v9 = vrot.slane %v1785_v46, %v2801_v25 }
 0x889   : > { %v1800_v10 = vcombine.low %v1792_v7, %v1799_v9 }
 0x88b   : > { %v1802_v11 = vadd.f32 %v1800_v10, %v1696_v8 }
 0x88d   : > { %v2163_v12 = vmul.f32 -1.442695, %v1802_v11  ;;  %v1810_v13 = vrot.slane %v1802_v11, 2  ;;  %v1821_v15 = vrot.slane %v1802_v11, 6  ;;  %v1818_v36 = vrot.slane %v1802_v11, 4 }
 0x88f   : > { %2358 = vpow2.f32 %v2163_v12  ;;  %v2164_v14 = vmul.f32 -1.442695, %v1810_v13  ;;  %v2165_v40 = vmul.f32 -1.442695, %v1821_v15 }
 0x891   : > { %2360 = vpow2.f32 %v2164_v14 }
 0x892   : > { %2362 = vpow2.f32 %v2165_v40 }
 0x899   : > { %v2359_v31 = vpop.eup %2358 }
 0x89a   : > { %v1806_v48 = vadd.f32 1.0, %v2359_v31 }
 0x89b   : > { %v2361_v53 = vpop.eup %2360 }
 0x89c   : > { %2364 = vrcp.f32 %v1806_v48  ;;  %v1815_v59 = vadd.f32 1.0, %v2361_v53  ;;  %v2363_v25 = vpop.eup %2362 }
 0x89d   : > { %2366 = vtanh.f32 %v1818_v36  ;;  %v1826_v63 = vadd.f32 1.0, %v2363_v25 }
 0x89e   : > { %2368 = vrcp.f32 %v1815_v59 }
 0x89f   : > { %2370 = vrcp.f32 %v1826_v63 }
 0x8a6   : > { %v2365_v62 = vpop.eup %2364 }
 0x8a7   : > { %v2367_v23 = vpop.eup %2366 }
 0x8a8   : > { %v2369_v27 = vpop.eup %2368  ;;  %v1830_v19 = vmul.f32 %v2367_v23, %v2365_v62 }
 0x8a9   : > { %v1829_v18 = vmul.f32 %v2369_v27, %v3233_v45  ;;  %v2371_v22 = vpop.eup %2370 }
 0x8ab   : > { %v1831_v20 = vadd.f32 %v1830_v19, %v1829_v18 }
 0x8ad   : > { %2372 = vtanh.f32 %v1831_v20  ;;  %v1840_v21 = vsel %vm1838_vm0, %v1831_v20, %v3233_v45 }
 0x8ae   : > { %1846 = vst [vmem:[%s412_s6] sm:$0x3] %v1840_v21 }
 0x8b7   : > { %v2373_v24 = vpop.eup %2372  ;;  %1861 = sbr.rel (!%p2497_p5) target bundleno = 2250 (0x8ca), region = 100 }
 0x8b8   : > { %v1833_v26 = vmul.f32 %v2373_v24, %v2371_v22 }
 0x8ba   : > { %v1839_v41 = vsel %vm1838_vm0, %v1833_v26, %v3238_v42  ;;  %v1841_v30 = vsel %vm1838_vm0, %v1833_v26, 0.0 }
 0x8bb   : > { %v1842_v47 = vpack.c.bf16 %v1841_v30, %v1841_v30  ;;  %1845 = vst [vmem:[%s408_s10] sm:$0x3] %v1839_v41 }
 0x8bd   : > { %1844 = vst [vmem:[%s1843_s12] sm:$0x1] %v1842_v47 }
 0x8c4   : > { %v1878_v49 = vld [vmem:[%s2819_s11] sm:$0x1]  ;;  %v1880_v50 = vld [vmem:[%s2819_s11 + $0x1] sm:$0x1]  ;;  %v1882_v52 = vld [vmem:[%s2819_s11 + $0x2] sm:$0x1] }
 0x8c5   : > { %1879 = vst [vmem:[%s1862_s16] sm:$0x1] %v1878_v49  ;;  %1881 = vst [vmem:[%s1862_s16 + $0x2] sm:$0x1] %v1880_v50  ;;  %v1884_v54 = vld [vmem:[%s2819_s11 + $0x3] sm:$0x1] }
 0x8c6   : > { %1883 = vst [vmem:[%s1862_s16 + $0x4] sm:$0x1] %v1882_v52  ;;  %v1886_v55 = vld [vmem:[%s2819_s11 + $0x4] sm:$0x1]  ;;  %v1888_v56 = vld [vmem:[%s2819_s11 + $0x5] sm:$0x1] }
 0x8c7   : > { %1885 = vst [vmem:[%s1862_s16 + $0x6] sm:$0x1] %v1884_v54  ;;  %1887 = vst [vmem:[%s1862_s16 + $0x8] sm:$0x1] %v1886_v55  ;;  %v1890_v57 = vld [vmem:[%s2819_s11 + $0x6] sm:$0x1] }
 0x8c8   : > { %1889 = vst [vmem:[%s1862_s16 + $0xa] sm:$0x1] %v1888_v56  ;;  %v1892_v58 = vld [vmem:[%s2819_s11 + $0x7] sm:$0x1]  ;;  %1891 = vst [vmem:[%s1862_s16 + $0xc] sm:$0x1] %v1890_v57 }
 0x8c9   : > { %1893 = vst [vmem:[%s1862_s16 + $0xe] sm:$0x1] %v1892_v58 }
 0x8ca PF: > { %p13_p12 = scmp.ge.s32.totalorder %s2481_s22, 4   ;;  %s3291_s18 = smov %s2424_s19 }
 0x8cb   : > { %s3292_s19 = smov %s2491_s25  ;;  %s3293_s20 = smov %s2481_s22 }
 0x8cc   :  { %15 = sbr.rel (!%p13_p12) target bundleno = 2 (0x2), region = 220 }

// kernel: lstm_tagger_focus_forward.4
= control target key start
LH: loop header
LB: loop body
LE: loop exit
PB: predicated region body
PF: predicated region fallthrough
CT: control target
= control target key end

     0   :  { %v1714_v1 = vmov 0   ;;  %v1715_v40 = vmov 1983009808   ;;  %v311_v42 = vlaneseq  ;;  %s2495_s2 = inlined_call_operand.vmem [shape: bf16[128,512], index: 2, kind: input, shape index: {}]   ;;  %s2496_s0 = inlined_call_operand.vmem [shape: s32[2,1], index: 0, kind: input, shape index: {}]   ;;  %s2497_s3 = inlined_call_operand.vmem [shape: f32[2,128], index: 3, kind: input, shape index: {}]   ;;  %s2498_s1 = inlined_call_operand.vmem [shape: bf16[8,2,512], index: 1, kind: input, shape index: {}]   ;;  %s2499_s4 = inlined_call_operand.vmem [shape: f32[2,128], index: 4, kind: input, shape index: {}]   ;;  %s2500_s5 = inlined_call_operand.vmem [shape: bf16[8,2,128], index: 5, kind: output, shape index: {}]  }
   0x1   :  { %v1749_v0 = vld [vmem:[%s2495_s2 + $0x4] ss:$16 sps:$4 sm:$0xff]   ;;  %252 = vmatprep.mubr.bf16.mxu0 %v1714_v1  ;;  %293 = vmatprep.mubr.bf16.mxu1 %v1714_v1  ;;  %v1756_v2 = vld [vmem:[%s2495_s2 + $0xc] ss:$16 sps:$4 sm:$0xff]   ;;  %v1764_v3 = vld [vmem:[%s2495_s2] ss:$16 sps:$4 sm:$0xff]   ;;  %v309_v41 = vunpack.c.l.s4 %v1715_v40 }
   0x2   :  { %1504 = vset.pattern.permute.xlu0 %v1714_v1  ;;  %1505 = vset.pattern.permute.xlu1 %v1714_v1  ;;  %v1769_v4 = vld [vmem:[%s2495_s2 + $0x8] ss:$16 sps:$4 sm:$0xff]   ;;  %v1775_v5 = vld [vmem:[%s2495_s2 + $0x24] ss:$16 sps:$4 sm:$0xff]   ;;  %v1782_v6 = vld [vmem:[%s2495_s2 + $0x2c] ss:$16 sps:$4 sm:$0xff]  }
   0x3   :  { %220 = vmatprep.subr.bf16.mxu0 %v1749_v0  ;;  %261 = vmatprep.subr.bf16.mxu1 %v1756_v2  ;;  %v1787_v7 = vld [vmem:[%s2495_s2 + $0x20] ss:$16 sps:$4 sm:$0xff]   ;;  %v1793_v8 = vld [vmem:[%s2495_s2 + $0x28] ss:$16 sps:$4 sm:$0xff]   ;;  %v1799_v9 = vld [vmem:[%s2495_s2 + $0x44] ss:$16 sps:$4 sm:$0xff]   ;;  %v310_v43 = vunpack.c.0.s8 %v309_v41 }
   0x4   :  { %221 = vmatpush1.bf16.msra.mxu0 %v1764_v3  ;;  %262 = vmatpush1.bf16.msra.mxu1 %v1769_v4  ;;  %v1804_v10 = vld [vmem:[%s2495_s2 + $0x4c] ss:$16 sps:$4 sm:$0xff]   ;;  %v1809_v11 = vld [vmem:[%s2495_s2 + $0x40] ss:$16 sps:$4 sm:$0xff]   ;;  %v1814_v12 = vld [vmem:[%s2495_s2 + $0x48] ss:$16 sps:$4 sm:$0xff]  }
   0x5   :  { %222 = vmatprep.subr.bf16.mxu0 %v1775_v5  ;;  %263 = vmatprep.subr.bf16.mxu1 %v1782_v6  ;;  %v1821_v13 = vld [vmem:[%s2495_s2 + $0x64] ss:$16 sps:$4 sm:$0xff]   ;;  %v1828_v14 = vld [vmem:[%s2495_s2 + $0x6c] ss:$16 sps:$4 sm:$0xff]   ;;  %v1833_v15 = vld [vmem:[%s2495_s2 + $0x60] ss:$16 sps:$4 sm:$0xff]  }
   0x6   :  { %v1840_v16 = vld [vmem:[%s2495_s2 + $0x68] ss:$16 sps:$4 sm:$0xff]   ;;  %v1845_v17 = vld [vmem:[%s2495_s2 + $0x84] ss:$16 sps:$4 sm:$0xff]   ;;  %v1852_v18 = vld [vmem:[%s2495_s2 + $0x8c] ss:$16 sps:$4 sm:$0xff]  }
   0x7   :  { %v1857_v19 = vld [vmem:[%s2495_s2 + $0x80] ss:$16 sps:$4 sm:$0xff]   ;;  %v1862_v20 = vld [vmem:[%s2495_s2 + $0x88] ss:$16 sps:$4 sm:$0xff]   ;;  %v1869_v21 = vld [vmem:[%s2495_s2 + $0xa4] ss:$16 sps:$4 sm:$0xff]  }
   0x8   :  { %223 = vmatpush1.bf16.msra.mxu0 %v1787_v7  ;;  %264 = vmatpush1.bf16.msra.mxu1 %v1793_v8  ;;  %v1876_v22 = vld [vmem:[%s2495_s2 + $0xac] ss:$16 sps:$4 sm:$0xff]   ;;  %v1883_v23 = vld [vmem:[%s2495_s2 + $0xa0] ss:$16 sps:$4 sm:$0xff]   ;;  %v1888_v24 = vld [vmem:[%s2495_s2 + $0xa8] ss:$16 sps:$4 sm:$0xff]  }
   0x9   :  { %224 = vmatprep.subr.bf16.mxu0 %v1799_v9  ;;  %265 = vmatprep.subr.bf16.mxu1 %v1804_v10  ;;  %v1895_v25 = vld [vmem:[%s2495_s2 + $0xc4] ss:$16 sps:$4 sm:$0xff]   ;;  %v1900_v26 = vld [vmem:[%s2495_s2 + $0xcc] ss:$16 sps:$4 sm:$0xff]   ;;  %v1905_v27 = vld [vmem:[%s2496_s0] sm:$0x3] }
   0xa   :  { %vm56_vm0 = vcmp.gt.s32.totalorder %v1905_v27, 0  ;;  %v1914_v29 = vld [vmem:[%s2495_s2 + $0xc0] ss:$16 sps:$4 sm:$0xff]   ;;  %v1919_v30 = vld [vmem:[%s2495_s2 + $0xc8] ss:$16 sps:$4 sm:$0xff]   ;;  %vm366_vm1 = vcmp.gt.s32.totalorder %v1905_v27, 1 }
   0xb   :  { %v356_v28 = vsel %vm56_vm0, 1, %v1714_v1  ;;  %v1927_v31 = vld [vmem:[%s2495_s2 + $0xe4] ss:$16 sps:$4 sm:$0xff]   ;;  %v1932_v32 = vld [vmem:[%s2495_s2 + $0xec] ss:$16 sps:$4 sm:$0xff]   ;;  %v507_v34 = vsel %vm366_vm1, 1, %v1714_v1 }
   0xc   :  { %225 = vmatpush1.bf16.msra.mxu0 %v1809_v11  ;;  %266 = vmatpush1.bf16.msra.mxu1 %v1814_v12  ;;  %v1937_v33 = vld [vmem:[%s2495_s2 + $0xe0] ss:$16 sps:$4 sm:$0xff]   ;;  %v1945_v35 = vld [vmem:[%s2495_s2 + $0xe8] ss:$16 sps:$4 sm:$0xff]   ;;  %vm822_vm2 = vcmp.gt.s32.totalorder %v1905_v27, 4  ;;  %vm1126_vm3 = vcmp.gt.s32.totalorder %v1905_v27, 6 }
   0xd   :  { %226 = vmatprep.subr.bf16.mxu0 %v1821_v13  ;;  %267 = vmatprep.subr.bf16.mxu1 %v1828_v14  ;;  %v1950_v36 = vld [vmem:[%s2497_s3] sm:$0x3]  ;;  %v963_v38 = vsel %vm822_vm2, 1, %v1714_v1  ;;  %v1267_v39 = vsel %vm1126_vm3, 1, %v1714_v1  ;;  %v312_v44 = vshrl.u32 %v311_v42, 7  ;;  %vm518_vm5 = vcmp.gt.s32.totalorder %v1905_v27, 2 }
   0xe   :  { %358 = vperm.xlu0 %1504, %v356_v28   ;;  %v59_v37 = vpack.c.bf16 %v1950_v36, %v1950_v36  ;;  %v57_v49 = vld [vmem:[%s2498_s1] sm:$0xf]  ;;  %vm670_vm6 = vcmp.gt.s32.totalorder %v1905_v27, 3  ;;  %vm974_vm7 = vcmp.gt.s32.totalorder %v1905_v27, 5  ;;  %vm1278_vm8 = vcmp.gt.s32.totalorder %v1905_v27, 7 }
   0xf   :  { %v1998_v47 = vsub.s32 %v310_v43, %v312_v44  ;;  %v58_v58 = vunpack.c.l.bf16 %v57_v49 }
  0x10   :  { %227 = vmatpush1.bf16.msra.mxu0 %v1833_v15  ;;  %268 = vmatpush1.bf16.msra.mxu1 %v1840_v16 }
  0x11   :  { %228 = vmatprep.subr.bf16.mxu0 %v1845_v17  ;;  %269 = vmatprep.subr.bf16.mxu1 %v1852_v18 }
  0x12   :  { %509 = vperm.xlu0 %1504, %v507_v34  }
  0x14   :  { %229 = vmatpush1.bf16.msra.mxu0 %v1857_v19  ;;  %270 = vmatpush1.bf16.msra.mxu1 %v1862_v20 }
  0x15   :  { %230 = vmatprep.subr.bf16.mxu0 %v1869_v21  ;;  %271 = vmatprep.subr.bf16.mxu1 %v1876_v22 }
  0x16   :  { %965 = vperm.xlu0 %1504, %v963_v38  }
  0x18   :  { %231 = vmatpush1.bf16.msra.mxu0 %v1883_v23  ;;  %272 = vmatpush1.bf16.msra.mxu1 %v1888_v24 }
  0x19   :  { %232 = vmatprep.subr.bf16.mxu0 %v1895_v25  ;;  %273 = vmatprep.subr.bf16.mxu1 %v1900_v26 }
  0x1a   :  { %1269 = vperm.xlu0 %1504, %v1267_v39  }
  0x1c   :  { %233 = vmatpush1.bf16.msra.mxu0 %v1914_v29  ;;  %274 = vmatpush1.bf16.msra.mxu1 %v1919_v30 }
  0x1d   :  { %234 = vmatprep.subr.bf16.mxu0 %v1927_v31  ;;  %275 = vmatprep.subr.bf16.mxu1 %v1932_v32 }
  0x20   :  { %235 = vmatpush1.bf16.msra.mxu0 %v1937_v33  ;;  %276 = vmatpush1.bf16.msra.mxu1 %v1945_v35 }
  0x21   :  { %371 = vmatprep.subr.bf16.mxu0 %v1749_v0  ;;  %412 = vmatprep.subr.bf16.mxu1 %v1756_v2 }
  0x23   :  { %253 = vmatmul.mubr.bf16.vlgmr.msra.gmra.mrb[0].mxu0 %v59_v37  ;;  %294 = vmatmul.mubr.bf16.vlgmr.msra.gmra.mrb[0].mxu1 %v59_v37 }
  0x24   :  { %372 = vmatpush1.bf16.msra.mxu0 %v1764_v3  ;;  %413 = vmatpush1.bf16.msra.mxu1 %v1769_v4 }
  0x25   :  { %373 = vmatprep.subr.bf16.mxu0 %v1775_v5  ;;  %414 = vmatprep.subr.bf16.mxu1 %v1782_v6 }
  0x26   :  { %403 = vmatprep.mubr.bf16.mxu0 %v1714_v1  ;;  %444 = vmatprep.mubr.bf16.mxu1 %v1714_v1 }
  0x28   :  { %374 = vmatpush1.bf16.msra.mxu0 %v1787_v7  ;;  %415 = vmatpush1.bf16.msra.mxu1 %v1793_v8 }
  0x29   :  { %375 = vmatprep.subr.bf16.mxu0 %v1799_v9  ;;  %416 = vmatprep.subr.bf16.mxu1 %v1804_v10 }
  0x2c   :  { %376 = vmatpush1.bf16.msra.mxu0 %v1809_v11  ;;  %417 = vmatpush1.bf16.msra.mxu1 %v1814_v12 }
  0x2d   :  { %377 = vmatprep.subr.bf16.mxu0 %v1821_v13  ;;  %418 = vmatprep.subr.bf16.mxu1 %v1828_v14 }
  0x30   :  { %378 = vmatpush1.bf16.msra.mxu0 %v1833_v15  ;;  %419 = vmatpush1.bf16.msra.mxu1 %v1840_v16 }
  0x31   :  { %379 = vmatprep.subr.bf16.mxu0 %v1845_v17  ;;  %420 = vmatprep.subr.bf16.mxu1 %v1852_v18 }
  0x34   :  { %380 = vmatpush1.bf16.msra.mxu0 %v1857_v19  ;;  %421 = vmatpush1.bf16.msra.mxu1 %v1862_v20 }
  0x35   :  { %381 = vmatprep.subr.bf16.mxu0 %v1869_v21  ;;  %422 = vmatprep.subr.bf16.mxu1 %v1876_v22 }
  0x38   :  { %382 = vmatpush1.bf16.msra.mxu0 %v1883_v23  ;;  %423 = vmatpush1.bf16.msra.mxu1 %v1888_v24 }
  0x39   :  { %383 = vmatprep.subr.bf16.mxu0 %v1895_v25  ;;  %424 = vmatprep.subr.bf16.mxu1 %v1900_v26 }
  0x3c   :  { %384 = vmatpush1.bf16.msra.mxu0 %v1914_v29  ;;  %425 = vmatpush1.bf16.msra.mxu1 %v1919_v30 }
  0x3d   :  { %385 = vmatprep.subr.bf16.mxu0 %v1927_v31  ;;  %426 = vmatprep.subr.bf16.mxu1 %v1932_v32 }
  0x40   :  { %386 = vmatpush1.bf16.msra.mxu0 %v1937_v33  ;;  %427 = vmatpush1.bf16.msra.mxu1 %v1945_v35 }
  0x41   :  { %523 = vmatprep.subr.bf16.mxu0 %v1749_v0  ;;  %564 = vmatprep.subr.bf16.mxu1 %v1756_v2 }
  0xf6   :  { %v254_v45 = vpop.f32.mrb[0].mxu0  ;;  %v295_v46 = vpop.f32.mrb[0].mxu1 }
  0xf7   :  { %v256_v48 = vpop.f32.mrb[1].mxu0  ;;  %v297_v50 = vpop.f32.mrb[1].mxu1 }
  0xf8   :  { %v306_v51 = vcombine.low %v254_v45, %v256_v48  ;;  %v307_v52 = vcombine.low %v295_v46, %v297_v50  ;;  %v258_v53 = vpop.f32.mrb[2].mxu0  ;;  %v299_v54 = vpop.f32.mrb[2].mxu1  ;;  %v55_v45 = vld [vmem:[%s2499_s4] sm:$0x3] }
  0xf9   :  { %v259_v55 = vpop.f32.mrb[3].mxu0  ;;  %v300_v56 = vpop.f32.mrb[3].mxu1 }
  0xfa   :  { %v314_v57 = vrot.slane %v306_v51, %v1998_v47  ;;  %v321_v59 = vrot.slane %v307_v52, %v1998_v47  ;;  %v359_v48 = vpop.permute.xlu0 %358 }
  0xfb   :  { %vm360_vm4 = vcmp.eq.s32.totalorder %v359_v48, 1 }
  0xfc   :  { %v322_v60 = vcombine.low %v314_v57, %v321_v59 }
  0xfe   :  { %v324_v61 = vadd.f32 %v322_v60, %v58_v58 }
 0x100   :  { %v1464_v62 = vmul.f32 -1.442695, %v324_v61  ;;  %v332_v63 = vrot.slane %v324_v61, 2  ;;  %v343_v34 = vrot.slane %v324_v61, 6  ;;  %v340_v39 = vrot.slane %v324_v61, 4 }
 0x102   :  { %1554 = vpow2.f32 %v1464_v62  ;;  %v1465_v28 = vmul.f32 -1.442695, %v332_v63  ;;  %v1466_v37 = vmul.f32 -1.442695, %v343_v34  ;;  %v811_v62 = vsel %vm670_vm6, 1, %v1714_v1 }
 0x103   :  { %v1115_v63 = vsel %vm974_vm7, 1, %v1714_v1 }
 0x104   :  { %1556 = vpow2.f32 %v1465_v28  ;;  %v1419_v28 = vsel %vm1278_vm8, 1, %v1714_v1 }
 0x105   :  { %1558 = vpow2.f32 %v1466_v37 }
 0x10c   :  { %v1555_v38 = vpop.eup %1554 }
 0x10d   :  { %v328_v40 = vadd.f32 1.0, %v1555_v38 }
 0x10e   :  { %v1557_v41 = vpop.eup %1556 }
 0x10f   :  { %1560 = vrcp.f32 %v328_v40  ;;  %v337_v42 = vadd.f32 1.0, %v1557_v41  ;;  %v1559_v43 = vpop.eup %1558 }
 0x110   :  { %1562 = vtanh.f32 %v340_v39  ;;  %v348_v50 = vadd.f32 1.0, %v1559_v43  ;;  %v2063_v39 = vld [vmem:[%s2498_s1 + $0x4] sm:$0xff]  }
 0x111   :  { %1564 = vrcp.f32 %v337_v42  ;;  %v369_v48 = vunpack.c.l.bf16 %v2063_v39 }
 0x112   :  { %1566 = vrcp.f32 %v348_v50 }
 0x119   :  { %v1561_v44 = vpop.eup %1560 }
 0x11a   :  { %v1563_v46 = vpop.eup %1562 }
 0x11b   :  { %v1565_v49 = vpop.eup %1564  ;;  %v352_v52 = vmul.f32 %v1563_v46, %v1561_v44 }
 0x11c   :  { %v351_v51 = vmul.f32 %v1565_v49, %v55_v45  ;;  %v1567_v55 = vpop.eup %1566 }
 0x11e   :  { %v353_v53 = vadd.f32 %v352_v52, %v351_v51 }
 0x120   :  { %1568 = vtanh.f32 %v353_v53  ;;  %v2008_v54 = vsel %vm360_vm4, %v353_v53, %v55_v45 }
 0x12a   :  { %v1569_v56 = vpop.eup %1568 }
 0x12b   :  { %v355_v57 = vmul.f32 %v1569_v56, %v1567_v55 }
 0x12d   :  { %v2011_v58 = vsel %vm360_vm4, %v355_v57, %v1950_v36  ;;  %v363_v59 = vsel %vm360_vm4, %v355_v57, 0.0  ;;  %v659_v36 = vsel %vm518_vm5, 1, %v1714_v1 }
 0x12e   :  { %v364_v60 = vpack.c.bf16 %v363_v59, %v363_v59  ;;  %v370_v61 = vpack.c.bf16 %v2011_v58, %v2011_v58  ;;  %661 = vperm.xlu1 %1505, %v659_v36  }
 0x130   :  { %365 = vst [vmem:[%s2500_s5] sm:$0x1] %v364_v60  ;;  %404 = vmatmul.mubr.bf16.vlgmr.msra.gmra.mrb[4].mxu0 %v370_v61  ;;  %445 = vmatmul.mubr.bf16.vlgmr.msra.gmra.mrb[4].mxu1 %v370_v61 }
 0x131   :  { %524 = vmatpush1.bf16.msra.mxu0 %v1764_v3  ;;  %565 = vmatpush1.bf16.msra.mxu1 %v1769_v4 }
 0x132   :  { %525 = vmatprep.subr.bf16.mxu0 %v1775_v5  ;;  %566 = vmatprep.subr.bf16.mxu1 %v1782_v6 }
 0x133   :  { %555 = vmatprep.mubr.bf16.mxu0 %v1714_v1  ;;  %596 = vmatprep.mubr.bf16.mxu1 %v1714_v1 }
 0x134   :  { %813 = vperm.xlu1 %1505, %v811_v62  }
 0x135   :  { %526 = vmatpush1.bf16.msra.mxu0 %v1787_v7  ;;  %567 = vmatpush1.bf16.msra.mxu1 %v1793_v8 }
 0x136   :  { %527 = vmatprep.subr.bf16.mxu0 %v1799_v9  ;;  %568 = vmatprep.subr.bf16.mxu1 %v1804_v10 }
 0x138   :  { %1117 = vperm.xlu1 %1505, %v1115_v63  }
 0x139   :  { %528 = vmatpush1.bf16.msra.mxu0 %v1809_v11  ;;  %569 = vmatpush1.bf16.msra.mxu1 %v1814_v12 }
 0x13a   :  { %529 = vmatprep.subr.bf16.mxu0 %v1821_v13  ;;  %570 = vmatprep.subr.bf16.mxu1 %v1828_v14 }
 0x13c   :  { %1421 = vperm.xlu1 %1505, %v1419_v28  }
 0x13d   :  { %530 = vmatpush1.bf16.msra.mxu0 %v1833_v15  ;;  %571 = vmatpush1.bf16.msra.mxu1 %v1840_v16 }
 0x13e   :  { %531 = vmatprep.subr.bf16.mxu0 %v1845_v17  ;;  %572 = vmatprep.subr.bf16.mxu1 %v1852_v18 }
 0x141   :  { %532 = vmatpush1.bf16.msra.mxu0 %v1857_v19  ;;  %573 = vmatpush1.bf16.msra.mxu1 %v1862_v20 }
 0x142   :  { %533 = vmatprep.subr.bf16.mxu0 %v1869_v21  ;;  %574 = vmatprep.subr.bf16.mxu1 %v1876_v22 }
 0x145   :  { %534 = vmatpush1.bf16.msra.mxu0 %v1883_v23  ;;  %575 = vmatpush1.bf16.msra.mxu1 %v1888_v24 }
 0x146   :  { %535 = vmatprep.subr.bf16.mxu0 %v1895_v25  ;;  %576 = vmatprep.subr.bf16.mxu1 %v1900_v26 }
 0x149   :  { %536 = vmatpush1.bf16.msra.mxu0 %v1914_v29  ;;  %577 = vmatpush1.bf16.msra.mxu1 %v1919_v30 }
 0x14a   :  { %537 = vmatprep.subr.bf16.mxu0 %v1927_v31  ;;  %578 = vmatprep.subr.bf16.mxu1 %v1932_v32 }
 0x14d   :  { %538 = vmatpush1.bf16.msra.mxu0 %v1937_v33  ;;  %579 = vmatpush1.bf16.msra.mxu1 %v1945_v35 }
 0x14e   :  { %675 = vmatprep.subr.bf16.mxu0 %v1749_v0  ;;  %716 = vmatprep.subr.bf16.mxu1 %v1756_v2 }
 0x203   :  { %v405_v34 = vpop.f32.mrb[4].mxu0  ;;  %v446_v37 = vpop.f32.mrb[4].mxu1 }
 0x204   :  { %v407_v38 = vpop.f32.mrb[5].mxu0  ;;  %v448_v40 = vpop.f32.mrb[5].mxu1 }
 0x205   :  { %v457_v41 = vcombine.low %v405_v34, %v407_v38  ;;  %v458_v42 = vcombine.low %v446_v37, %v448_v40  ;;  %v409_v43 = vpop.f32.mrb[6].mxu0  ;;  %v450_v44 = vpop.f32.mrb[6].mxu1 }
 0x206   :  { %v410_v45 = vpop.f32.mrb[7].mxu0  ;;  %v451_v46 = vpop.f32.mrb[7].mxu1 }
 0x207   :  { %v465_v27 = vrot.slane %v457_v41, %v1998_v47  ;;  %v472_v49 = vrot.slane %v458_v42, %v1998_v47  ;;  %v510_v42 = vpop.permute.xlu0 %509 }
 0x208   :  { %vm511_vm9 = vcmp.eq.s32.totalorder %v510_v42, 1 }
 0x209   :  { %v473_v50 = vcombine.low %v465_v27, %v472_v49 }
 0x20b   :  { %v475_v51 = vadd.f32 %v473_v50, %v369_v48 }
 0x20d   :  { %v1468_v52 = vmul.f32 -1.442695, %v475_v51  ;;  %v483_v53 = vrot.slane %v475_v51, 2  ;;  %v494_v56 = vrot.slane %v475_v51, 6  ;;  %v491_v60 = vrot.slane %v475_v51, 4 }
 0x20f   :  { %1570 = vpow2.f32 %v1468_v52  ;;  %v1469_v55 = vmul.f32 -1.442695, %v483_v53  ;;  %v1470_v57 = vmul.f32 -1.442695, %v494_v56 }
 0x211   :  { %1572 = vpow2.f32 %v1469_v55 }
 0x212   :  { %1574 = vpow2.f32 %v1470_v57 }
 0x219   :  { %v1571_v59 = vpop.eup %1570 }
 0x21a   :  { %v479_v61 = vadd.f32 1.0, %v1571_v59 }
 0x21b   :  { %v1573_v36 = vpop.eup %1572 }
 0x21c   :  { %1576 = vrcp.f32 %v479_v61  ;;  %v488_v62 = vadd.f32 1.0, %v1573_v36  ;;  %v1575_v63 = vpop.eup %1574 }
 0x21d   :  { %1578 = vtanh.f32 %v491_v60  ;;  %v499_v38 = vadd.f32 1.0, %v1575_v63 }
 0x21e   :  { %1580 = vrcp.f32 %v488_v62  ;;  %v521_v62 = vunpack.c.h.bf16 %v2063_v39 }
 0x21f   :  { %1582 = vrcp.f32 %v499_v38 }
 0x226   :  { %v1577_v28 = vpop.eup %1576 }
 0x227   :  { %v1579_v34 = vpop.eup %1578 }
 0x228   :  { %v1581_v37 = vpop.eup %1580  ;;  %v503_v40 = vmul.f32 %v1579_v34, %v1577_v28 }
 0x229   :  { %v502_v41 = vmul.f32 %v1581_v37, %v2008_v54  ;;  %v1583_v45 = vpop.eup %1582 }
 0x22b   :  { %v504_v43 = vadd.f32 %v503_v40, %v502_v41 }
 0x22d   :  { %1584 = vtanh.f32 %v504_v43  ;;  %v2070_v44 = vsel %vm511_vm9, %v504_v43, %v2008_v54 }
 0x237   :  { %v1585_v46 = vpop.eup %1584 }
 0x238   :  { %v506_v27 = vmul.f32 %v1585_v46, %v1583_v45 }
 0x23a   :  { %v2073_v48 = vsel %vm511_vm9, %v506_v27, %v2011_v58  ;;  %v514_v49 = vsel %vm511_vm9, %v506_v27, 0.0 }
 0x23b   :  { %v515_v50 = vpack.c.bf16 %v514_v49, %v514_v49  ;;  %v522_v51 = vpack.c.bf16 %v2073_v48, %v2073_v48 }
 0x23d   :  { %1471 = vst [vmem:[%s2500_s5 + $0x1] sm:$0x1] %v515_v50  ;;  %556 = vmatmul.mubr.bf16.vlgmr.msra.gmra.mrb[8].mxu0 %v522_v51  ;;  %597 = vmatmul.mubr.bf16.vlgmr.msra.gmra.mrb[8].mxu1 %v522_v51 }
 0x23e   :  { %676 = vmatpush1.bf16.msra.mxu0 %v1764_v3  ;;  %717 = vmatpush1.bf16.msra.mxu1 %v1769_v4 }
 0x23f   :  { %677 = vmatprep.subr.bf16.mxu0 %v1775_v5  ;;  %718 = vmatprep.subr.bf16.mxu1 %v1782_v6 }
 0x240   :  { %707 = vmatprep.mubr.bf16.mxu0 %v1714_v1  ;;  %748 = vmatprep.mubr.bf16.mxu1 %v1714_v1 }
 0x242   :  { %678 = vmatpush1.bf16.msra.mxu0 %v1787_v7  ;;  %719 = vmatpush1.bf16.msra.mxu1 %v1793_v8 }
 0x243   :  { %679 = vmatprep.subr.bf16.mxu0 %v1799_v9  ;;  %720 = vmatprep.subr.bf16.mxu1 %v1804_v10 }
 0x246   :  { %680 = vmatpush1.bf16.msra.mxu0 %v1809_v11  ;;  %721 = vmatpush1.bf16.msra.mxu1 %v1814_v12 }
 0x247   :  { %681 = vmatprep.subr.bf16.mxu0 %v1821_v13  ;;  %722 = vmatprep.subr.bf16.mxu1 %v1828_v14 }
 0x24a   :  { %682 = vmatpush1.bf16.msra.mxu0 %v1833_v15  ;;  %723 = vmatpush1.bf16.msra.mxu1 %v1840_v16 }
 0x24b   :  { %683 = vmatprep.subr.bf16.mxu0 %v1845_v17  ;;  %724 = vmatprep.subr.bf16.mxu1 %v1852_v18 }
 0x24e   :  { %684 = vmatpush1.bf16.msra.mxu0 %v1857_v19  ;;  %725 = vmatpush1.bf16.msra.mxu1 %v1862_v20 }
 0x24f   :  { %685 = vmatprep.subr.bf16.mxu0 %v1869_v21  ;;  %726 = vmatprep.subr.bf16.mxu1 %v1876_v22 }
 0x252   :  { %686 = vmatpush1.bf16.msra.mxu0 %v1883_v23  ;;  %727 = vmatpush1.bf16.msra.mxu1 %v1888_v24 }
 0x253   :  { %687 = vmatprep.subr.bf16.mxu0 %v1895_v25  ;;  %728 = vmatprep.subr.bf16.mxu1 %v1900_v26 }
 0x256   :  { %688 = vmatpush1.bf16.msra.mxu0 %v1914_v29  ;;  %729 = vmatpush1.bf16.msra.mxu1 %v1919_v30 }
 0x257   :  { %689 = vmatprep.subr.bf16.mxu0 %v1927_v31  ;;  %730 = vmatprep.subr.bf16.mxu1 %v1932_v32 }
 0x25a   :  { %690 = vmatpush1.bf16.msra.mxu0 %v1937_v33  ;;  %731 = vmatpush1.bf16.msra.mxu1 %v1945_v35 }
 0x25b   :  { %827 = vmatprep.subr.bf16.mxu0 %v1749_v0  ;;  %868 = vmatprep.subr.bf16.mxu1 %v1756_v2 }
 0x310   :  { %v557_v54 = vpop.f32.mrb[8].mxu0  ;;  %v598_v58 = vpop.f32.mrb[8].mxu1 }
 0x311   :  { %v559_v52 = vpop.f32.mrb[9].mxu0  ;;  %v600_v53 = vpop.f32.mrb[9].mxu1 }
 0x312   :  { %v609_v55 = vcombine.low %v557_v54, %v559_v52  ;;  %v610_v56 = vcombine.low %v598_v58, %v600_v53  ;;  %v561_v57 = vpop.f32.mrb[10].mxu0  ;;  %v602_v59 = vpop.f32.mrb[10].mxu1 }
 0x313   :  { %v562_v60 = vpop.f32.mrb[11].mxu0  ;;  %v603_v61 = vpop.f32.mrb[11].mxu1 }
 0x314   :  { %v617_v36 = vrot.slane %v609_v55, %v1998_v47  ;;  %v624_v63 = vrot.slane %v610_v56, %v1998_v47  ;;  %v662_v54 = vpop.permute.xlu1 %661 }
 0x315   :  { %vm663_vm10 = vcmp.eq.s32.totalorder %v662_v54, 1 }
 0x316   :  { %v625_v28 = vcombine.low %v617_v36, %v624_v63 }
 0x318   :  { %v627_v34 = vadd.f32 %v625_v28, %v521_v62 }
 0x31a   :  { %v1473_v37 = vmul.f32 -1.442695, %v627_v34  ;;  %v635_v38 = vrot.slane %v627_v34, 2  ;;  %v646_v41 = vrot.slane %v627_v34, 6  ;;  %v643_v45 = vrot.slane %v627_v34, 4 }
 0x31c   :  { %1586 = vpow2.f32 %v1473_v37  ;;  %v1474_v40 = vmul.f32 -1.442695, %v635_v38  ;;  %v1475_v42 = vmul.f32 -1.442695, %v646_v41  ;;  %v2166_v37 = vld [vmem:[%s2498_s1 + $0xc] sm:$0xff]  }
 0x31e   :  { %1588 = vpow2.f32 %v1474_v40 }
 0x31f   :  { %1590 = vpow2.f32 %v1475_v42 }
 0x326   :  { %v1587_v43 = vpop.eup %1586 }
 0x327   :  { %v631_v46 = vadd.f32 1.0, %v1587_v43 }
 0x328   :  { %v1589_v27 = vpop.eup %1588 }
 0x329   :  { %1592 = vrcp.f32 %v631_v46  ;;  %v640_v49 = vadd.f32 1.0, %v1589_v27  ;;  %v1591_v39 = vpop.eup %1590 }
 0x32a   :  { %1594 = vtanh.f32 %v643_v45  ;;  %v651_v52 = vadd.f32 1.0, %v1591_v39 }
 0x32b   :  { %1596 = vrcp.f32 %v640_v49 }
 0x32c   :  { %1598 = vrcp.f32 %v651_v52 }
 0x333   :  { %v1593_v50 = vpop.eup %1592 }
 0x334   :  { %v1595_v51 = vpop.eup %1594 }
 0x335   :  { %v1597_v58 = vpop.eup %1596  ;;  %v655_v55 = vmul.f32 %v1595_v51, %v1593_v50 }
 0x336   :  { %v654_v53 = vmul.f32 %v1597_v58, %v2070_v44  ;;  %v1599_v59 = vpop.eup %1598 }
 0x338   :  { %v656_v56 = vadd.f32 %v655_v55, %v654_v53 }
 0x33a   :  { %1600 = vtanh.f32 %v656_v56  ;;  %v2119_v57 = vsel %vm663_vm10, %v656_v56, %v2070_v44 }
 0x344   :  { %v1601_v60 = vpop.eup %1600 }
 0x345   :  { %v658_v61 = vmul.f32 %v1601_v60, %v1599_v59 }
 0x347   :  { %v2122_v36 = vsel %vm663_vm10, %v658_v61, %v2073_v48  ;;  %v666_v62 = vsel %vm663_vm10, %v658_v61, 0.0 }
 0x348   :  { %v667_v63 = vpack.c.bf16 %v666_v62, %v666_v62  ;;  %v674_v28 = vpack.c.bf16 %v2122_v36, %v2122_v36 }
 0x34a   :  { %1476 = vst [vmem:[%s2500_s5 + $0x2] sm:$0x1] %v667_v63  ;;  %708 = vmatmul.mubr.bf16.vlgmr.msra.gmra.mrb[12].mxu0 %v674_v28  ;;  %749 = vmatmul.mubr.bf16.vlgmr.msra.gmra.mrb[12].mxu1 %v674_v28 }
 0x34b   :  { %828 = vmatpush1.bf16.msra.mxu0 %v1764_v3  ;;  %869 = vmatpush1.bf16.msra.mxu1 %v1769_v4 }
 0x34c   :  { %829 = vmatprep.subr.bf16.mxu0 %v1775_v5  ;;  %870 = vmatprep.subr.bf16.mxu1 %v1782_v6 }
 0x34d   :  { %859 = vmatprep.mubr.bf16.mxu0 %v1714_v1  ;;  %900 = vmatprep.mubr.bf16.mxu1 %v1714_v1 }
 0x34f   :  { %830 = vmatpush1.bf16.msra.mxu0 %v1787_v7  ;;  %871 = vmatpush1.bf16.msra.mxu1 %v1793_v8 }
 0x350   :  { %831 = vmatprep.subr.bf16.mxu0 %v1799_v9  ;;  %872 = vmatprep.subr.bf16.mxu1 %v1804_v10 }
 0x353   :  { %832 = vmatpush1.bf16.msra.mxu0 %v1809_v11  ;;  %873 = vmatpush1.bf16.msra.mxu1 %v1814_v12 }
 0x354   :  { %833 = vmatprep.subr.bf16.mxu0 %v1821_v13  ;;  %874 = vmatprep.subr.bf16.mxu1 %v1828_v14 }
 0x357   :  { %834 = vmatpush1.bf16.msra.mxu0 %v1833_v15  ;;  %875 = vmatpush1.bf16.msra.mxu1 %v1840_v16 }
 0x358   :  { %835 = vmatprep.subr.bf16.mxu0 %v1845_v17  ;;  %876 = vmatprep.subr.bf16.mxu1 %v1852_v18 }
 0x35b   :  { %836 = vmatpush1.bf16.msra.mxu0 %v1857_v19  ;;  %877 = vmatpush1.bf16.msra.mxu1 %v1862_v20 }
 0x35c   :  { %837 = vmatprep.subr.bf16.mxu0 %v1869_v21  ;;  %878 = vmatprep.subr.bf16.mxu1 %v1876_v22 }
 0x35f   :  { %838 = vmatpush1.bf16.msra.mxu0 %v1883_v23  ;;  %879 = vmatpush1.bf16.msra.mxu1 %v1888_v24 }
 0x360   :  { %839 = vmatprep.subr.bf16.mxu0 %v1895_v25  ;;  %880 = vmatprep.subr.bf16.mxu1 %v1900_v26 }
 0x363   :  { %840 = vmatpush1.bf16.msra.mxu0 %v1914_v29  ;;  %881 = vmatpush1.bf16.msra.mxu1 %v1919_v30 }
 0x364   :  { %841 = vmatprep.subr.bf16.mxu0 %v1927_v31  ;;  %882 = vmatprep.subr.bf16.mxu1 %v1932_v32 }
 0x367   :  { %842 = vmatpush1.bf16.msra.mxu0 %v1937_v33  ;;  %883 = vmatpush1.bf16.msra.mxu1 %v1945_v35 }
 0x368   :  { %979 = vmatprep.subr.bf16.mxu0 %v1749_v0  ;;  %1020 = vmatprep.subr.bf16.mxu1 %v1756_v2  ;;  %v673_v0 = vunpack.c.l.bf16 %v2166_v37 }
 0x41d   :  { %v709_v44 = vpop.f32.mrb[12].mxu0  ;;  %v750_v48 = vpop.f32.mrb[12].mxu1 }
 0x41e   :  { %v711_v34 = vpop.f32.mrb[13].mxu0  ;;  %v752_v38 = vpop.f32.mrb[13].mxu1 }
 0x41f   :  { %v761_v40 = vcombine.low %v709_v44, %v711_v34  ;;  %v762_v41 = vcombine.low %v750_v48, %v752_v38  ;;  %v713_v42 = vpop.f32.mrb[14].mxu0  ;;  %v754_v43 = vpop.f32.mrb[14].mxu1 }
 0x420   :  { %v714_v45 = vpop.f32.mrb[15].mxu0  ;;  %v755_v46 = vpop.f32.mrb[15].mxu1 }
 0x421   :  { %v769_v27 = vrot.slane %v761_v40, %v1998_v47  ;;  %v776_v2 = vrot.slane %v762_v41, %v1998_v47  ;;  %v814_v38 = vpop.permute.xlu1 %813 }
 0x422   :  { %vm815_vm11 = vcmp.eq.s32.totalorder %v814_v38, 1  ;;  %v2295_v38 = vld [vmem:[%s2495_s2 + $0x40] ss:$16 sps:$4 sm:$0xff]  }
 0x423   :  { %v777_v49 = vcombine.low %v769_v27, %v776_v2 }
 0x425   :  { %v779_v39 = vadd.f32 %v777_v49, %v673_v0 }
 0x427   :  { %v1478_v50 = vmul.f32 -1.442695, %v779_v39  ;;  %v787_v51 = vrot.slane %v779_v39, 2  ;;  %v798_v58 = vrot.slane %v779_v39, 6  ;;  %v795_v55 = vrot.slane %v779_v39, 4  ;;  %v966_v39 = vpop.permute.xlu0 %965 }
 0x428   :  { %vm967_vm12 = vcmp.eq.s32.totalorder %v966_v39, 1 }
 0x429   :  { %1602 = vpow2.f32 %v1478_v50  ;;  %v1479_v54 = vmul.f32 -1.442695, %v787_v51  ;;  %v1480_v52 = vmul.f32 -1.442695, %v798_v58 }
 0x42b   :  { %1604 = vpow2.f32 %v1479_v54 }
 0x42c   :  { %1606 = vpow2.f32 %v1480_v52 }
 0x433   :  { %v1603_v53 = vpop.eup %1602 }
 0x434   :  { %v783_v56 = vadd.f32 1.0, %v1603_v53 }
 0x435   :  { %v1605_v59 = vpop.eup %1604 }
 0x436   :  { %1608 = vrcp.f32 %v783_v56  ;;  %v792_v60 = vadd.f32 1.0, %v1605_v59  ;;  %v1607_v61 = vpop.eup %1606 }
 0x437   :  { %1610 = vtanh.f32 %v795_v55  ;;  %v803_v44 = vadd.f32 1.0, %v1607_v61  ;;  %v2251_v61 = vld [vmem:[%s2495_s2 + $0x8] ss:$16 sps:$4 sm:$0xff]  }
 0x438   :  { %1612 = vrcp.f32 %v792_v60  ;;  %v2245_v60 = vld [vmem:[%s2495_s2] ss:$16 sps:$4 sm:$0xff]  }
 0x439   :  { %1614 = vrcp.f32 %v803_v44  ;;  %v2277_v44 = vld [vmem:[%s2495_s2 + $0x28] ss:$16 sps:$4 sm:$0xff]  }
 0x440   :  { %v1609_v62 = vpop.eup %1608 }
 0x441   :  { %v1611_v63 = vpop.eup %1610 }
 0x442   :  { %v1613_v28 = vpop.eup %1612  ;;  %v807_v48 = vmul.f32 %v1611_v63, %v1609_v62  ;;  %v2257_v62 = vld [vmem:[%s2495_s2 + $0x24] ss:$16 sps:$4 sm:$0xff]   ;;  %v2263_v63 = vld [vmem:[%s2495_s2 + $0x2c] ss:$16 sps:$4 sm:$0xff]  }
 0x443   :  { %v806_v34 = vmul.f32 %v1613_v28, %v2119_v57  ;;  %v1615_v42 = vpop.eup %1614  ;;  %v2271_v28 = vld [vmem:[%s2495_s2 + $0x20] ss:$16 sps:$4 sm:$0xff]  }
 0x445   :  { %v808_v40 = vadd.f32 %v807_v48, %v806_v34  ;;  %v2283_v48 = vld [vmem:[%s2495_s2 + $0x44] ss:$16 sps:$4 sm:$0xff]   ;;  %v2289_v34 = vld [vmem:[%s2495_s2 + $0x4c] ss:$16 sps:$4 sm:$0xff]  }
 0x447   :  { %1616 = vtanh.f32 %v808_v40  ;;  %v2173_v41 = vsel %vm815_vm11, %v808_v40, %v2119_v57  ;;  %v2301_v40 = vld [vmem:[%s2495_s2 + $0x48] ss:$16 sps:$4 sm:$0xff]  }
 0x451   :  { %v1617_v43 = vpop.eup %1616 }
 0x452   :  { %v810_v45 = vmul.f32 %v1617_v43, %v1615_v42  ;;  %v2313_v42 = vld [vmem:[%s2495_s2 + $0x6c] ss:$16 sps:$4 sm:$0xff]   ;;  %v2319_v43 = vld [vmem:[%s2495_s2 + $0x60] ss:$16 sps:$4 sm:$0xff]  }
 0x454   :  { %v2176_v46 = vsel %vm815_vm11, %v810_v45, %v2122_v36  ;;  %v818_v27 = vsel %vm815_vm11, %v810_v45, 0.0  ;;  %v2325_v45 = vld [vmem:[%s2495_s2 + $0x68] ss:$16 sps:$4 sm:$0xff]  }
 0x455   :  { %v819_v0 = vpack.c.bf16 %v818_v27, %v818_v27  ;;  %v826_v2 = vpack.c.bf16 %v2176_v46, %v2176_v46  ;;  %v2337_v27 = vld [vmem:[%s2495_s2 + $0x8c] ss:$16 sps:$4 sm:$0xff]  }
 0x457   :  { %1481 = vst [vmem:[%s2500_s5 + $0x3] sm:$0x1] %v819_v0  ;;  %860 = vmatmul.mubr.bf16.vlgmr.msra.gmra.mrb[16].mxu0 %v826_v2  ;;  %901 = vmatmul.mubr.bf16.vlgmr.msra.gmra.mrb[16].mxu1 %v826_v2  ;;  %v2343_v0 = vld [vmem:[%s2495_s2 + $0x80] ss:$16 sps:$4 sm:$0xff]   ;;  %v2349_v2 = vld [vmem:[%s2495_s2 + $0x88] ss:$16 sps:$4 sm:$0xff]  }
 0x458   :  { %980 = vmatpush1.bf16.msra.mxu0 %v1764_v3  ;;  %1021 = vmatpush1.bf16.msra.mxu1 %v1769_v4  ;;  %v2218_v3 = vld [vmem:[%s2495_s2 + $0x4] ss:$16 sps:$4 sm:$0xff]   ;;  %v2224_v4 = vld [vmem:[%s2495_s2 + $0xc] ss:$16 sps:$4 sm:$0xff]  }
 0x459   :  { %981 = vmatprep.subr.bf16.mxu0 %v1775_v5  ;;  %1022 = vmatprep.subr.bf16.mxu1 %v1782_v6 }
 0x45a   :  { %1011 = vmatprep.mubr.bf16.mxu0 %v1714_v1  ;;  %1052 = vmatprep.mubr.bf16.mxu1 %v1714_v1 }
 0x45c   :  { %982 = vmatpush1.bf16.msra.mxu0 %v1787_v7  ;;  %1023 = vmatpush1.bf16.msra.mxu1 %v1793_v8 }
 0x45d   :  { %983 = vmatprep.subr.bf16.mxu0 %v1799_v9  ;;  %1024 = vmatprep.subr.bf16.mxu1 %v1804_v10 }
 0x460   :  { %984 = vmatpush1.bf16.msra.mxu0 %v1809_v11  ;;  %1025 = vmatpush1.bf16.msra.mxu1 %v1814_v12 }
 0x461   :  { %985 = vmatprep.subr.bf16.mxu0 %v1821_v13  ;;  %1026 = vmatprep.subr.bf16.mxu1 %v1828_v14 }
 0x464   :  { %986 = vmatpush1.bf16.msra.mxu0 %v1833_v15  ;;  %1027 = vmatpush1.bf16.msra.mxu1 %v1840_v16  ;;  %v825_v16 = vunpack.c.h.bf16 %v2166_v37 }
 0x465   :  { %987 = vmatprep.subr.bf16.mxu0 %v1845_v17  ;;  %1028 = vmatprep.subr.bf16.mxu1 %v1852_v18 }
 0x468   :  { %988 = vmatpush1.bf16.msra.mxu0 %v1857_v19  ;;  %1029 = vmatpush1.bf16.msra.mxu1 %v1862_v20 }
 0x469   :  { %989 = vmatprep.subr.bf16.mxu0 %v1869_v21  ;;  %1030 = vmatprep.subr.bf16.mxu1 %v1876_v22 }
 0x46c   :  { %990 = vmatpush1.bf16.msra.mxu0 %v1883_v23  ;;  %1031 = vmatpush1.bf16.msra.mxu1 %v1888_v24 }
 0x46d   :  { %991 = vmatprep.subr.bf16.mxu0 %v1895_v25  ;;  %1032 = vmatprep.subr.bf16.mxu1 %v1900_v26 }
 0x470   :  { %992 = vmatpush1.bf16.msra.mxu0 %v1914_v29  ;;  %1033 = vmatpush1.bf16.msra.mxu1 %v1919_v30 }
 0x471   :  { %993 = vmatprep.subr.bf16.mxu0 %v1927_v31  ;;  %1034 = vmatprep.subr.bf16.mxu1 %v1932_v32 }
 0x474   :  { %994 = vmatpush1.bf16.msra.mxu0 %v1937_v33  ;;  %1035 = vmatpush1.bf16.msra.mxu1 %v1945_v35 }
 0x475   :  { %1131 = vmatprep.subr.bf16.mxu0 %v2218_v3  ;;  %1172 = vmatprep.subr.bf16.mxu1 %v2224_v4 }
 0x52a   :  { %v861_v5 = vpop.f32.mrb[16].mxu0  ;;  %v902_v6 = vpop.f32.mrb[16].mxu1 }
 0x52b   :  { %v863_v7 = vpop.f32.mrb[17].mxu0  ;;  %v904_v8 = vpop.f32.mrb[17].mxu1 }
 0x52c   :  { %v913_v9 = vcombine.low %v861_v5, %v863_v7  ;;  %v914_v10 = vcombine.low %v902_v6, %v904_v8  ;;  %v865_v11 = vpop.f32.mrb[18].mxu0  ;;  %v906_v12 = vpop.f32.mrb[18].mxu1  ;;  %v2355_v5 = vld [vmem:[%s2495_s2 + $0xa4] ss:$16 sps:$4 sm:$0xff]   ;;  %v2361_v6 = vld [vmem:[%s2495_s2 + $0xac] ss:$16 sps:$4 sm:$0xff]  }
 0x52d   :  { %v866_v13 = vpop.f32.mrb[19].mxu0  ;;  %v907_v14 = vpop.f32.mrb[19].mxu1  ;;  %v2367_v7 = vld [vmem:[%s2495_s2 + $0xa0] ss:$16 sps:$4 sm:$0xff]   ;;  %v2373_v8 = vld [vmem:[%s2495_s2 + $0xa8] ss:$16 sps:$4 sm:$0xff]  }
 0x52e   :  { %v921_v15 = vrot.slane %v913_v9, %v1998_v47  ;;  %v928_v17 = vrot.slane %v914_v10, %v1998_v47  ;;  %v2379_v9 = vld [vmem:[%s2495_s2 + $0xc4] ss:$16 sps:$4 sm:$0xff]   ;;  %v2385_v10 = vld [vmem:[%s2495_s2 + $0xcc] ss:$16 sps:$4 sm:$0xff]   ;;  %v2391_v11 = vld [vmem:[%s2495_s2 + $0xc0] ss:$16 sps:$4 sm:$0xff]  }
 0x52f   :  { %v2397_v12 = vld [vmem:[%s2495_s2 + $0xc8] ss:$16 sps:$4 sm:$0xff]   ;;  %v2403_v13 = vld [vmem:[%s2495_s2 + $0xe4] ss:$16 sps:$4 sm:$0xff]   ;;  %v2409_v14 = vld [vmem:[%s2495_s2 + $0xec] ss:$16 sps:$4 sm:$0xff]  }
 0x530   :  { %v929_v18 = vcombine.low %v921_v15, %v928_v17  ;;  %v2415_v15 = vld [vmem:[%s2495_s2 + $0xe0] ss:$16 sps:$4 sm:$0xff]  }
 0x532   :  { %v931_v19 = vadd.f32 %v929_v18, %v825_v16  ;;  %v2421_v16 = vld [vmem:[%s2495_s2 + $0xe8] ss:$16 sps:$4 sm:$0xff]  }
 0x534   :  { %v1483_v20 = vmul.f32 -1.442695, %v931_v19  ;;  %v939_v21 = vrot.slane %v931_v19, 2  ;;  %v950_v23 = vrot.slane %v931_v19, 6  ;;  %v947_v26 = vrot.slane %v931_v19, 4 }
 0x536   :  { %1618 = vpow2.f32 %v1483_v20  ;;  %v1484_v22 = vmul.f32 -1.442695, %v939_v21  ;;  %v1485_v24 = vmul.f32 -1.442695, %v950_v23  ;;  %v2429_v20 = vld [vmem:[%s2498_s1 + $0x14] sm:$0xff]  }
 0x538   :  { %1620 = vpow2.f32 %v1484_v22 }
 0x539   :  { %1622 = vpow2.f32 %v1485_v24 }
 0x540   :  { %v1619_v25 = vpop.eup %1618 }
 0x541   :  { %v935_v29 = vadd.f32 1.0, %v1619_v25 }
 0x542   :  { %v1621_v30 = vpop.eup %1620 }
 0x543   :  { %1624 = vrcp.f32 %v935_v29  ;;  %v944_v31 = vadd.f32 1.0, %v1621_v30  ;;  %v1623_v32 = vpop.eup %1622 }
 0x544   :  { %1626 = vtanh.f32 %v947_v26  ;;  %v955_v36 = vadd.f32 1.0, %v1623_v32 }
 0x545   :  { %1628 = vrcp.f32 %v944_v31 }
 0x546   :  { %1630 = vrcp.f32 %v955_v36 }
 0x54d   :  { %v1625_v33 = vpop.eup %1624 }
 0x54e   :  { %v1627_v35 = vpop.eup %1626 }
 0x54f   :  { %v1629_v57 = vpop.eup %1628  ;;  %v959_v37 = vmul.f32 %v1627_v35, %v1625_v33 }
 0x550   :  { %v958_v49 = vmul.f32 %v1629_v57, %v2173_v41  ;;  %v1631_v54 = vpop.eup %1630 }
 0x552   :  { %v960_v50 = vadd.f32 %v959_v37, %v958_v49 }
 0x554   :  { %1632 = vtanh.f32 %v960_v50  ;;  %v2232_v51 = vsel %vm967_vm12, %v960_v50, %v2173_v41  ;;  %v2307_v41 = vld [vmem:[%s2495_s2 + $0x64] ss:$16 sps:$4 sm:$0xff]  }
 0x55e   :  { %v1633_v58 = vpop.eup %1632 }
 0x55f   :  { %v962_v52 = vmul.f32 %v1633_v58, %v1631_v54 }
 0x561   :  { %v2235_v53 = vsel %vm967_vm12, %v962_v52, %v2176_v46  ;;  %v970_v55 = vsel %vm967_vm12, %v962_v52, 0.0  ;;  %v2331_v46 = vld [vmem:[%s2495_s2 + $0x84] ss:$16 sps:$4 sm:$0xff]  }
 0x562   :  { %v971_v56 = vpack.c.bf16 %v970_v55, %v970_v55  ;;  %v978_v59 = vpack.c.bf16 %v2235_v53, %v2235_v53 }
 0x564   :  { %1486 = vst [vmem:[%s2500_s5 + $0x4] sm:$0x1] %v971_v56  ;;  %1012 = vmatmul.mubr.bf16.vlgmr.msra.gmra.mrb[20].mxu0 %v978_v59  ;;  %1053 = vmatmul.mubr.bf16.vlgmr.msra.gmra.mrb[20].mxu1 %v978_v59 }
 0x565   :  { %1132 = vmatpush1.bf16.msra.mxu0 %v2245_v60  ;;  %1173 = vmatpush1.bf16.msra.mxu1 %v2251_v61 }
 0x566   :  { %1133 = vmatprep.subr.bf16.mxu0 %v2257_v62  ;;  %1174 = vmatprep.subr.bf16.mxu1 %v2263_v63 }
 0x567   :  { %1163 = vmatprep.mubr.bf16.mxu0 %v1714_v1  ;;  %1204 = vmatprep.mubr.bf16.mxu1 %v1714_v1 }
 0x569   :  { %1134 = vmatpush1.bf16.msra.mxu0 %v2271_v28  ;;  %1175 = vmatpush1.bf16.msra.mxu1 %v2277_v44 }
 0x56a   :  { %1135 = vmatprep.subr.bf16.mxu0 %v2283_v48  ;;  %1176 = vmatprep.subr.bf16.mxu1 %v2289_v34 }
 0x56d   :  { %1136 = vmatpush1.bf16.msra.mxu0 %v2295_v38  ;;  %1177 = vmatpush1.bf16.msra.mxu1 %v2301_v40 }
 0x56e   :  { %1137 = vmatprep.subr.bf16.mxu0 %v2307_v41  ;;  %1178 = vmatprep.subr.bf16.mxu1 %v2313_v42 }
 0x571   :  { %1138 = vmatpush1.bf16.msra.mxu0 %v2319_v43  ;;  %1179 = vmatpush1.bf16.msra.mxu1 %v2325_v45 }
 0x572   :  { %1139 = vmatprep.subr.bf16.mxu0 %v2331_v46  ;;  %1180 = vmatprep.subr.bf16.mxu1 %v2337_v27 }
 0x575   :  { %1140 = vmatpush1.bf16.msra.mxu0 %v2343_v0  ;;  %1181 = vmatpush1.bf16.msra.mxu1 %v2349_v2 }
 0x576   :  { %1141 = vmatprep.subr.bf16.mxu0 %v2355_v5  ;;  %1182 = vmatprep.subr.bf16.mxu1 %v2361_v6 }
 0x579   :  { %1142 = vmatpush1.bf16.msra.mxu0 %v2367_v7  ;;  %1183 = vmatpush1.bf16.msra.mxu1 %v2373_v8 }
 0x57a   :  { %1143 = vmatprep.subr.bf16.mxu0 %v2379_v9  ;;  %1184 = vmatprep.subr.bf16.mxu1 %v2385_v10 }
 0x57d   :  { %1144 = vmatpush1.bf16.msra.mxu0 %v2391_v11  ;;  %1185 = vmatpush1.bf16.msra.mxu1 %v2397_v12 }
 0x57e   :  { %1145 = vmatprep.subr.bf16.mxu0 %v2403_v13  ;;  %1186 = vmatprep.subr.bf16.mxu1 %v2409_v14 }
 0x581   :  { %1146 = vmatpush1.bf16.msra.mxu0 %v2415_v15  ;;  %1187 = vmatpush1.bf16.msra.mxu1 %v2421_v16 }
 0x582   :  { %1283 = vmatprep.subr.bf16.mxu0 %v2218_v3  ;;  %1324 = vmatprep.subr.bf16.mxu1 %v2224_v4  ;;  %v977_v3 = vunpack.c.l.bf16 %v2429_v20 }
 0x637   :  { %v1013_v17 = vpop.f32.mrb[20].mxu0  ;;  %v1054_v18 = vpop.f32.mrb[20].mxu1 }
 0x638   :  { %v1015_v19 = vpop.f32.mrb[21].mxu0  ;;  %v1056_v21 = vpop.f32.mrb[21].mxu1 }
 0x639   :  { %v1065_v22 = vcombine.low %v1013_v17, %v1015_v19  ;;  %v1066_v23 = vcombine.low %v1054_v18, %v1056_v21  ;;  %v1017_v24 = vpop.f32.mrb[22].mxu0  ;;  %v1058_v25 = vpop.f32.mrb[22].mxu1 }
 0x63a   :  { %v1018_v26 = vpop.f32.mrb[23].mxu0  ;;  %v1059_v29 = vpop.f32.mrb[23].mxu1 }
 0x63b   :  { %v1073_v30 = vrot.slane %v1065_v22, %v1998_v47  ;;  %v1080_v4 = vrot.slane %v1066_v23, %v1998_v47  ;;  %v1118_v21 = vpop.permute.xlu1 %1117 }
 0x63c   :  { %vm1119_vm13 = vcmp.eq.s32.totalorder %v1118_v21, 1 }
 0x63d   :  { %v1081_v31 = vcombine.low %v1073_v30, %v1080_v4 }
 0x63f   :  { %v1083_v32 = vadd.f32 %v1081_v31, %v977_v3 }
 0x641   :  { %v1488_v33 = vmul.f32 -1.442695, %v1083_v32  ;;  %v1091_v35 = vrot.slane %v1083_v32, 2  ;;  %v1102_v36 = vrot.slane %v1083_v32, 6  ;;  %v1099_v39 = vrot.slane %v1083_v32, 4 }
 0x643   :  { %1634 = vpow2.f32 %v1488_v33  ;;  %v1489_v57 = vmul.f32 -1.442695, %v1091_v35  ;;  %v1490_v37 = vmul.f32 -1.442695, %v1102_v36 }
 0x645   :  { %1636 = vpow2.f32 %v1489_v57 }
 0x646   :  { %1638 = vpow2.f32 %v1490_v37 }
 0x64d   :  { %v1635_v49 = vpop.eup %1634 }
 0x64e   :  { %v1087_v50 = vadd.f32 1.0, %v1635_v49 }
 0x64f   :  { %v1637_v54 = vpop.eup %1636 }
 0x650   :  { %1640 = vrcp.f32 %v1087_v50  ;;  %v1096_v58 = vadd.f32 1.0, %v1637_v54  ;;  %v1639_v52 = vpop.eup %1638 }
 0x651   :  { %1642 = vtanh.f32 %v1099_v39  ;;  %v1107_v17 = vadd.f32 1.0, %v1639_v52 }
 0x652   :  { %1644 = vrcp.f32 %v1096_v58  ;;  %v1497_v58 = vld [vmem:[%s2498_s1 + $0x1c] sm:$0xf] }
 0x653   :  { %1646 = vrcp.f32 %v1107_v17 }
 0x65a   :  { %v1641_v55 = vpop.eup %1640 }
 0x65b   :  { %v1643_v56 = vpop.eup %1642 }
 0x65c   :  { %v1645_v59 = vpop.eup %1644  ;;  %v1111_v18 = vmul.f32 %v1643_v56, %v1641_v55 }
 0x65d   :  { %v1110_v19 = vmul.f32 %v1645_v59, %v2232_v51  ;;  %v1647_v24 = vpop.eup %1646 }
 0x65f   :  { %v1112_v22 = vadd.f32 %v1111_v18, %v1110_v19 }
 0x661   :  { %1648 = vtanh.f32 %v1112_v22  ;;  %v2436_v23 = vsel %vm1119_vm13, %v1112_v22, %v2232_v51  ;;  %v1281_v22 = vunpack.c.l.bf16 %v1497_v58 }
 0x66b   :  { %v1649_v25 = vpop.eup %1648 }
 0x66c   :  { %v1114_v26 = vmul.f32 %v1649_v25, %v1647_v24 }
 0x66e   :  { %v2439_v29 = vsel %vm1119_vm13, %v1114_v26, %v2235_v53  ;;  %v1122_v30 = vsel %vm1119_vm13, %v1114_v26, 0.0 }
 0x66f   :  { %v1123_v3 = vpack.c.bf16 %v1122_v30, %v1122_v30  ;;  %v1130_v4 = vpack.c.bf16 %v2439_v29, %v2439_v29 }
 0x671   :  { %1491 = vst [vmem:[%s2500_s5 + $0x5] sm:$0x1] %v1123_v3  ;;  %1164 = vmatmul.mubr.bf16.vlgmr.msra.gmra.mrb[24].mxu0 %v1130_v4  ;;  %1205 = vmatmul.mubr.bf16.vlgmr.msra.gmra.mrb[24].mxu1 %v1130_v4 }
 0x672   :  { %1284 = vmatpush1.bf16.msra.mxu0 %v2245_v60  ;;  %1325 = vmatpush1.bf16.msra.mxu1 %v2251_v61 }
 0x673   :  { %1285 = vmatprep.subr.bf16.mxu0 %v2257_v62  ;;  %1326 = vmatprep.subr.bf16.mxu1 %v2263_v63 }
 0x674   :  { %1315 = vmatprep.mubr.bf16.mxu0 %v1714_v1  ;;  %1356 = vmatprep.mubr.bf16.mxu1 %v1714_v1 }
 0x676   :  { %1286 = vmatpush1.bf16.msra.mxu0 %v2271_v28  ;;  %1327 = vmatpush1.bf16.msra.mxu1 %v2277_v44 }
 0x677   :  { %1287 = vmatprep.subr.bf16.mxu0 %v2283_v48  ;;  %1328 = vmatprep.subr.bf16.mxu1 %v2289_v34 }
 0x67a   :  { %1288 = vmatpush1.bf16.msra.mxu0 %v2295_v38  ;;  %1329 = vmatpush1.bf16.msra.mxu1 %v2301_v40  ;;  %v1129_v38 = vunpack.c.h.bf16 %v2429_v20 }
 0x67b   :  { %1289 = vmatprep.subr.bf16.mxu0 %v2307_v41  ;;  %1330 = vmatprep.subr.bf16.mxu1 %v2313_v42 }
 0x67e   :  { %1290 = vmatpush1.bf16.msra.mxu0 %v2319_v43  ;;  %1331 = vmatpush1.bf16.msra.mxu1 %v2325_v45 }
 0x67f   :  { %1291 = vmatprep.subr.bf16.mxu0 %v2331_v46  ;;  %1332 = vmatprep.subr.bf16.mxu1 %v2337_v27 }
 0x682   :  { %1292 = vmatpush1.bf16.msra.mxu0 %v2343_v0  ;;  %1333 = vmatpush1.bf16.msra.mxu1 %v2349_v2 }
 0x683   :  { %1293 = vmatprep.subr.bf16.mxu0 %v2355_v5  ;;  %1334 = vmatprep.subr.bf16.mxu1 %v2361_v6 }
 0x686   :  { %1294 = vmatpush1.bf16.msra.mxu0 %v2367_v7  ;;  %1335 = vmatpush1.bf16.msra.mxu1 %v2373_v8 }
 0x687   :  { %1295 = vmatprep.subr.bf16.mxu0 %v2379_v9  ;;  %1336 = vmatprep.subr.bf16.mxu1 %v2385_v10 }
 0x68a   :  { %1296 = vmatpush1.bf16.msra.mxu0 %v2391_v11  ;;  %1337 = vmatpush1.bf16.msra.mxu1 %v2397_v12 }
 0x68b   :  { %1297 = vmatprep.subr.bf16.mxu0 %v2403_v13  ;;  %1338 = vmatprep.subr.bf16.mxu1 %v2409_v14  ;;  %v1270_v14 = vpop.permute.xlu0 %1269 }
 0x68c   :  { %vm1271_vm14 = vcmp.eq.s32.totalorder %v1270_v14, 1 }
 0x68e   :  { %1298 = vmatpush1.bf16.msra.mxu0 %v2415_v15  ;;  %1339 = vmatpush1.bf16.msra.mxu1 %v2421_v16 }
 0x744   :  { %v1165_v1 = vpop.f32.mrb[24].mxu0  ;;  %v1206_v51 = vpop.f32.mrb[24].mxu1 }
 0x745   :  { %v1167_v53 = vpop.f32.mrb[25].mxu0  ;;  %v1208_v60 = vpop.f32.mrb[25].mxu1 }
 0x746   :  { %v1217_v61 = vcombine.low %v1165_v1, %v1167_v53  ;;  %v1218_v62 = vcombine.low %v1206_v51, %v1208_v60  ;;  %v1169_v63 = vpop.f32.mrb[26].mxu0  ;;  %v1210_v28 = vpop.f32.mrb[26].mxu1 }
 0x747   :  { %v1170_v44 = vpop.f32.mrb[27].mxu0  ;;  %v1211_v48 = vpop.f32.mrb[27].mxu1 }
 0x748   :  { %v1225_v34 = vrot.slane %v1217_v61, %v1998_v47  ;;  %v1232_v40 = vrot.slane %v1218_v62, %v1998_v47 }
 0x74a   :  { %v1233_v41 = vcombine.low %v1225_v34, %v1232_v40 }
 0x74c   :  { %v1235_v42 = vadd.f32 %v1233_v41, %v1129_v38  ;;  %v1422_v41 = vpop.permute.xlu1 %1421 }
 0x74d   :  { %vm1423_vm15 = vcmp.eq.s32.totalorder %v1422_v41, 1 }
 0x74e   :  { %v1493_v43 = vmul.f32 -1.442695, %v1235_v42  ;;  %v1243_v45 = vrot.slane %v1235_v42, 2  ;;  %v1254_v27 = vrot.slane %v1235_v42, 6  ;;  %v1251_v5 = vrot.slane %v1235_v42, 4 }
 0x750   :  { %1650 = vpow2.f32 %v1493_v43  ;;  %v1494_v46 = vmul.f32 -1.442695, %v1243_v45  ;;  %v1495_v0 = vmul.f32 -1.442695, %v1254_v27 }
 0x752   :  { %1652 = vpow2.f32 %v1494_v46 }
 0x753   :  { %1654 = vpow2.f32 %v1495_v0 }
 0x75a   :  { %v1651_v2 = vpop.eup %1650 }
 0x75b   :  { %v1239_v6 = vadd.f32 1.0, %v1651_v2 }
 0x75c   :  { %v1653_v7 = vpop.eup %1652 }
 0x75d   :  { %1656 = vrcp.f32 %v1239_v6  ;;  %v1248_v8 = vadd.f32 1.0, %v1653_v7  ;;  %v1655_v9 = vpop.eup %1654 }
 0x75e   :  { %1658 = vtanh.f32 %v1251_v5  ;;  %v1259_v13 = vadd.f32 1.0, %v1655_v9 }
 0x75f   :  { %1660 = vrcp.f32 %v1248_v8 }
 0x760   :  { %1662 = vrcp.f32 %v1259_v13 }
 0x767   :  { %v1657_v10 = vpop.eup %1656 }
 0x768   :  { %v1659_v11 = vpop.eup %1658 }
 0x769   :  { %v1661_v12 = vpop.eup %1660  ;;  %v1263_v15 = vmul.f32 %v1659_v11, %v1657_v10 }
 0x76a   :  { %v1262_v16 = vmul.f32 %v1661_v12, %v2436_v23  ;;  %v1663_v32 = vpop.eup %1662 }
 0x76c   :  { %v1264_v20 = vadd.f32 %v1263_v15, %v1262_v16 }
 0x76e   :  { %1664 = vtanh.f32 %v1264_v20  ;;  %v1273_v31 = vsel %vm1271_vm14, %v1264_v20, %v2436_v23 }
 0x778   :  { %v1665_v33 = vpop.eup %1664 }
 0x779   :  { %v1266_v35 = vmul.f32 %v1665_v33, %v1663_v32 }
 0x77b   :  { %v1272_v57 = vsel %vm1271_vm14, %v1266_v35, %v2439_v29  ;;  %v1274_v36 = vsel %vm1271_vm14, %v1266_v35, 0.0 }
 0x77c   :  { %v1275_v37 = vpack.c.bf16 %v1274_v36, %v1274_v36  ;;  %v1282_v49 = vpack.c.bf16 %v1272_v57, %v1272_v57 }
 0x77e   :  { %1496 = vst [vmem:[%s2500_s5 + $0x6] sm:$0x1] %v1275_v37  ;;  %1316 = vmatmul.mubr.bf16.vlgmr.msra.gmra.mrb[28].mxu0 %v1282_v49  ;;  %1357 = vmatmul.mubr.bf16.vlgmr.msra.gmra.mrb[28].mxu1 %v1282_v49 }
 0x851   :  { %v1317_v39 = vpop.f32.mrb[28].mxu0  ;;  %v1358_v50 = vpop.f32.mrb[28].mxu1 }
 0x852   :  { %v1319_v54 = vpop.f32.mrb[29].mxu0  ;;  %v1360_v52 = vpop.f32.mrb[29].mxu1 }
 0x853   :  { %v1369_v55 = vcombine.low %v1317_v39, %v1319_v54  ;;  %v1370_v56 = vcombine.low %v1358_v50, %v1360_v52  ;;  %v1321_v59 = vpop.f32.mrb[30].mxu0  ;;  %v1362_v17 = vpop.f32.mrb[30].mxu1 }
 0x854   :  { %v1322_v18 = vpop.f32.mrb[31].mxu0  ;;  %v1363_v19 = vpop.f32.mrb[31].mxu1 }
 0x855   :  { %v1377_v21 = vrot.slane %v1369_v55, %v1998_v47  ;;  %v1384_v23 = vrot.slane %v1370_v56, %v1998_v47 }
 0x857   :  { %v1385_v24 = vcombine.low %v1377_v21, %v1384_v23 }
 0x859   :  { %v1387_v25 = vadd.f32 %v1385_v24, %v1281_v22 }
 0x85b   :  { %v1498_v26 = vmul.f32 -1.442695, %v1387_v25  ;;  %v1395_v29 = vrot.slane %v1387_v25, 2  ;;  %v1406_v3 = vrot.slane %v1387_v25, 6  ;;  %v1403_v51 = vrot.slane %v1387_v25, 4 }
 0x85d   :  { %1666 = vpow2.f32 %v1498_v26  ;;  %v1499_v30 = vmul.f32 -1.442695, %v1395_v29  ;;  %v1500_v4 = vmul.f32 -1.442695, %v1406_v3 }
 0x85f   :  { %1668 = vpow2.f32 %v1499_v30 }
 0x860   :  { %1670 = vpow2.f32 %v1500_v4 }
 0x867   :  { %v1667_v1 = vpop.eup %1666 }
 0x868   :  { %v1391_v53 = vadd.f32 1.0, %v1667_v1 }
 0x869   :  { %v1669_v60 = vpop.eup %1668 }
 0x86a   :  { %1672 = vrcp.f32 %v1391_v53  ;;  %v1400_v61 = vadd.f32 1.0, %v1669_v60  ;;  %v1671_v62 = vpop.eup %1670 }
 0x86b   :  { %1674 = vtanh.f32 %v1403_v51  ;;  %v1411_v44 = vadd.f32 1.0, %v1671_v62 }
 0x86c   :  { %1676 = vrcp.f32 %v1400_v61 }
 0x86d   :  { %1678 = vrcp.f32 %v1411_v44 }
 0x874   :  { %v1673_v47 = vpop.eup %1672 }
 0x875   :  { %v1675_v63 = vpop.eup %1674 }
 0x876   :  { %v1677_v28 = vpop.eup %1676  ;;  %v1415_v34 = vmul.f32 %v1675_v63, %v1673_v47 }
 0x877   :  { %v1414_v48 = vmul.f32 %v1677_v28, %v1273_v31  ;;  %v1679_v40 = vpop.eup %1678 }
 0x879   :  { %v1416_v38 = vadd.f32 %v1415_v34, %v1414_v48 }
 0x87b   :  { %1680 = vtanh.f32 %v1416_v38 }
 0x885   :  { %v1681_v42 = vpop.eup %1680 }
 0x886   :  { %v1418_v43 = vmul.f32 %v1681_v42, %v1679_v40 }
 0x888   :  { %v1424_v45 = vsel %vm1423_vm15, %v1418_v43, 0.0 }
 0x889   :  { %v1425_v46 = vpack.c.bf16 %v1424_v45, %v1424_v45 }
 0x88b   :  { %1501 = vst [vmem:[%s2500_s5 + $0x7] sm:$0x1] %v1425_v46 }

</bundles_post_ra>
